<compile_context>
chip_gen: v5e
topology: v5e:2x2
jax: 0.10.0
libtpu: 0.0.40
codegen_flags: <defaults>
</compile_context>

<pallas_src>
import functools

import jax
import jax.numpy as jnp
from jax import lax
from jax.experimental import pallas as pl
from jax.experimental.pallas import tpu as pltpu


# ----------------------------- in-kernel PRNG ------------------------------

def _fmix32(x):
    """murmur3 finalizer: uint32 -> well-mixed uint32 (plain VPU integer ops)."""
    x = x ^ (x >> jnp.uint32(16))
    x = x * jnp.uint32(0x7FEB352D)
    x = x ^ (x >> jnp.uint32(15))
    x = x * jnp.uint32(0x846CA68B)
    x = x ^ (x >> jnp.uint32(16))
    return x


def _apply_dropout(y, seed_u32, salt, p):
    """Inverted dropout on a 2-D fp32 array, fused into the caller's epilogue.

    mask = hash(linear element index, seed, salt) compared against an integer
    threshold; keep prob = 1 - round(p*2^24)/2^24 (negligible quantization of p).
    Uses only jnp integer ops -> lowers on Mosaic and in interpret mode alike.
    """
    p = float(p)
    if p <= 0.0:
        return y
    if p >= 1.0:
        return jnp.zeros_like(y)
    thresh = jnp.uint32(min(int(round(p * (1 << 24))), (1 << 24) - 1))
    rows = lax.broadcasted_iota(jnp.int32, y.shape, 0).astype(jnp.uint32)
    cols = lax.broadcasted_iota(jnp.int32, y.shape, 1).astype(jnp.uint32)
    idx = rows * jnp.uint32(y.shape[1]) + cols
    key = (seed_u32 + jnp.uint32(salt)) * jnp.uint32(0x9E3779B1)
    h = _fmix32(idx * jnp.uint32(0x85EBCA6B) + key)
    keep = (h & jnp.uint32(0x00FFFFFF)) >= thresh          # integer compare
    return jnp.where(keep, y * jnp.float32(1.0 / (1.0 - p)), jnp.float32(0.0))


# ------------------------------ Pallas kernels -----------------------------

def _input_dropout_kernel(seed_ref, x_ref, o_ref, *, p, salt):
    seed = seed_ref[0].astype(jnp.uint32)
    o_ref[...] = _apply_dropout(x_ref[...], seed, salt, p)


def _conv_gemm_kernel(seed_ref, w_ref, p_ref, b_ref, o_ref, *, drops):
    # (Cout, K) @ (K, B*Ho*Wo) : spatial on lanes -> lane-dense output.
    seed = seed_ref[0].astype(jnp.uint32)
    acc = jnp.dot(w_ref[...], p_ref[...], preferred_element_type=jnp.float32)
    acc = jnp.maximum(acc + b_ref[...], 0.0)           # bias (Cout,1) + ReLU
    for p, salt in drops:
        acc = _apply_dropout(acc, seed, salt, p)
    o_ref[...] = acc


def _pool_dropout_kernel(seed_ref, a_ref, b_ref, c_ref, d_ref, o_ref, *, drops):
    seed = seed_ref[0].astype(jnp.uint32)
    m = jnp.maximum(jnp.maximum(a_ref[...], b_ref[...]),
                    jnp.maximum(c_ref[...], d_ref[...]))
    for p, salt in drops:
        m = _apply_dropout(m, seed, salt, p)
    o_ref[...] = m


def _fc_stack_kernel(seed_ref, x_ref, w1_ref, b1_ref, w2_ref, b2_ref,
                     w3_ref, b3_ref, o_ref, *, p1, p2, salts):
    seed = seed_ref[0].astype(jnp.uint32)

    def mm(a, w_ref_):
        return jnp.dot(a.astype(jnp.bfloat16), w_ref_[...],
                       preferred_element_type=jnp.float32)

    h = jnp.maximum(mm(x_ref[...], w1_ref) + b1_ref[...], 0.0)
    h = _apply_dropout(h, seed, salts[0], p2)
    h = _apply_dropout(h, seed, salts[1], p1)
    h = jnp.maximum(mm(h, w2_ref) + b2_ref[...], 0.0)
    h = _apply_dropout(h, seed, salts[2], p2)
    o_ref[...] = mm(h, w3_ref) + b3_ref[...]


# ------------------------------ wrappers / glue -----------------------------

def _vmem():
    return pl.BlockSpec(memory_space=pltpu.MemorySpace.VMEM)


def _smem():
    return pl.BlockSpec(memory_space=pltpu.MemorySpace.SMEM)


def dropout_input(x, p, seed_arr, salt):
    """dropout(x, p) for the raw input, on a lane-dense 2-D view."""
    if float(p) <= 0.0:
        return x
    shape = x.shape
    lanes = 128 if (x.size % 128 == 0) else shape[-1]
    x2 = x.reshape(-1, lanes)
    out = pl.pallas_call(
        functools.partial(_input_dropout_kernel, p=float(p), salt=salt),
        out_shape=jax.ShapeDtypeStruct(x2.shape, jnp.float32),
        in_specs=[_smem(), _vmem()],
        out_specs=_vmem(),
    )(seed_arr, x2)
    return out.reshape(shape)


def _im2col_T(x_nchw, k):
    """(B,C,H,W) -> (C*k*k, B*Ho*Wo); feature order (ci,ky,kx) matches
    PyTorch w.reshape(Cout, Cin*KH*KW)."""
    B, C, H, W = x_nchw.shape
    Ho, Wo = H - k + 1, W - k + 1
    cols = [x_nchw[:, :, ky:ky + Ho, kx:kx + Wo]
            for ky in range(k) for kx in range(k)]       # each (B,C,Ho,Wo)
    p = jnp.stack(cols, axis=2)                          # (B, C, k*k, Ho, Wo)
    p = p.reshape(B, C * k * k, Ho * Wo)
    p = p.transpose(1, 0, 2).reshape(C * k * k, B * Ho * Wo)
    return p, Ho, Wo


def conv2d_relu_dropout(x_nchw, w, b, seed_arr, drops):
    """valid conv (stride 1) + bias + ReLU + fused dropouts, as a single
    lane-dense GEMM kernel: (Cout,K) @ (K, B*Ho*Wo)."""
    Cout, Cin, k, _ = w.shape
    B = x_nchw.shape[0]
    patches, Ho, Wo = _im2col_T(x_nchw, k)
    patches = patches.astype(jnp.bfloat16)               # halve DMA, MXU-native
    wm = w.reshape(Cout, Cin * k * k).astype(jnp.bfloat16)
    bm = b.reshape(Cout, 1).astype(jnp.float32)
    out = pl.pallas_call(
        functools.partial(_conv_gemm_kernel, drops=drops),
        out_shape=jax.ShapeDtypeStruct((Cout, B * Ho * Wo), jnp.float32),
        in_specs=[_smem(), _vmem(), _vmem(), _vmem()],
        out_specs=_vmem(),
    )(seed_arr, wm, patches, bm)
    return out.reshape(Cout, B, Ho, Wo).transpose(1, 0, 2, 3)   # back to NCHW


def maxpool2x2_dropout(x_nchw, seed_arr, drops, out_rows):
    """F.max_pool2d(x, 2) + fused dropouts. The four 2x2-phase views are XLA
    glue; the max-reduce and both dropouts run in one kernel."""
    B, C, H, W = x_nchw.shape
    Ho, Wo = H // 2, W // 2

    def sl(dy, dx):
        return x_nchw[:, :, dy::2, dx::2].reshape(out_rows, -1)

    a, b_, c, d = sl(0, 0), sl(0, 1), sl(1, 0), sl(1, 1)
    out = pl.pallas_call(
        functools.partial(_pool_dropout_kernel, drops=drops),
        out_shape=jax.ShapeDtypeStruct(a.shape, jnp.float32),
        in_specs=[_smem()] + [_vmem()] * 4,
        out_specs=_vmem(),
    )(seed_arr, a, b_, c, d)
    return out.reshape(B, C, Ho, Wo)


def fc_stack(x2d, params, seed_arr, p1, p2):
    """fc1 + ReLU + dropout(p2) + dropout(p1) + fc2 + ReLU + dropout(p2) + fc3,
    fully fused in one kernel."""
    B = x2d.shape[0]
    N = params["wf3"].shape[1]
    w1 = params["wf1"].astype(jnp.bfloat16)
    w2 = params["wf2"].astype(jnp.bfloat16)
    w3 = params["wf3"].astype(jnp.bfloat16)
    return pl.pallas_call(
        functools.partial(_fc_stack_kernel, p1=float(p1), p2=float(p2),
                          salts=(9, 10, 11)),
        out_shape=jax.ShapeDtypeStruct((B, N), jnp.float32),
        in_specs=[_smem()] + [_vmem()] * 7,
        out_specs=_vmem(),
    )(seed_arr, x2d, w1, params["bf1"], w2, params["bf2"], w3, params["bf3"])


# ------------------------------- forward pass -------------------------------

def lenet_forward(x, params, p0, p1, p2, seed=0):
    seed_arr = jnp.asarray(seed, jnp.int32).reshape((1,))
    out = dropout_input(x, p0, seed_arr, salt=0)
    out = conv2d_relu_dropout(out, params["w1"], params["b1"], seed_arr,
                              drops=((p2, 1), (p1, 2)))
    B, C = out.shape[0], out.shape[1]
    out = maxpool2x2_dropout(out, seed_arr, drops=((p2, 3), (p1, 4)),
                             out_rows=B * C)
    out = conv2d_relu_dropout(out, params["w2"], params["b2"], seed_arr,
                              drops=((p2, 5), (p1, 6)))
    out = maxpool2x2_dropout(out, seed_arr, drops=((p2, 7), (p1, 8)),
                             out_rows=B)                      # lane-dense (B,400)
    out = out.reshape(B, -1)                                   # (B, 16*5*5)
    return fc_stack(out, params, seed_arr, p1, p2)


def init_params(key):
    ks = jax.random.split(key, 10)

    def u(k, shape, fan_in):
        bound = 1.0 / float(fan_in) ** 0.5
        return jax.random.uniform(k, shape, jnp.float32, -bound, bound)

    return {
        "w1": u(ks[0], (6, 3, 5, 5), 3 * 25),
        "b1": u(ks[1], (6,), 3 * 25),
        "w2": u(ks[2], (16, 6, 5, 5), 6 * 25),
        "b2": u(ks[3], (16,), 6 * 25),
        "wf1": u(ks[4], (16 * 5 * 5, 120), 16 * 5 * 5),   # PyTorch weight.T
        "bf1": u(ks[5], (1, 120), 16 * 5 * 5),
        "wf2": u(ks[6], (120, 84), 120),
        "bf2": u(ks[7], (1, 84), 120),
        "wf3": u(ks[8], (84, 10), 84),
        "bf3": u(ks[9], (1, 10), 84),
    }


if __name__ == "__main__":
    key = jax.random.PRNGKey(0)
    kx, kp = jax.random.split(key)
    # Input must be 3x32x32 so that after two 5x5 convs + two 2x2 pools the
    # flattened size is exactly 16*5*5 = 400 (required by fc1).
    x = jax.random.normal(kx, (2, 3, 32, 32), jnp.float32)     # NCHW
    params = init_params(kp)

    p0, p1, p2 = 0.1, 0.2, 0.25
    fwd = jax.jit(lambda xx, pp, seed: lenet_forward(xx, pp, p0, p1, p2, seed))
    out = fwd(x, params, jnp.int32(0))
    out = jax.block_until_ready(out)
    assert out.shape == (2, 10) and out.dtype == jnp.float32
    print("KERNEL_OK")
</pallas_src>

<mosaic_0001>
module attributes {stable_mosaic.version = 11 : i64} {
  func.func @_input_dropout_kernel(%arg0: memref<1xi32, #tpu.memory_space<smem>>, %arg1: memref<48x128xf32, #tpu.memory_space<vmem>>, %arg2: memref<48x128xf32, #tpu.memory_space<vmem>>) attributes {dimension_semantics = [], scalar_prefetch = 0 : i64, scratch_operands = 0 : i64, tpu.core_type = #tpu.core_type<tc>} {
    %c0 = arith.constant 0 : index
    %0 = memref.load %arg0[%c0] : memref<1xi32, #tpu.memory_space<smem>>
    %c0_0 = arith.constant 0 : index
    %c0_1 = arith.constant 0 : index
    %1 = vector.load %arg1[%c0_0, %c0_1] : memref<48x128xf32, #tpu.memory_space<vmem>>, vector<48x128xf32>
    %2 = tpu.iota {dimensions = array<i32: 0>} : vector<48x128xi32>
    %3 = tpu.iota {dimensions = array<i32: 1>} : vector<48x128xi32>
    %c128_i32 = arith.constant 128 : i32
    %4 = vector.broadcast %c128_i32 : i32 to vector<48x128xi32>
    %5 = arith.muli %2, %4 : vector<48x128xi32>
    %6 = arith.addi %5, %3 : vector<48x128xi32>
    %c0_i32 = arith.constant 0 : i32
    %7 = arith.addi %0, %c0_i32 : i32
    %c-1640531535_i32 = arith.constant -1640531535 : i32
    %8 = arith.muli %7, %c-1640531535_i32 : i32
    %c-2048144789_i32 = arith.constant -2048144789 : i32
    %9 = vector.broadcast %c-2048144789_i32 : i32 to vector<48x128xi32>
    %10 = arith.muli %6, %9 : vector<48x128xi32>
    %11 = vector.broadcast %8 : i32 to vector<48x128xi32>
    %12 = arith.addi %10, %11 : vector<48x128xi32>
    %c16_i32 = arith.constant 16 : i32
    %13 = vector.broadcast %c16_i32 : i32 to vector<48x128xi32>
    %14 = arith.shrui %12, %13 : vector<48x128xi32>
    %15 = arith.xori %12, %14 : vector<48x128xi32>
    %c2146121005_i32 = arith.constant 2146121005 : i32
    %16 = vector.broadcast %c2146121005_i32 : i32 to vector<48x128xi32>
    %17 = arith.muli %15, %16 : vector<48x128xi32>
    %c15_i32 = arith.constant 15 : i32
    %18 = vector.broadcast %c15_i32 : i32 to vector<48x128xi32>
    %19 = arith.shrui %17, %18 : vector<48x128xi32>
    %20 = arith.xori %17, %19 : vector<48x128xi32>
    %c-2073254261_i32 = arith.constant -2073254261 : i32
    %21 = vector.broadcast %c-2073254261_i32 : i32 to vector<48x128xi32>
    %22 = arith.muli %20, %21 : vector<48x128xi32>
    %c16_i32_2 = arith.constant 16 : i32
    %23 = vector.broadcast %c16_i32_2 : i32 to vector<48x128xi32>
    %24 = arith.shrui %22, %23 : vector<48x128xi32>
    %25 = arith.xori %22, %24 : vector<48x128xi32>
    %c16777215_i32 = arith.constant 16777215 : i32
    %26 = vector.broadcast %c16777215_i32 : i32 to vector<48x128xi32>
    %27 = arith.andi %25, %26 : vector<48x128xi32>
    %c1677722_i32 = arith.constant 1677722 : i32
    %28 = vector.broadcast %c1677722_i32 : i32 to vector<48x128xi32>
    %29 = arith.cmpi uge, %27, %28 : vector<48x128xi32>
    %cst = arith.constant 1.11111116 : f32
    %30 = vector.broadcast %cst : f32 to vector<48x128xf32>
    %31 = arith.mulf %1, %30 : vector<48x128xf32>
    %cst_3 = arith.constant 0.000000e+00 : f32
    %32 = vector.broadcast %cst_3 : f32 to vector<48x128xf32>
    %33 = arith.select %29, %31, %32 : vector<48x128xi1>, vector<48x128xf32>
    %c0_4 = arith.constant 0 : index
    %c0_5 = arith.constant 0 : index
    %34 = vector.load %arg2[%c0_4, %c0_5] : memref<48x128xf32, #tpu.memory_space<vmem>>, vector<48x128xf32>
    tpu.vector_store %arg2[%c0_4, %c0_5], %33 {strides = array<i32>} : memref<48x128xf32, #tpu.memory_space<vmem>>, vector<48x128xf32>,
    return
  }
}

module attributes {stable_mosaic.version = 11 : i64} {
  func.func @_conv_gemm_kernel(%arg0: memref<1xi32, #tpu.memory_space<smem>>, %arg1: memref<6x75xbf16, #tpu.memory_space<vmem>>, %arg2: memref<75x1568xbf16, #tpu.memory_space<vmem>>, %arg3: memref<6x1xf32, #tpu.memory_space<vmem>>, %arg4: memref<6x1568xf32, #tpu.memory_space<vmem>>) attributes {dimension_semantics = [], scalar_prefetch = 0 : i64, scratch_operands = 0 : i64, tpu.core_type = #tpu.core_type<tc>} {
    %c0 = arith.constant 0 : index
    %0 = memref.load %arg0[%c0] : memref<1xi32, #tpu.memory_space<smem>>
    %c0_0 = arith.constant 0 : index
    %c0_1 = arith.constant 0 : index
    %1 = vector.load %arg1[%c0_0, %c0_1] : memref<6x75xbf16, #tpu.memory_space<vmem>>, vector<6x75xbf16>
    %c0_2 = arith.constant 0 : index
    %c0_3 = arith.constant 0 : index
    %2 = vector.load %arg2[%c0_2, %c0_3] : memref<75x1568xbf16, #tpu.memory_space<vmem>>, vector<75x1568xbf16>
    %cst = arith.constant dense<0.000000e+00> : vector<6x1568xf32>
    %3 = tpu.matmul %1, %2, %cst {dimension_numbers = #tpu.dot_dimension_numbers<[1], [0], [0], [1], [0, 0, 1, 1], [], []>} : vector<6x75xbf16>, vector<75x1568xbf16>, vector<6x1568xf32> -> vector<6x1568xf32>
    %c0_4 = arith.constant 0 : index
    %c0_5 = arith.constant 0 : index
    %4 = vector.load %arg3[%c0_4, %c0_5] : memref<6x1xf32, #tpu.memory_space<vmem>>, vector<6x1xf32>
    %5 = vector.broadcast %4 : vector<6x1xf32> to vector<6x1568xf32>
    %6 = arith.addf %3, %5 : vector<6x1568xf32>
    %cst_6 = arith.constant 0.000000e+00 : f32
    %7 = vector.broadcast %cst_6 : f32 to vector<6x1568xf32>
    %8 = arith.maximumf %6, %7 : vector<6x1568xf32>
    %9 = tpu.iota {dimensions = array<i32: 0>} : vector<6x1568xi32>
    %10 = tpu.iota {dimensions = array<i32: 1>} : vector<6x1568xi32>
    %c1568_i32 = arith.constant 1568 : i32
    %11 = vector.broadcast %c1568_i32 : i32 to vector<6x1568xi32>
    %12 = arith.muli %9, %11 : vector<6x1568xi32>
    %13 = arith.addi %12, %10 : vector<6x1568xi32>
    %c1_i32 = arith.constant 1 : i32
    %14 = arith.addi %0, %c1_i32 : i32
    %c-1640531535_i32 = arith.constant -1640531535 : i32
    %15 = arith.muli %14, %c-1640531535_i32 : i32
    %c-2048144789_i32 = arith.constant -2048144789 : i32
    %16 = vector.broadcast %c-2048144789_i32 : i32 to vector<6x1568xi32>
    %17 = arith.muli %13, %16 : vector<6x1568xi32>
    %18 = vector.broadcast %15 : i32 to vector<6x1568xi32>
    %19 = arith.addi %17, %18 : vector<6x1568xi32>
    %c16_i32 = arith.constant 16 : i32
    %20 = vector.broadcast %c16_i32 : i32 to vector<6x1568xi32>
    %21 = arith.shrui %19, %20 : vector<6x1568xi32>
    %22 = arith.xori %19, %21 : vector<6x1568xi32>
    %c2146121005_i32 = arith.constant 2146121005 : i32
    %23 = vector.broadcast %c2146121005_i32 : i32 to vector<6x1568xi32>
    %24 = arith.muli %22, %23 : vector<6x1568xi32>
    %c15_i32 = arith.constant 15 : i32
    %25 = vector.broadcast %c15_i32 : i32 to vector<6x1568xi32>
    %26 = arith.shrui %24, %25 : vector<6x1568xi32>
    %27 = arith.xori %24, %26 : vector<6x1568xi32>
    %c-2073254261_i32 = arith.constant -2073254261 : i32
    %28 = vector.broadcast %c-2073254261_i32 : i32 to vector<6x1568xi32>
    %29 = arith.muli %27, %28 : vector<6x1568xi32>
    %c16_i32_7 = arith.constant 16 : i32
    %30 = vector.broadcast %c16_i32_7 : i32 to vector<6x1568xi32>
    %31 = arith.shrui %29, %30 : vector<6x1568xi32>
    %32 = arith.xori %29, %31 : vector<6x1568xi32>
    %c16777215_i32 = arith.constant 16777215 : i32
    %33 = vector.broadcast %c16777215_i32 : i32 to vector<6x1568xi32>
    %34 = arith.andi %32, %33 : vector<6x1568xi32>
    %c4194304_i32 = arith.constant 4194304 : i32
    %35 = vector.broadcast %c4194304_i32 : i32 to vector<6x1568xi32>
    %36 = arith.cmpi uge, %34, %35 : vector<6x1568xi32>
    %cst_8 = arith.constant 1.33333337 : f32
    %37 = vector.broadcast %cst_8 : f32 to vector<6x1568xf32>
    %38 = arith.mulf %8, %37 : vector<6x1568xf32>
    %cst_9 = arith.constant 0.000000e+00 : f32
    %39 = vector.broadcast %cst_9 : f32 to vector<6x1568xf32>
    %40 = arith.select %36, %38, %39 : vector<6x1568xi1>, vector<6x1568xf32>
    %41 = tpu.iota {dimensions = array<i32: 0>} : vector<6x1568xi32>
    %42 = tpu.iota {dimensions = array<i32: 1>} : vector<6x1568xi32>
    %c1568_i32_10 = arith.constant 1568 : i32
    %43 = vector.broadcast %c1568_i32_10 : i32 to vector<6x1568xi32>
    %44 = arith.muli %41, %43 : vector<6x1568xi32>
    %45 = arith.addi %44, %42 : vector<6x1568xi32>
    %c2_i32 = arith.constant 2 : i32
    %46 = arith.addi %0, %c2_i32 : i32
    %c-1640531535_i32_11 = arith.constant -1640531535 : i32
    %47 = arith.muli %46, %c-1640531535_i32_11 : i32
    %c-2048144789_i32_12 = arith.constant -2048144789 : i32
    %48 = vector.broadcast %c-2048144789_i32_12 : i32 to vector<6x1568xi32>
    %49 = arith.muli %45, %48 : vector<6x1568xi32>
    %50 = vector.broadcast %47 : i32 to vector<6x1568xi32>
    %51 = arith.addi %49, %50 : vector<6x1568xi32>
    %c16_i32_13 = arith.constant 16 : i32
    %52 = vector.broadcast %c16_i32_13 : i32 to vector<6x1568xi32>
    %53 = arith.shrui %51, %52 : vector<6x1568xi32>
    %54 = arith.xori %51, %53 : vector<6x1568xi32>
    %c2146121005_i32_14 = arith.constant 2146121005 : i32
    %55 = vector.broadcast %c2146121005_i32_14 : i32 to vector<6x1568xi32>
    %56 = arith.muli %54, %55 : vector<6x1568xi32>
    %c15_i32_15 = arith.constant 15 : i32
    %57 = vector.broadcast %c15_i32_15 : i32 to vector<6x1568xi32>
    %58 = arith.shrui %56, %57 : vector<6x1568xi32>
    %59 = arith.xori %56, %58 : vector<6x1568xi32>
    %c-2073254261_i32_16 = arith.constant -2073254261 : i32
    %60 = vector.broadcast %c-2073254261_i32_16 : i32 to vector<6x1568xi32>
    %61 = arith.muli %59, %60 : vector<6x1568xi32>
    %c16_i32_17 = arith.constant 16 : i32
    %62 = vector.broadcast %c16_i32_17 : i32 to vector<6x1568xi32>
    %63 = arith.shrui %61, %62 : vector<6x1568xi32>
    %64 = arith.xori %61, %63 : vector<6x1568xi32>
    %c16777215_i32_18 = arith.constant 16777215 : i32
    %65 = vector.broadcast %c16777215_i32_18 : i32 to vector<6x1568xi32>
    %66 = arith.andi %64, %65 : vector<6x1568xi32>
    %c3355443_i32 = arith.constant 3355443 : i32
    %67 = vector.broadcast %c3355443_i32 : i32 to vector<6x1568xi32>
    %68 = arith.cmpi uge, %66, %67 : vector<6x1568xi32>
    %cst_19 = arith.constant 1.250000e+00 : f32
    %69 = vector.broadcast %cst_19 : f32 to vector<6x1568xf32>
    %70 = arith.mulf %40, %69 : vector<6x1568xf32>
    %cst_20 = arith.constant 0.000000e+00 : f32
    %71 = vector.broadcast %cst_20 : f32 to vector<6x1568xf32>
    %72 = arith.select %68, %70, %71 : vector<6x1568xi1>, vector<6x1568xf32>
    %c0_21 = arith.constant 0 : index
    %c0_22 = arith.constant 0 : index
    %73 = vector.load %arg4[%c0_21, %c0_22] : memref<6x1568xf32, #tpu.memory_space<vmem>>, vector<6x1568xf32>
    tpu.vector_store %arg4[%c0_21, %c0_22], %72 {strides = array<i32>} : memref<6x1568xf32, #tpu.memory_space<vmem>>, vector<6x1568xf32>,
    return
  }
}

module attributes {stable_mosaic.version = 11 : i64} {
  func.func @_pool_dropout_kernel(%arg0: memref<1xi32, #tpu.memory_space<smem>>, %arg1: memref<12x196xf32, #tpu.memory_space<vmem>>, %arg2: memref<12x196xf32, #tpu.memory_space<vmem>>, %arg3: memref<12x196xf32, #tpu.memory_space<vmem>>, %arg4: memref<12x196xf32, #tpu.memory_space<vmem>>, %arg5: memref<12x196xf32, #tpu.memory_space<vmem>>) attributes {dimension_semantics = [], scalar_prefetch = 0 : i64, scratch_operands = 0 : i64, tpu.core_type = #tpu.core_type<tc>} {
    %c0 = arith.constant 0 : index
    %0 = memref.load %arg0[%c0] : memref<1xi32, #tpu.memory_space<smem>>
    %c0_0 = arith.constant 0 : index
    %c0_1 = arith.constant 0 : index
    %1 = vector.load %arg1[%c0_0, %c0_1] : memref<12x196xf32, #tpu.memory_space<vmem>>, vector<12x196xf32>
    %c0_2 = arith.constant 0 : index
    %c0_3 = arith.constant 0 : index
    %2 = vector.load %arg2[%c0_2, %c0_3] : memref<12x196xf32, #tpu.memory_space<vmem>>, vector<12x196xf32>
    %3 = arith.maximumf %1, %2 : vector<12x196xf32>
    %c0_4 = arith.constant 0 : index
    %c0_5 = arith.constant 0 : index
    %4 = vector.load %arg3[%c0_4, %c0_5] : memref<12x196xf32, #tpu.memory_space<vmem>>, vector<12x196xf32>
    %c0_6 = arith.constant 0 : index
    %c0_7 = arith.constant 0 : index
    %5 = vector.load %arg4[%c0_6, %c0_7] : memref<12x196xf32, #tpu.memory_space<vmem>>, vector<12x196xf32>
    %6 = arith.maximumf %4, %5 : vector<12x196xf32>
    %7 = arith.maximumf %3, %6 : vector<12x196xf32>
    %8 = tpu.iota {dimensions = array<i32: 0>} : vector<12x196xi32>
    %9 = tpu.iota {dimensions = array<i32: 1>} : vector<12x196xi32>
    %c196_i32 = arith.constant 196 : i32
    %10 = vector.broadcast %c196_i32 : i32 to vector<12x196xi32>
    %11 = arith.muli %8, %10 : vector<12x196xi32>
    %12 = arith.addi %11, %9 : vector<12x196xi32>
    %c3_i32 = arith.constant 3 : i32
    %13 = arith.addi %0, %c3_i32 : i32
    %c-1640531535_i32 = arith.constant -1640531535 : i32
    %14 = arith.muli %13, %c-1640531535_i32 : i32
    %c-2048144789_i32 = arith.constant -2048144789 : i32
    %15 = vector.broadcast %c-2048144789_i32 : i32 to vector<12x196xi32>
    %16 = arith.muli %12, %15 : vector<12x196xi32>
    %17 = vector.broadcast %14 : i32 to vector<12x196xi32>
    %18 = arith.addi %16, %17 : vector<12x196xi32>
    %c16_i32 = arith.constant 16 : i32
    %19 = vector.broadcast %c16_i32 : i32 to vector<12x196xi32>
    %20 = arith.shrui %18, %19 : vector<12x196xi32>
    %21 = arith.xori %18, %20 : vector<12x196xi32>
    %c2146121005_i32 = arith.constant 2146121005 : i32
    %22 = vector.broadcast %c2146121005_i32 : i32 to vector<12x196xi32>
    %23 = arith.muli %21, %22 : vector<12x196xi32>
    %c15_i32 = arith.constant 15 : i32
    %24 = vector.broadcast %c15_i32 : i32 to vector<12x196xi32>
    %25 = arith.shrui %23, %24 : vector<12x196xi32>
    %26 = arith.xori %23, %25 : vector<12x196xi32>
    %c-2073254261_i32 = arith.constant -2073254261 : i32
    %27 = vector.broadcast %c-2073254261_i32 : i32 to vector<12x196xi32>
    %28 = arith.muli %26, %27 : vector<12x196xi32>
    %c16_i32_8 = arith.constant 16 : i32
    %29 = vector.broadcast %c16_i32_8 : i32 to vector<12x196xi32>
    %30 = arith.shrui %28, %29 : vector<12x196xi32>
    %31 = arith.xori %28, %30 : vector<12x196xi32>
    %c16777215_i32 = arith.constant 16777215 : i32
    %32 = vector.broadcast %c16777215_i32 : i32 to vector<12x196xi32>
    %33 = arith.andi %31, %32 : vector<12x196xi32>
    %c4194304_i32 = arith.constant 4194304 : i32
    %34 = vector.broadcast %c4194304_i32 : i32 to vector<12x196xi32>
    %35 = arith.cmpi uge, %33, %34 : vector<12x196xi32>
    %cst = arith.constant 1.33333337 : f32
    %36 = vector.broadcast %cst : f32 to vector<12x196xf32>
    %37 = arith.mulf %7, %36 : vector<12x196xf32>
    %cst_9 = arith.constant 0.000000e+00 : f32
    %38 = vector.broadcast %cst_9 : f32 to vector<12x196xf32>
    %39 = arith.select %35, %37, %38 : vector<12x196xi1>, vector<12x196xf32>
    %40 = tpu.iota {dimensions = array<i32: 0>} : vector<12x196xi32>
    %41 = tpu.iota {dimensions = array<i32: 1>} : vector<12x196xi32>
    %c196_i32_10 = arith.constant 196 : i32
    %42 = vector.broadcast %c196_i32_10 : i32 to vector<12x196xi32>
    %43 = arith.muli %40, %42 : vector<12x196xi32>
    %44 = arith.addi %43, %41 : vector<12x196xi32>
    %c4_i32 = arith.constant 4 : i32
    %45 = arith.addi %0, %c4_i32 : i32
    %c-1640531535_i32_11 = arith.constant -1640531535 : i32
    %46 = arith.muli %45, %c-1640531535_i32_11 : i32
    %c-2048144789_i32_12 = arith.constant -2048144789 : i32
    %47 = vector.broadcast %c-2048144789_i32_12 : i32 to vector<12x196xi32>
    %48 = arith.muli %44, %47 : vector<12x196xi32>
    %49 = vector.broadcast %46 : i32 to vector<12x196xi32>
    %50 = arith.addi %48, %49 : vector<12x196xi32>
    %c16_i32_13 = arith.constant 16 : i32
    %51 = vector.broadcast %c16_i32_13 : i32 to vector<12x196xi32>
    %52 = arith.shrui %50, %51 : vector<12x196xi32>
    %53 = arith.xori %50, %52 : vector<12x196xi32>
    %c2146121005_i32_14 = arith.constant 2146121005 : i32
    %54 = vector.broadcast %c2146121005_i32_14 : i32 to vector<12x196xi32>
    %55 = arith.muli %53, %54 : vector<12x196xi32>
    %c15_i32_15 = arith.constant 15 : i32
    %56 = vector.broadcast %c15_i32_15 : i32 to vector<12x196xi32>
    %57 = arith.shrui %55, %56 : vector<12x196xi32>
    %58 = arith.xori %55, %57 : vector<12x196xi32>
    %c-2073254261_i32_16 = arith.constant -2073254261 : i32
    %59 = vector.broadcast %c-2073254261_i32_16 : i32 to vector<12x196xi32>
    %60 = arith.muli %58, %59 : vector<12x196xi32>
    %c16_i32_17 = arith.constant 16 : i32
    %61 = vector.broadcast %c16_i32_17 : i32 to vector<12x196xi32>
    %62 = arith.shrui %60, %61 : vector<12x196xi32>
    %63 = arith.xori %60, %62 : vector<12x196xi32>
    %c16777215_i32_18 = arith.constant 16777215 : i32
    %64 = vector.broadcast %c16777215_i32_18 : i32 to vector<12x196xi32>
    %65 = arith.andi %63, %64 : vector<12x196xi32>
    %c3355443_i32 = arith.constant 3355443 : i32
    %66 = vector.broadcast %c3355443_i32 : i32 to vector<12x196xi32>
    %67 = arith.cmpi uge, %65, %66 : vector<12x196xi32>
    %cst_19 = arith.constant 1.250000e+00 : f32
    %68 = vector.broadcast %cst_19 : f32 to vector<12x196xf32>
    %69 = arith.mulf %39, %68 : vector<12x196xf32>
    %cst_20 = arith.constant 0.000000e+00 : f32
    %70 = vector.broadcast %cst_20 : f32 to vector<12x196xf32>
    %71 = arith.select %67, %69, %70 : vector<12x196xi1>, vector<12x196xf32>
    %c0_21 = arith.constant 0 : index
    %c0_22 = arith.constant 0 : index
    %72 = vector.load %arg5[%c0_21, %c0_22] : memref<12x196xf32, #tpu.memory_space<vmem>>, vector<12x196xf32>
    tpu.vector_store %arg5[%c0_21, %c0_22], %71 {strides = array<i32>} : memref<12x196xf32, #tpu.memory_space<vmem>>, vector<12x196xf32>,
    return
  }
}

module attributes {stable_mosaic.version = 11 : i64} {
  func.func @_conv_gemm_kernel(%arg0: memref<1xi32, #tpu.memory_space<smem>>, %arg1: memref<16x150xbf16, #tpu.memory_space<vmem>>, %arg2: memref<150x200xbf16, #tpu.memory_space<vmem>>, %arg3: memref<16x1xf32, #tpu.memory_space<vmem>>, %arg4: memref<16x200xf32, #tpu.memory_space<vmem>>) attributes {dimension_semantics = [], scalar_prefetch = 0 : i64, scratch_operands = 0 : i64, tpu.core_type = #tpu.core_type<tc>} {
    %c0 = arith.constant 0 : index
    %0 = memref.load %arg0[%c0] : memref<1xi32, #tpu.memory_space<smem>>
    %c0_0 = arith.constant 0 : index
    %c0_1 = arith.constant 0 : index
    %1 = vector.load %arg1[%c0_0, %c0_1] : memref<16x150xbf16, #tpu.memory_space<vmem>>, vector<16x150xbf16>
    %c0_2 = arith.constant 0 : index
    %c0_3 = arith.constant 0 : index
    %2 = vector.load %arg2[%c0_2, %c0_3] : memref<150x200xbf16, #tpu.memory_space<vmem>>, vector<150x200xbf16>
    %cst = arith.constant dense<0.000000e+00> : vector<16x200xf32>
    %3 = tpu.matmul %1, %2, %cst {dimension_numbers = #tpu.dot_dimension_numbers<[1], [0], [0], [1], [0, 0, 1, 1], [], []>} : vector<16x150xbf16>, vector<150x200xbf16>, vector<16x200xf32> -> vector<16x200xf32>
    %c0_4 = arith.constant 0 : index
    %c0_5 = arith.constant 0 : index
    %4 = vector.load %arg3[%c0_4, %c0_5] : memref<16x1xf32, #tpu.memory_space<vmem>>, vector<16x1xf32>
    %5 = vector.broadcast %4 : vector<16x1xf32> to vector<16x200xf32>
    %6 = arith.addf %3, %5 : vector<16x200xf32>
    %cst_6 = arith.constant 0.000000e+00 : f32
    %7 = vector.broadcast %cst_6 : f32 to vector<16x200xf32>
    %8 = arith.maximumf %6, %7 : vector<16x200xf32>
    %9 = tpu.iota {dimensions = array<i32: 0>} : vector<16x200xi32>
    %10 = tpu.iota {dimensions = array<i32: 1>} : vector<16x200xi32>
    %c200_i32 = arith.constant 200 : i32
    %11 = vector.broadcast %c200_i32 : i32 to vector<16x200xi32>
    %12 = arith.muli %9, %11 : vector<16x200xi32>
    %13 = arith.addi %12, %10 : vector<16x200xi32>
    %c5_i32 = arith.constant 5 : i32
    %14 = arith.addi %0, %c5_i32 : i32
    %c-1640531535_i32 = arith.constant -1640531535 : i32
    %15 = arith.muli %14, %c-1640531535_i32 : i32
    %c-2048144789_i32 = arith.constant -2048144789 : i32
    %16 = vector.broadcast %c-2048144789_i32 : i32 to vector<16x200xi32>
    %17 = arith.muli %13, %16 : vector<16x200xi32>
    %18 = vector.broadcast %15 : i32 to vector<16x200xi32>
    %19 = arith.addi %17, %18 : vector<16x200xi32>
    %c16_i32 = arith.constant 16 : i32
    %20 = vector.broadcast %c16_i32 : i32 to vector<16x200xi32>
    %21 = arith.shrui %19, %20 : vector<16x200xi32>
    %22 = arith.xori %19, %21 : vector<16x200xi32>
    %c2146121005_i32 = arith.constant 2146121005 : i32
    %23 = vector.broadcast %c2146121005_i32 : i32 to vector<16x200xi32>
    %24 = arith.muli %22, %23 : vector<16x200xi32>
    %c15_i32 = arith.constant 15 : i32
    %25 = vector.broadcast %c15_i32 : i32 to vector<16x200xi32>
    %26 = arith.shrui %24, %25 : vector<16x200xi32>
    %27 = arith.xori %24, %26 : vector<16x200xi32>
    %c-2073254261_i32 = arith.constant -2073254261 : i32
    %28 = vector.broadcast %c-2073254261_i32 : i32 to vector<16x200xi32>
    %29 = arith.muli %27, %28 : vector<16x200xi32>
    %c16_i32_7 = arith.constant 16 : i32
    %30 = vector.broadcast %c16_i32_7 : i32 to vector<16x200xi32>
    %31 = arith.shrui %29, %30 : vector<16x200xi32>
    %32 = arith.xori %29, %31 : vector<16x200xi32>
    %c16777215_i32 = arith.constant 16777215 : i32
    %33 = vector.broadcast %c16777215_i32 : i32 to vector<16x200xi32>
    %34 = arith.andi %32, %33 : vector<16x200xi32>
    %c4194304_i32 = arith.constant 4194304 : i32
    %35 = vector.broadcast %c4194304_i32 : i32 to vector<16x200xi32>
    %36 = arith.cmpi uge, %34, %35 : vector<16x200xi32>
    %cst_8 = arith.constant 1.33333337 : f32
    %37 = vector.broadcast %cst_8 : f32 to vector<16x200xf32>
    %38 = arith.mulf %8, %37 : vector<16x200xf32>
    %cst_9 = arith.constant 0.000000e+00 : f32
    %39 = vector.broadcast %cst_9 : f32 to vector<16x200xf32>
    %40 = arith.select %36, %38, %39 : vector<16x200xi1>, vector<16x200xf32>
    %41 = tpu.iota {dimensions = array<i32: 0>} : vector<16x200xi32>
    %42 = tpu.iota {dimensions = array<i32: 1>} : vector<16x200xi32>
    %c200_i32_10 = arith.constant 200 : i32
    %43 = vector.broadcast %c200_i32_10 : i32 to vector<16x200xi32>
    %44 = arith.muli %41, %43 : vector<16x200xi32>
    %45 = arith.addi %44, %42 : vector<16x200xi32>
    %c6_i32 = arith.constant 6 : i32
    %46 = arith.addi %0, %c6_i32 : i32
    %c-1640531535_i32_11 = arith.constant -1640531535 : i32
    %47 = arith.muli %46, %c-1640531535_i32_11 : i32
    %c-2048144789_i32_12 = arith.constant -2048144789 : i32
    %48 = vector.broadcast %c-2048144789_i32_12 : i32 to vector<16x200xi32>
    %49 = arith.muli %45, %48 : vector<16x200xi32>
    %50 = vector.broadcast %47 : i32 to vector<16x200xi32>
    %51 = arith.addi %49, %50 : vector<16x200xi32>
    %c16_i32_13 = arith.constant 16 : i32
    %52 = vector.broadcast %c16_i32_13 : i32 to vector<16x200xi32>
    %53 = arith.shrui %51, %52 : vector<16x200xi32>
    %54 = arith.xori %51, %53 : vector<16x200xi32>
    %c2146121005_i32_14 = arith.constant 2146121005 : i32
    %55 = vector.broadcast %c2146121005_i32_14 : i32 to vector<16x200xi32>
    %56 = arith.muli %54, %55 : vector<16x200xi32>
    %c15_i32_15 = arith.constant 15 : i32
    %57 = vector.broadcast %c15_i32_15 : i32 to vector<16x200xi32>
    %58 = arith.shrui %56, %57 : vector<16x200xi32>
    %59 = arith.xori %56, %58 : vector<16x200xi32>
    %c-2073254261_i32_16 = arith.constant -2073254261 : i32
    %60 = vector.broadcast %c-2073254261_i32_16 : i32 to vector<16x200xi32>
    %61 = arith.muli %59, %60 : vector<16x200xi32>
    %c16_i32_17 = arith.constant 16 : i32
    %62 = vector.broadcast %c16_i32_17 : i32 to vector<16x200xi32>
    %63 = arith.shrui %61, %62 : vector<16x200xi32>
    %64 = arith.xori %61, %63 : vector<16x200xi32>
    %c16777215_i32_18 = arith.constant 16777215 : i32
    %65 = vector.broadcast %c16777215_i32_18 : i32 to vector<16x200xi32>
    %66 = arith.andi %64, %65 : vector<16x200xi32>
    %c3355443_i32 = arith.constant 3355443 : i32
    %67 = vector.broadcast %c3355443_i32 : i32 to vector<16x200xi32>
    %68 = arith.cmpi uge, %66, %67 : vector<16x200xi32>
    %cst_19 = arith.constant 1.250000e+00 : f32
    %69 = vector.broadcast %cst_19 : f32 to vector<16x200xf32>
    %70 = arith.mulf %40, %69 : vector<16x200xf32>
    %cst_20 = arith.constant 0.000000e+00 : f32
    %71 = vector.broadcast %cst_20 : f32 to vector<16x200xf32>
    %72 = arith.select %68, %70, %71 : vector<16x200xi1>, vector<16x200xf32>
    %c0_21 = arith.constant 0 : index
    %c0_22 = arith.constant 0 : index
    %73 = vector.load %arg4[%c0_21, %c0_22] : memref<16x200xf32, #tpu.memory_space<vmem>>, vector<16x200xf32>
    tpu.vector_store %arg4[%c0_21, %c0_22], %72 {strides = array<i32>} : memref<16x200xf32, #tpu.memory_space<vmem>>, vector<16x200xf32>,
    return
  }
}

module attributes {stable_mosaic.version = 11 : i64} {
  func.func @_pool_dropout_kernel(%arg0: memref<1xi32, #tpu.memory_space<smem>>, %arg1: memref<2x400xf32, #tpu.memory_space<vmem>>, %arg2: memref<2x400xf32, #tpu.memory_space<vmem>>, %arg3: memref<2x400xf32, #tpu.memory_space<vmem>>, %arg4: memref<2x400xf32, #tpu.memory_space<vmem>>, %arg5: memref<2x400xf32, #tpu.memory_space<vmem>>) attributes {dimension_semantics = [], scalar_prefetch = 0 : i64, scratch_operands = 0 : i64, tpu.core_type = #tpu.core_type<tc>} {
    %c0 = arith.constant 0 : index
    %0 = memref.load %arg0[%c0] : memref<1xi32, #tpu.memory_space<smem>>
    %c0_0 = arith.constant 0 : index
    %c0_1 = arith.constant 0 : index
    %1 = vector.load %arg1[%c0_0, %c0_1] : memref<2x400xf32, #tpu.memory_space<vmem>>, vector<2x400xf32>
    %c0_2 = arith.constant 0 : index
    %c0_3 = arith.constant 0 : index
    %2 = vector.load %arg2[%c0_2, %c0_3] : memref<2x400xf32, #tpu.memory_space<vmem>>, vector<2x400xf32>
    %3 = arith.maximumf %1, %2 : vector<2x400xf32>
    %c0_4 = arith.constant 0 : index
    %c0_5 = arith.constant 0 : index
    %4 = vector.load %arg3[%c0_4, %c0_5] : memref<2x400xf32, #tpu.memory_space<vmem>>, vector<2x400xf32>
    %c0_6 = arith.constant 0 : index
    %c0_7 = arith.constant 0 : index
    %5 = vector.load %arg4[%c0_6, %c0_7] : memref<2x400xf32, #tpu.memory_space<vmem>>, vector<2x400xf32>
    %6 = arith.maximumf %4, %5 : vector<2x400xf32>
    %7 = arith.maximumf %3, %6 : vector<2x400xf32>
    %8 = tpu.iota {dimensions = array<i32: 0>} : vector<2x400xi32>
    %9 = tpu.iota {dimensions = array<i32: 1>} : vector<2x400xi32>
    %c400_i32 = arith.constant 400 : i32
    %10 = vector.broadcast %c400_i32 : i32 to vector<2x400xi32>
    %11 = arith.muli %8, %10 : vector<2x400xi32>
    %12 = arith.addi %11, %9 : vector<2x400xi32>
    %c7_i32 = arith.constant 7 : i32
    %13 = arith.addi %0, %c7_i32 : i32
    %c-1640531535_i32 = arith.constant -1640531535 : i32
    %14 = arith.muli %13, %c-1640531535_i32 : i32
    %c-2048144789_i32 = arith.constant -2048144789 : i32
    %15 = vector.broadcast %c-2048144789_i32 : i32 to vector<2x400xi32>
    %16 = arith.muli %12, %15 : vector<2x400xi32>
    %17 = vector.broadcast %14 : i32 to vector<2x400xi32>
    %18 = arith.addi %16, %17 : vector<2x400xi32>
    %c16_i32 = arith.constant 16 : i32
    %19 = vector.broadcast %c16_i32 : i32 to vector<2x400xi32>
    %20 = arith.shrui %18, %19 : vector<2x400xi32>
    %21 = arith.xori %18, %20 : vector<2x400xi32>
    %c2146121005_i32 = arith.constant 2146121005 : i32
    %22 = vector.broadcast %c2146121005_i32 : i32 to vector<2x400xi32>
    %23 = arith.muli %21, %22 : vector<2x400xi32>
    %c15_i32 = arith.constant 15 : i32
    %24 = vector.broadcast %c15_i32 : i32 to vector<2x400xi32>
    %25 = arith.shrui %23, %24 : vector<2x400xi32>
    %26 = arith.xori %23, %25 : vector<2x400xi32>
    %c-2073254261_i32 = arith.constant -2073254261 : i32
    %27 = vector.broadcast %c-2073254261_i32 : i32 to vector<2x400xi32>
    %28 = arith.muli %26, %27 : vector<2x400xi32>
    %c16_i32_8 = arith.constant 16 : i32
    %29 = vector.broadcast %c16_i32_8 : i32 to vector<2x400xi32>
    %30 = arith.shrui %28, %29 : vector<2x400xi32>
    %31 = arith.xori %28, %30 : vector<2x400xi32>
    %c16777215_i32 = arith.constant 16777215 : i32
    %32 = vector.broadcast %c16777215_i32 : i32 to vector<2x400xi32>
    %33 = arith.andi %31, %32 : vector<2x400xi32>
    %c4194304_i32 = arith.constant 4194304 : i32
    %34 = vector.broadcast %c4194304_i32 : i32 to vector<2x400xi32>
    %35 = arith.cmpi uge, %33, %34 : vector<2x400xi32>
    %cst = arith.constant 1.33333337 : f32
    %36 = vector.broadcast %cst : f32 to vector<2x400xf32>
    %37 = arith.mulf %7, %36 : vector<2x400xf32>
    %cst_9 = arith.constant 0.000000e+00 : f32
    %38 = vector.broadcast %cst_9 : f32 to vector<2x400xf32>
    %39 = arith.select %35, %37, %38 : vector<2x400xi1>, vector<2x400xf32>
    %40 = tpu.iota {dimensions = array<i32: 0>} : vector<2x400xi32>
    %41 = tpu.iota {dimensions = array<i32: 1>} : vector<2x400xi32>
    %c400_i32_10 = arith.constant 400 : i32
    %42 = vector.broadcast %c400_i32_10 : i32 to vector<2x400xi32>
    %43 = arith.muli %40, %42 : vector<2x400xi32>
    %44 = arith.addi %43, %41 : vector<2x400xi32>
    %c8_i32 = arith.constant 8 : i32
    %45 = arith.addi %0, %c8_i32 : i32
    %c-1640531535_i32_11 = arith.constant -1640531535 : i32
    %46 = arith.muli %45, %c-1640531535_i32_11 : i32
    %c-2048144789_i32_12 = arith.constant -2048144789 : i32
    %47 = vector.broadcast %c-2048144789_i32_12 : i32 to vector<2x400xi32>
    %48 = arith.muli %44, %47 : vector<2x400xi32>
    %49 = vector.broadcast %46 : i32 to vector<2x400xi32>
    %50 = arith.addi %48, %49 : vector<2x400xi32>
    %c16_i32_13 = arith.constant 16 : i32
    %51 = vector.broadcast %c16_i32_13 : i32 to vector<2x400xi32>
    %52 = arith.shrui %50, %51 : vector<2x400xi32>
    %53 = arith.xori %50, %52 : vector<2x400xi32>
    %c2146121005_i32_14 = arith.constant 2146121005 : i32
    %54 = vector.broadcast %c2146121005_i32_14 : i32 to vector<2x400xi32>
    %55 = arith.muli %53, %54 : vector<2x400xi32>
    %c15_i32_15 = arith.constant 15 : i32
    %56 = vector.broadcast %c15_i32_15 : i32 to vector<2x400xi32>
    %57 = arith.shrui %55, %56 : vector<2x400xi32>
    %58 = arith.xori %55, %57 : vector<2x400xi32>
    %c-2073254261_i32_16 = arith.constant -2073254261 : i32
    %59 = vector.broadcast %c-2073254261_i32_16 : i32 to vector<2x400xi32>
    %60 = arith.muli %58, %59 : vector<2x400xi32>
    %c16_i32_17 = arith.constant 16 : i32
    %61 = vector.broadcast %c16_i32_17 : i32 to vector<2x400xi32>
    %62 = arith.shrui %60, %61 : vector<2x400xi32>
    %63 = arith.xori %60, %62 : vector<2x400xi32>
    %c16777215_i32_18 = arith.constant 16777215 : i32
    %64 = vector.broadcast %c16777215_i32_18 : i32 to vector<2x400xi32>
    %65 = arith.andi %63, %64 : vector<2x400xi32>
    %c3355443_i32 = arith.constant 3355443 : i32
    %66 = vector.broadcast %c3355443_i32 : i32 to vector<2x400xi32>
    %67 = arith.cmpi uge, %65, %66 : vector<2x400xi32>
    %cst_19 = arith.constant 1.250000e+00 : f32
    %68 = vector.broadcast %cst_19 : f32 to vector<2x400xf32>
    %69 = arith.mulf %39, %68 : vector<2x400xf32>
    %cst_20 = arith.constant 0.000000e+00 : f32
    %70 = vector.broadcast %cst_20 : f32 to vector<2x400xf32>
    %71 = arith.select %67, %69, %70 : vector<2x400xi1>, vector<2x400xf32>
    %c0_21 = arith.constant 0 : index
    %c0_22 = arith.constant 0 : index
    %72 = vector.load %arg5[%c0_21, %c0_22] : memref<2x400xf32, #tpu.memory_space<vmem>>, vector<2x400xf32>
    tpu.vector_store %arg5[%c0_21, %c0_22], %71 {strides = array<i32>} : memref<2x400xf32, #tpu.memory_space<vmem>>, vector<2x400xf32>,
    return
  }
}

module attributes {stable_mosaic.version = 11 : i64} {
  func.func @_fc_stack_kernel(%arg0: memref<1xi32, #tpu.memory_space<smem>>, %arg1: memref<2x400xf32, #tpu.memory_space<vmem>>, %arg2: memref<400x120xbf16, #tpu.memory_space<vmem>>, %arg3: memref<1x120xf32, #tpu.memory_space<vmem>>, %arg4: memref<120x84xbf16, #tpu.memory_space<vmem>>, %arg5: memref<1x84xf32, #tpu.memory_space<vmem>>, %arg6: memref<84x10xbf16, #tpu.memory_space<vmem>>, %arg7: memref<1x10xf32, #tpu.memory_space<vmem>>, %arg8: memref<2x10xf32, #tpu.memory_space<vmem>>) attributes {dimension_semantics = [], scalar_prefetch = 0 : i64, scratch_operands = 0 : i64, tpu.core_type = #tpu.core_type<tc>} {
    %c0 = arith.constant 0 : index
    %0 = memref.load %arg0[%c0] : memref<1xi32, #tpu.memory_space<smem>>
    %c0_0 = arith.constant 0 : index
    %c0_1 = arith.constant 0 : index
    %1 = vector.load %arg1[%c0_0, %c0_1] : memref<2x400xf32, #tpu.memory_space<vmem>>, vector<2x400xf32>
    %2 = arith.truncf %1 : vector<2x400xf32> to vector<2x400xbf16>
    %c0_2 = arith.constant 0 : index
    %c0_3 = arith.constant 0 : index
    %3 = vector.load %arg2[%c0_2, %c0_3] : memref<400x120xbf16, #tpu.memory_space<vmem>>, vector<400x120xbf16>
    %cst = arith.constant dense<0.000000e+00> : vector<2x120xf32>
    %4 = tpu.matmul %2, %3, %cst {dimension_numbers = #tpu.dot_dimension_numbers<[1], [0], [0], [1], [0, 0, 1, 1], [], []>} : vector<2x400xbf16>, vector<400x120xbf16>, vector<2x120xf32> -> vector<2x120xf32>
    %c0_4 = arith.constant 0 : index
    %c0_5 = arith.constant 0 : index
    %5 = vector.load %arg3[%c0_4, %c0_5] : memref<1x120xf32, #tpu.memory_space<vmem>>, vector<1x120xf32>
    %6 = vector.broadcast %5 : vector<1x120xf32> to vector<2x120xf32>
    %7 = arith.addf %4, %6 : vector<2x120xf32>
    %cst_6 = arith.constant 0.000000e+00 : f32
    %8 = vector.broadcast %cst_6 : f32 to vector<2x120xf32>
    %9 = arith.maximumf %7, %8 : vector<2x120xf32>
    %10 = tpu.iota {dimensions = array<i32: 0>} : vector<2x120xi32>
    %11 = tpu.iota {dimensions = array<i32: 1>} : vector<2x120xi32>
    %c120_i32 = arith.constant 120 : i32
    %12 = vector.broadcast %c120_i32 : i32 to vector<2x120xi32>
    %13 = arith.muli %10, %12 : vector<2x120xi32>
    %14 = arith.addi %13, %11 : vector<2x120xi32>
    %c9_i32 = arith.constant 9 : i32
    %15 = arith.addi %0, %c9_i32 : i32
    %c-1640531535_i32 = arith.constant -1640531535 : i32
    %16 = arith.muli %15, %c-1640531535_i32 : i32
    %c-2048144789_i32 = arith.constant -2048144789 : i32
    %17 = vector.broadcast %c-2048144789_i32 : i32 to vector<2x120xi32>
    %18 = arith.muli %14, %17 : vector<2x120xi32>
    %19 = vector.broadcast %16 : i32 to vector<2x120xi32>
    %20 = arith.addi %18, %19 : vector<2x120xi32>
    %c16_i32 = arith.constant 16 : i32
    %21 = vector.broadcast %c16_i32 : i32 to vector<2x120xi32>
    %22 = arith.shrui %20, %21 : vector<2x120xi32>
    %23 = arith.xori %20, %22 : vector<2x120xi32>
    %c2146121005_i32 = arith.constant 2146121005 : i32
    %24 = vector.broadcast %c2146121005_i32 : i32 to vector<2x120xi32>
    %25 = arith.muli %23, %24 : vector<2x120xi32>
    %c15_i32 = arith.constant 15 : i32
    %26 = vector.broadcast %c15_i32 : i32 to vector<2x120xi32>
    %27 = arith.shrui %25, %26 : vector<2x120xi32>
    %28 = arith.xori %25, %27 : vector<2x120xi32>
    %c-2073254261_i32 = arith.constant -2073254261 : i32
    %29 = vector.broadcast %c-2073254261_i32 : i32 to vector<2x120xi32>
    %30 = arith.muli %28, %29 : vector<2x120xi32>
    %c16_i32_7 = arith.constant 16 : i32
    %31 = vector.broadcast %c16_i32_7 : i32 to vector<2x120xi32>
    %32 = arith.shrui %30, %31 : vector<2x120xi32>
    %33 = arith.xori %30, %32 : vector<2x120xi32>
    %c16777215_i32 = arith.constant 16777215 : i32
    %34 = vector.broadcast %c16777215_i32 : i32 to vector<2x120xi32>
    %35 = arith.andi %33, %34 : vector<2x120xi32>
    %c4194304_i32 = arith.constant 4194304 : i32
    %36 = vector.broadcast %c4194304_i32 : i32 to vector<2x120xi32>
    %37 = arith.cmpi uge, %35, %36 : vector<2x120xi32>
    %cst_8 = arith.constant 1.33333337 : f32
    %38 = vector.broadcast %cst_8 : f32 to vector<2x120xf32>
    %39 = arith.mulf %9, %38 : vector<2x120xf32>
    %cst_9 = arith.constant 0.000000e+00 : f32
    %40 = vector.broadcast %cst_9 : f32 to vector<2x120xf32>
    %41 = arith.select %37, %39, %40 : vector<2x120xi1>, vector<2x120xf32>
    %42 = tpu.iota {dimensions = array<i32: 0>} : vector<2x120xi32>
    %43 = tpu.iota {dimensions = array<i32: 1>} : vector<2x120xi32>
    %c120_i32_10 = arith.constant 120 : i32
    %44 = vector.broadcast %c120_i32_10 : i32 to vector<2x120xi32>
    %45 = arith.muli %42, %44 : vector<2x120xi32>
    %46 = arith.addi %45, %43 : vector<2x120xi32>
    %c10_i32 = arith.constant 10 : i32
    %47 = arith.addi %0, %c10_i32 : i32
    %c-1640531535_i32_11 = arith.constant -1640531535 : i32
    %48 = arith.muli %47, %c-1640531535_i32_11 : i32
    %c-2048144789_i32_12 = arith.constant -2048144789 : i32
    %49 = vector.broadcast %c-2048144789_i32_12 : i32 to vector<2x120xi32>
    %50 = arith.muli %46, %49 : vector<2x120xi32>
    %51 = vector.broadcast %48 : i32 to vector<2x120xi32>
    %52 = arith.addi %50, %51 : vector<2x120xi32>
    %c16_i32_13 = arith.constant 16 : i32
    %53 = vector.broadcast %c16_i32_13 : i32 to vector<2x120xi32>
    %54 = arith.shrui %52, %53 : vector<2x120xi32>
    %55 = arith.xori %52, %54 : vector<2x120xi32>
    %c2146121005_i32_14 = arith.constant 2146121005 : i32
    %56 = vector.broadcast %c2146121005_i32_14 : i32 to vector<2x120xi32>
    %57 = arith.muli %55, %56 : vector<2x120xi32>
    %c15_i32_15 = arith.constant 15 : i32
    %58 = vector.broadcast %c15_i32_15 : i32 to vector<2x120xi32>
    %59 = arith.shrui %57, %58 : vector<2x120xi32>
    %60 = arith.xori %57, %59 : vector<2x120xi32>
    %c-2073254261_i32_16 = arith.constant -2073254261 : i32
    %61 = vector.broadcast %c-2073254261_i32_16 : i32 to vector<2x120xi32>
    %62 = arith.muli %60, %61 : vector<2x120xi32>
    %c16_i32_17 = arith.constant 16 : i32
    %63 = vector.broadcast %c16_i32_17 : i32 to vector<2x120xi32>
    %64 = arith.shrui %62, %63 : vector<2x120xi32>
    %65 = arith.xori %62, %64 : vector<2x120xi32>
    %c16777215_i32_18 = arith.constant 16777215 : i32
    %66 = vector.broadcast %c16777215_i32_18 : i32 to vector<2x120xi32>
    %67 = arith.andi %65, %66 : vector<2x120xi32>
    %c3355443_i32 = arith.constant 3355443 : i32
    %68 = vector.broadcast %c3355443_i32 : i32 to vector<2x120xi32>
    %69 = arith.cmpi uge, %67, %68 : vector<2x120xi32>
    %cst_19 = arith.constant 1.250000e+00 : f32
    %70 = vector.broadcast %cst_19 : f32 to vector<2x120xf32>
    %71 = arith.mulf %41, %70 : vector<2x120xf32>
    %cst_20 = arith.constant 0.000000e+00 : f32
    %72 = vector.broadcast %cst_20 : f32 to vector<2x120xf32>
    %73 = arith.select %69, %71, %72 : vector<2x120xi1>, vector<2x120xf32>
    %74 = arith.truncf %73 : vector<2x120xf32> to vector<2x120xbf16>
    %c0_21 = arith.constant 0 : index
    %c0_22 = arith.constant 0 : index
    %75 = vector.load %arg4[%c0_21, %c0_22] : memref<120x84xbf16, #tpu.memory_space<vmem>>, vector<120x84xbf16>
    %cst_23 = arith.constant dense<0.000000e+00> : vector<2x84xf32>
    %76 = tpu.matmul %74, %75, %cst_23 {dimension_numbers = #tpu.dot_dimension_numbers<[1], [0], [0], [1], [0, 0, 1, 1], [], []>} : vector<2x120xbf16>, vector<120x84xbf16>, vector<2x84xf32> -> vector<2x84xf32>
    %c0_24 = arith.constant 0 : index
    %c0_25 = arith.constant 0 : index
    %77 = vector.load %arg5[%c0_24, %c0_25] : memref<1x84xf32, #tpu.memory_space<vmem>>, vector<1x84xf32>
    %78 = vector.broadcast %77 : vector<1x84xf32> to vector<2x84xf32>
    %79 = arith.addf %76, %78 : vector<2x84xf32>
    %cst_26 = arith.constant 0.000000e+00 : f32
    %80 = vector.broadcast %cst_26 : f32 to vector<2x84xf32>
    %81 = arith.maximumf %79, %80 : vector<2x84xf32>
    %82 = tpu.iota {dimensions = array<i32: 0>} : vector<2x84xi32>
    %83 = tpu.iota {dimensions = array<i32: 1>} : vector<2x84xi32>
    %c84_i32 = arith.constant 84 : i32
    %84 = vector.broadcast %c84_i32 : i32 to vector<2x84xi32>
    %85 = arith.muli %82, %84 : vector<2x84xi32>
    %86 = arith.addi %85, %83 : vector<2x84xi32>
    %c11_i32 = arith.constant 11 : i32
    %87 = arith.addi %0, %c11_i32 : i32
    %c-1640531535_i32_27 = arith.constant -1640531535 : i32
    %88 = arith.muli %87, %c-1640531535_i32_27 : i32
    %c-2048144789_i32_28 = arith.constant -2048144789 : i32
    %89 = vector.broadcast %c-2048144789_i32_28 : i32 to vector<2x84xi32>
    %90 = arith.muli %86, %89 : vector<2x84xi32>
    %91 = vector.broadcast %88 : i32 to vector<2x84xi32>
    %92 = arith.addi %90, %91 : vector<2x84xi32>
    %c16_i32_29 = arith.constant 16 : i32
    %93 = vector.broadcast %c16_i32_29 : i32 to vector<2x84xi32>
    %94 = arith.shrui %92, %93 : vector<2x84xi32>
    %95 = arith.xori %92, %94 : vector<2x84xi32>
    %c2146121005_i32_30 = arith.constant 2146121005 : i32
    %96 = vector.broadcast %c2146121005_i32_30 : i32 to vector<2x84xi32>
    %97 = arith.muli %95, %96 : vector<2x84xi32>
    %c15_i32_31 = arith.constant 15 : i32
    %98 = vector.broadcast %c15_i32_31 : i32 to vector<2x84xi32>
    %99 = arith.shrui %97, %98 : vector<2x84xi32>
    %100 = arith.xori %97, %99 : vector<2x84xi32>
    %c-2073254261_i32_32 = arith.constant -2073254261 : i32
    %101 = vector.broadcast %c-2073254261_i32_32 : i32 to vector<2x84xi32>
    %102 = arith.muli %100, %101 : vector<2x84xi32>
    %c16_i32_33 = arith.constant 16 : i32
    %103 = vector.broadcast %c16_i32_33 : i32 to vector<2x84xi32>
    %104 = arith.shrui %102, %103 : vector<2x84xi32>
    %105 = arith.xori %102, %104 : vector<2x84xi32>
    %c16777215_i32_34 = arith.constant 16777215 : i32
    %106 = vector.broadcast %c16777215_i32_34 : i32 to vector<2x84xi32>
    %107 = arith.andi %105, %106 : vector<2x84xi32>
    %c4194304_i32_35 = arith.constant 4194304 : i32
    %108 = vector.broadcast %c4194304_i32_35 : i32 to vector<2x84xi32>
    %109 = arith.cmpi uge, %107, %108 : vector<2x84xi32>
    %cst_36 = arith.constant 1.33333337 : f32
    %110 = vector.broadcast %cst_36 : f32 to vector<2x84xf32>
    %111 = arith.mulf %81, %110 : vector<2x84xf32>
    %cst_37 = arith.constant 0.000000e+00 : f32
    %112 = vector.broadcast %cst_37 : f32 to vector<2x84xf32>
    %113 = arith.select %109, %111, %112 : vector<2x84xi1>, vector<2x84xf32>
    %114 = arith.truncf %113 : vector<2x84xf32> to vector<2x84xbf16>
    %c0_38 = arith.constant 0 : index
    %c0_39 = arith.constant 0 : index
    %115 = vector.load %arg6[%c0_38, %c0_39] : memref<84x10xbf16, #tpu.memory_space<vmem>>, vector<84x10xbf16>
    %cst_40 = arith.constant dense<0.000000e+00> : vector<2x10xf32>
    %116 = tpu.matmul %114, %115, %cst_40 {dimension_numbers = #tpu.dot_dimension_numbers<[1], [0], [0], [1], [0, 0, 1, 1], [], []>} : vector<2x84xbf16>, vector<84x10xbf16>, vector<2x10xf32> -> vector<2x10xf32>
    %c0_41 = arith.constant 0 : index
    %c0_42 = arith.constant 0 : index
    %117 = vector.load %arg7[%c0_41, %c0_42] : memref<1x10xf32, #tpu.memory_space<vmem>>, vector<1x10xf32>
    %118 = vector.broadcast %117 : vector<1x10xf32> to vector<2x10xf32>
    %119 = arith.addf %116, %118 : vector<2x10xf32>
    %c0_43 = arith.constant 0 : index
    %c0_44 = arith.constant 0 : index
    %120 = vector.load %arg8[%c0_43, %c0_44] : memref<2x10xf32, #tpu.memory_space<vmem>>, vector<2x10xf32>
    tpu.vector_store %arg8[%c0_43, %c0_44], %119 {strides = array<i32>} : memref<2x10xf32, #tpu.memory_space<vmem>>, vector<2x10xf32>,
    return
  }
}

</mosaic_0001>

<bundles_post_ra>
// kernel: _lambda_.6
= control target key start
LH: loop header
LB: loop body
LE: loop exit
PB: predicated region body
PF: predicated region fallthrough
CT: control target
= control target key end

     0   :  { %v19_v0 = vlaneseq  ;;  %s208_s0 = inlined_call_operand.<no memory space> [shape: s32[1], index: 0, kind: input, shape index: {}]   ;;  %s209_s1 = inlined_call_operand.vmem [shape: f32[48,128], index: 1, kind: input, shape index: {}]   ;;  %s210_s2 = inlined_call_operand.vmem [shape: f32[48,128], index: 2, kind: output, shape index: {}]  }
   0x1   :  { %s40_s11 = smul.u32 2654435761, %s208_s0  ;;  %v13_v52 = vld [vmem:[%s209_s1] sm:$0xff]  ;;  %v14_v63 = vld [vmem:[%s209_s1 + $0x8] sm:$0xff] }
   0x2   :  { %v20_v1 = vshrl.u32 %v19_v0, 7  ;;  %v27_v2 = vand.u32 127, %v19_v0  ;;  %v126_v62 = vmul.f32 1.1111112, %v13_v52  ;;  %v15_v0 = vld [vmem:[%s209_s1 + $0x10] sm:$0xff] }
   0x3   :  { %v47_v13 = vstv %s40_s11 }
   0x4   :  { %v28_v3 = vmul.u32 128, %v20_v1  ;;  %v21_v4 = vadd.s32 8, %v20_v1  ;;  %v22_v5 = vadd.s32 16, %v20_v1  ;;  %v23_v6 = vadd.s32 24, %v20_v1 }
   0x5   :  { %v24_v7 = vadd.s32 32, %v20_v1  ;;  %v25_v8 = vadd.s32 40, %v20_v1 }
   0x6   :  { %v34_v9 = vadd.s32 %v28_v3, %v27_v2  ;;  %v29_v10 = vmul.u32 128, %v21_v4  ;;  %v30_v11 = vmul.u32 128, %v22_v5  ;;  %v31_v12 = vmul.u32 128, %v23_v6 }
   0x7   :  { %v32_v14 = vmul.u32 128, %v24_v7  ;;  %v33_v15 = vmul.u32 128, %v25_v8  ;;  %v16_v7 = vld [vmem:[%s209_s1 + $0x18] sm:$0xff] }
   0x8   :  { %v41_v16 = vmul.u32 2246822507, %v34_v9  ;;  %v35_v17 = vadd.s32 %v29_v10, %v27_v2  ;;  %v36_v18 = vadd.s32 %v30_v11, %v27_v2  ;;  %v37_v19 = vadd.s32 %v31_v12, %v27_v2 }
   0x9   :  { %v38_v20 = vadd.s32 %v32_v14, %v27_v2  ;;  %v39_v21 = vadd.s32 %v33_v15, %v27_v2  ;;  %v17_v15 = vld [vmem:[%s209_s1 + $0x20] sm:$0xff] }
   0xa   :  { %v48_v22 = vadd.s32 %v47_v13, %v41_v16  ;;  %v42_v23 = vmul.u32 2246822507, %v35_v17  ;;  %v43_v24 = vmul.u32 2246822507, %v36_v18  ;;  %v44_v25 = vmul.u32 2246822507, %v37_v19 }
   0xb   :  { %v45_v26 = vmul.u32 2246822507, %v38_v20  ;;  %v46_v27 = vmul.u32 2246822507, %v39_v21  ;;  %v128_v16 = vmul.f32 1.1111112, %v15_v0 }
   0xc   :  { %v54_v28 = vshrl.u32 %v48_v22, 16  ;;  %v49_v29 = vadd.s32 %v47_v13, %v42_v23  ;;  %v50_v30 = vadd.s32 %v47_v13, %v43_v24  ;;  %v51_v31 = vadd.s32 %v47_v13, %v44_v25 }
   0xd   :  { %v52_v32 = vadd.s32 %v47_v13, %v45_v26  ;;  %v53_v33 = vadd.s32 %v47_v13, %v46_v27  ;;  %v127_v13 = vmul.f32 1.1111112, %v14_v63  ;;  %v129_v23 = vmul.f32 1.1111112, %v16_v7  ;;  %v18_v27 = vld [vmem:[%s209_s1 + $0x28] sm:$0xff] }
   0xe   :  { %v60_v34 = vxor.u32 %v54_v28, %v48_v22  ;;  %v55_v35 = vshrl.u32 %v49_v29, 16  ;;  %v56_v36 = vshrl.u32 %v50_v30, 16  ;;  %v57_v37 = vshrl.u32 %v51_v31, 16 }
   0xf   :  { %v58_v38 = vshrl.u32 %v52_v32, 16  ;;  %v59_v39 = vshrl.u32 %v53_v33, 16  ;;  %v130_v26 = vmul.f32 1.1111112, %v17_v15 }
  0x10   :  { %v66_v40 = vmul.u32 2146121005, %v60_v34  ;;  %v61_v41 = vxor.u32 %v55_v35, %v49_v29  ;;  %v62_v42 = vxor.u32 %v56_v36, %v50_v30  ;;  %v63_v43 = vxor.u32 %v57_v37, %v51_v31 }
  0x11   :  { %v64_v44 = vxor.u32 %v58_v38, %v52_v32  ;;  %v65_v45 = vxor.u32 %v59_v39, %v53_v33  ;;  %v131_v37 = vmul.f32 1.1111112, %v18_v27 }
  0x12   :  { %v72_v46 = vshrl.u32 %v66_v40, 15  ;;  %v67_v47 = vmul.u32 2146121005, %v61_v41  ;;  %v68_v48 = vmul.u32 2146121005, %v62_v42 }
  0x13   :  { %v69_v49 = vmul.u32 2146121005, %v63_v43  ;;  %v70_v50 = vmul.u32 2146121005, %v64_v44  ;;  %v71_v51 = vmul.u32 2146121005, %v65_v45 }
  0x14   :  { %v78_v53 = vxor.u32 %v72_v46, %v66_v40  ;;  %v73_v54 = vshrl.u32 %v67_v47, 15  ;;  %v74_v55 = vshrl.u32 %v68_v48, 15 }
  0x15   :  { %v75_v56 = vshrl.u32 %v69_v49, 15  ;;  %v76_v57 = vshrl.u32 %v70_v50, 15  ;;  %v77_v58 = vshrl.u32 %v71_v51, 15 }
  0x16   :  { %v84_v59 = vmul.u32 2221713035, %v78_v53  ;;  %v79_v60 = vxor.u32 %v73_v54, %v67_v47  ;;  %v80_v61 = vxor.u32 %v74_v55, %v68_v48 }
  0x17   :  { %v81_v1 = vxor.u32 %v75_v56, %v69_v49  ;;  %v82_v2 = vxor.u32 %v76_v57, %v70_v50  ;;  %v83_v3 = vxor.u32 %v77_v58, %v71_v51 }
  0x18   :  { %v90_v4 = vshrl.u32 %v84_v59, 16  ;;  %v85_v5 = vmul.u32 2221713035, %v79_v60  ;;  %v86_v6 = vmul.u32 2221713035, %v80_v61 }
  0x19   :  { %v87_v8 = vmul.u32 2221713035, %v81_v1  ;;  %v88_v9 = vmul.u32 2221713035, %v82_v2  ;;  %v89_v10 = vmul.u32 2221713035, %v83_v3 }
  0x1a   :  { %v96_v11 = vxor.u32 %v90_v4, %v84_v59  ;;  %v91_v12 = vshrl.u32 %v85_v5, 16  ;;  %v92_v14 = vshrl.u32 %v86_v6, 16 }
  0x1b   :  { %v93_v17 = vshrl.u32 %v87_v8, 16  ;;  %v94_v18 = vshrl.u32 %v88_v9, 16  ;;  %v95_v19 = vshrl.u32 %v89_v10, 16 }
  0x1c   :  { %v102_v20 = vand.u32 16777215, %v96_v11  ;;  %v97_v21 = vxor.u32 %v91_v12, %v85_v5  ;;  %v98_v22 = vxor.u32 %v92_v14, %v86_v6 }
  0x1d   :  { %v99_v24 = vxor.u32 %v93_v17, %v87_v8  ;;  %v100_v25 = vxor.u32 %v94_v18, %v88_v9  ;;  %v101_v28 = vxor.u32 %v95_v19, %v89_v10 }
  0x1e   :  { %v148_v29 = vxor.u32 2147483648, %v102_v20  ;;  %v103_v30 = vand.u32 16777215, %v97_v21  ;;  %v104_v31 = vand.u32 16777215, %v98_v22 }
  0x1f   :  { %v105_v32 = vand.u32 16777215, %v99_v24  ;;  %v106_v33 = vand.u32 16777215, %v100_v25  ;;  %v107_v34 = vand.u32 16777215, %v101_v28 }
  0x20   :  { %vm110_vm0 = vcmp.ge.s32.totalorder %v148_v29, 2149161370  ;;  %v149_v35 = vxor.u32 2147483648, %v103_v30  ;;  %v150_v36 = vxor.u32 2147483648, %v104_v31 }
  0x21   :  { %v132_v38 = vsel %vm110_vm0, %v126_v62, 0.0  ;;  %v151_v39 = vxor.u32 2147483648, %v105_v32  ;;  %v152_v40 = vxor.u32 2147483648, %v106_v33  ;;  %v153_v41 = vxor.u32 2147483648, %v107_v34 }
  0x22   :  { %138 = vst [vmem:[%s210_s2] sm:$0xff] %v132_v38  ;;  %vm113_vm1 = vcmp.ge.s32.totalorder %v149_v35, 2149161370  ;;  %vm116_vm2 = vcmp.ge.s32.totalorder %v150_v36, 2149161370 }
  0x23   :  { %v133_v42 = vsel %vm113_vm1, %v127_v13, 0.0  ;;  %v134_v43 = vsel %vm116_vm2, %v128_v16, 0.0  ;;  %vm119_vm3 = vcmp.ge.s32.totalorder %v151_v39, 2149161370  ;;  %vm122_vm4 = vcmp.ge.s32.totalorder %v152_v40, 2149161370 }
  0x24   :  { %139 = vst [vmem:[%s210_s2 + $0x8] sm:$0xff] %v133_v42  ;;  %v135_v44 = vsel %vm119_vm3, %v129_v23, 0.0  ;;  %v136_v45 = vsel %vm122_vm4, %v130_v26, 0.0  ;;  %vm125_vm5 = vcmp.ge.s32.totalorder %v153_v41, 2149161370 }
  0x25   :  { %140 = vst [vmem:[%s210_s2 + $0x10] sm:$0xff] %v134_v43  ;;  %v137_v46 = vsel %vm125_vm5, %v131_v37, 0.0 }
  0x26   :  { %141 = vst [vmem:[%s210_s2 + $0x18] sm:$0xff] %v135_v44 }
  0x27   :  { %142 = vst [vmem:[%s210_s2 + $0x20] sm:$0xff] %v136_v45 }
  0x28   :  { %143 = vst [vmem:[%s210_s2 + $0x28] sm:$0xff] %v137_v46 }

// kernel: _lambda_.7
= control target key start
LH: loop header
LB: loop body
LE: loop exit
PB: predicated region body
PF: predicated region fallthrough
CT: control target
= control target key end

     0   :  { %vm418_vm0 = vcmask 1044480   ;;  %vm419_vm1 = vcmask 1045504   ;;  %v1467_v2 = vmov 65535   ;;  %vm414_vm2 = vcmask 613376   ;;  %s2133_s2 = inlined_call_operand.vmem [shape: bf16[75,1568], index: 2, kind: input, shape index: {}]   ;;  %s2134_s1 = inlined_call_operand.vmem [shape: bf16[6,75], index: 1, kind: input, shape index: {}]   ;;  %s2135_s3 = inlined_call_operand.vmem [shape: f32[6,1], index: 3, kind: input, shape index: {}]   ;;  %s2136_s0 = inlined_call_operand.<no memory space> [shape: s32[1], index: 0, kind: input, shape index: {}]   ;;  %s2137_s4 = inlined_call_operand.vmem [shape: f32[6,1568], index: 4, kind: output, shape index: {}]  }
   0x1   :  { %v1310_v0 = vld [vmem:[%s2133_s2 + $0x1a0] sm:$0xf]  ;;  %v1457_v1 = vld [vmem:[%s2133_s2 + $0x1d0] sm:$0x30]  ;;  %v420_v3 = vsel %vm418_vm0, 4294967295, %v1467_v2  ;;  %s673_s10 = sadd.s32 1, %s2136_s0 }
   0x2   :  { %v1311_v4 = vor.u32 %v1457_v1, %v1310_v0  ;;  %v1500_v5 = vsel %vm419_vm1, %v420_v3, 0  ;;  %v1318_v6 = vld [vmem:[%s2133_s2 + $0x1a8] sm:$0xf]  ;;  %v1458_v7 = vld [vmem:[%s2133_s2 + $0x1d8] sm:$0x30]  ;;  %s884_s13 = sadd.s32 2, %s2136_s0 }
   0x3   :  { %v1319_v8 = vor.u32 %v1458_v7, %v1318_v6  ;;  %v1452_v9 = vld [vmem:[%s2133_s2 + $0x1ac] sm:$0xf]  ;;  %v1320_v10 = vld [vmem:[%s2133_s2 + $0x1dc] sm:$0x30]  ;;  %v1258_v11 = vld [vmem:[%s2133_s2 + $0x138] sm:$0xf] }
   0x4   :  { %v423_v12 = vand.u32 %v1311_v4, %v1500_v5  ;;  %v1323_v13 = vor.u32 %v1452_v9, %v1320_v10  ;;  %v1444_v14 = vld [vmem:[%s2133_s2 + $0x168] sm:$0xf0]  ;;  %v1266_v15 = vld [vmem:[%s2133_s2 + $0x140] sm:$0xf]  ;;  %v1445_v16 = vld [vmem:[%s2133_s2 + $0x170] sm:$0xf0] }
   0x5   :  { %v429_v17 = vand.u32 %v1319_v8, %v1500_v5  ;;  %v1439_v18 = vld [vmem:[%s2133_s2 + $0x144] sm:$0xf]  ;;  %v1268_v19 = vld [vmem:[%s2133_s2 + $0x174] sm:$0xf0]  ;;  %v1259_v21 = vor.u32 %v1444_v14, %v1258_v11  ;;  %v1267_v24 = vor.u32 %v1445_v16, %v1266_v15  ;;  %v1206_v25 = vld [vmem:[%s2133_s2 + $0xd0] sm:$0xf] }
   0x6   :  { %464 = vmatpush.bf16.msra.mxu0 %v423_v12  ;;  %v432_v20 = vand.u32 %v1323_v13, %v1500_v5  ;;  %v1451_v22 = vld [vmem:[%s2133_s2 + $0x1a4] sm:$0xf]  ;;  %v1312_v23 = vld [vmem:[%s2133_s2 + $0x1d4] sm:$0x30]  ;;  %v1271_v28 = vor.u32 %v1439_v18, %v1268_v19  ;;  %v1432_v30 = vld [vmem:[%s2133_s2 + $0x108] sm:$0xf0] }
   0x7   :  { %490 = vmatpush.bf16.msra.mxu2 %v429_v17  ;;  %v1431_v26 = vld [vmem:[%s2133_s2 + $0x100] sm:$0xf0]  ;;  %v1315_v27 = vor.u32 %v1451_v22, %v1312_v23  ;;  %v1214_v29 = vld [vmem:[%s2133_s2 + $0xd8] sm:$0xf]  ;;  %v1426_v31 = vld [vmem:[%s2133_s2 + $0xdc] sm:$0xf] }
   0x8   :  { %503 = vmatpush.bf16.msra.mxu3 %v432_v20  ;;  %v1216_v33 = vld [vmem:[%s2133_s2 + $0x10c] sm:$0xf0]  ;;  %v1438_v34 = vld [vmem:[%s2133_s2 + $0x13c] sm:$0xf]  ;;  %v1207_v36 = vor.u32 %v1431_v26, %v1206_v25  ;;  %v1154_v37 = vld [vmem:[%s2133_s2 + $0x68] sm:$0xf]  ;;  %v1215_v39 = vor.u32 %v1432_v30, %v1214_v29 }
   0x9   :  { %v426_v32 = vand.u32 %v1315_v27, %v1500_v5  ;;  %v1260_v35 = vld [vmem:[%s2133_s2 + $0x16c] sm:$0xf0]  ;;  %v1418_v38 = vld [vmem:[%s2133_s2 + $0x98] sm:$0xf0]  ;;  %v1419_v42 = vld [vmem:[%s2133_s2 + $0xa0] sm:$0xf0]  ;;  %v1219_v44 = vor.u32 %v1426_v31, %v1216_v33 }
   0xa   :  { %465 = vmatpush.bf16.msra.mxu0 %v1259_v21  ;;  %v1263_v40 = vor.u32 %v1438_v34, %v1260_v35  ;;  %v1162_v41 = vld [vmem:[%s2133_s2 + $0x70] sm:$0xf]  ;;  %v1425_v43 = vld [vmem:[%s2133_s2 + $0xd4] sm:$0xf]  ;;  %v1208_v45 = vld [vmem:[%s2133_s2 + $0x104] sm:$0xf0]  ;;  %v1155_v50 = vor.u32 %v1418_v38, %v1154_v37 }
   0xb   :  { %491 = vmatpush.bf16.msra.mxu2 %v1267_v24  ;;  %477 = vmatpush.bf16.msra.mxu1 %v426_v32  ;;  %v1326_v46 = vld [vmem:[%s2133_s2 + $0x1b0] sm:$0xf]  ;;  %v1459_v47 = vld [vmem:[%s2133_s2 + $0x1e0] sm:$0x30]  ;;  %v1413_v48 = vld [vmem:[%s2133_s2 + $0x74] sm:$0xf]  ;;  %v1163_v54 = vor.u32 %v1419_v42, %v1162_v41  ;;  %v1211_v55 = vor.u32 %v1425_v43, %v1208_v45 }
   0xc   :  { %504 = vmatpush.bf16.msra.mxu3 %v1271_v28  ;;  %v1164_v49 = vld [vmem:[%s2133_s2 + $0xa4] sm:$0xf0]  ;;  %v1102_v51 = vld [vmem:[%s2133_s2] sm:$0xf]  ;;  %v1405_v52 = vld [vmem:[%s2133_s2 + $0x30] sm:$0xf0]  ;;  %v1327_v56 = vor.u32 %v1459_v47, %v1326_v46 }
   0xd   :  { %v1334_v53 = vld [vmem:[%s2133_s2 + $0x1b8] sm:$0xf]  ;;  %v1460_v57 = vld [vmem:[%s2133_s2 + $0x1e8] sm:$0x30]  ;;  %v1454_v58 = vld [vmem:[%s2133_s2 + $0x1bc] sm:$0xf]  ;;  %v1167_v60 = vor.u32 %v1413_v48, %v1164_v49  ;;  %v1103_v3 = vor.u32 %v1405_v52, %v1102_v51 }
   0xe   :  { %466 = vmatpush.bf16.msra.mxu0 %v1207_v36  ;;  %v1336_v59 = vld [vmem:[%s2133_s2 + $0x1ec] sm:$0x30]  ;;  %v1110_v61 = vld [vmem:[%s2133_s2 + $0x8] sm:$0xf]  ;;  %v1406_v62 = vld [vmem:[%s2133_s2 + $0x38] sm:$0xf0]  ;;  %v1335_v63 = vor.u32 %v1460_v57, %v1334_v53  ;;  %v435_v4 = vand.u32 %v1327_v56, %v1500_v5 }
   0xf   :  { %492 = vmatpush.bf16.msra.mxu2 %v1215_v39  ;;  %478 = vmatpush.bf16.msra.mxu1 %v1263_v40  ;;  %v1400_v0 = vld [vmem:[%s2133_s2 + $0xc] sm:$0xf]  ;;  %v1112_v1 = vld [vmem:[%s2133_s2 + $0x3c] sm:$0xf0]  ;;  %v1339_v2 = vor.u32 %v1454_v58, %v1336_v59  ;;  %v1111_v6 = vor.u32 %v1406_v62, %v1110_v61  ;;  %v1274_v9 = vld [vmem:[%s2133_s2 + $0x148] sm:$0xf] }
  0x10   :  { %505 = vmatpush.bf16.msra.mxu3 %v1219_v44  ;;  %v1412_v7 = vld [vmem:[%s2133_s2 + $0x6c] sm:$0xf]  ;;  %v1156_v8 = vld [vmem:[%s2133_s2 + $0x9c] sm:$0xf0]  ;;  %v1115_v10 = vor.u32 %v1400_v0, %v1112_v1  ;;  %v441_v11 = vand.u32 %v1335_v63, %v1500_v5  ;;  %v1446_v12 = vld [vmem:[%s2133_s2 + $0x178] sm:$0xf0] }
  0x11   :  { %v1453_v13 = vld [vmem:[%s2133_s2 + $0x1b4] sm:$0xf]  ;;  %v1328_v14 = vld [vmem:[%s2133_s2 + $0x1e4] sm:$0x30]  ;;  %v444_v15 = vand.u32 %v1339_v2, %v1500_v5  ;;  %v1282_v16 = vld [vmem:[%s2133_s2 + $0x150] sm:$0xf]  ;;  %v1159_v19 = vor.u32 %v1412_v7, %v1156_v8  ;;  %v1275_v22 = vor.u32 %v1446_v12, %v1274_v9 }
  0x12   :  { %467 = vmatpush.bf16.msra.mxu0 %v1155_v50  ;;  %v1447_v17 = vld [vmem:[%s2133_s2 + $0x180] sm:$0xf0]  ;;  %v1656_v18 = vld [vmem:[%s2134_s1] sm:$0x7]  ;;  %v1441_v20 = vld [vmem:[%s2133_s2 + $0x154] sm:$0xf]  ;;  %v1331_v25 = vor.u32 %v1453_v13, %v1328_v14 }
  0x13   :  { %493 = vmatpush.bf16.msra.mxu2 %v1163_v54  ;;  %479 = vmatpush.bf16.msra.mxu1 %v1211_v55  ;;  %v1284_v21 = vld [vmem:[%s2133_s2 + $0x184] sm:$0xf0]  ;;  %v1399_v23 = vld [vmem:[%s2133_s2 + $0x4] sm:$0xf]  ;;  %v1104_v24 = vld [vmem:[%s2133_s2 + $0x34] sm:$0xf0]  ;;  %v1283_v26 = vor.u32 %v1447_v17, %v1282_v16 }
  0x14   :  { %506 = vmatpush.bf16.msra.mxu3 %v1167_v60  ;;  %v1222_v27 = vld [vmem:[%s2133_s2 + $0xe0] sm:$0xf]  ;;  %v1433_v28 = vld [vmem:[%s2133_s2 + $0x110] sm:$0xf0]  ;;  %v1287_v29 = vor.u32 %v1441_v20, %v1284_v21  ;;  %v1230_v30 = vld [vmem:[%s2133_s2 + $0xe8] sm:$0xf]  ;;  %v1107_v32 = vor.u32 %v1399_v23, %v1104_v24  ;;  %v438_v37 = vand.u32 %v1331_v25, %v1500_v5 }
  0x15   :  { %v1434_v31 = vld [vmem:[%s2133_s2 + $0x118] sm:$0xf0]  ;;  %v1428_v33 = vld [vmem:[%s2133_s2 + $0xec] sm:$0xf]  ;;  %v1232_v34 = vld [vmem:[%s2133_s2 + $0x11c] sm:$0xf0]  ;;  %v1223_v36 = vor.u32 %v1433_v28, %v1222_v27 }
  0x16   :  { %468 = vmatpush.bf16.msra.mxu0 %v1103_v3  ;;  %v91_v35 = vld [vmem:[%s2135_s3] sm:$0x3f]  ;;  %v1170_v38 = vld [vmem:[%s2133_s2 + $0x78] sm:$0xf]  ;;  %v1420_v39 = vld [vmem:[%s2133_s2 + $0xa8] sm:$0xf0]  ;;  %v1231_v41 = vor.u32 %v1434_v31, %v1230_v30  ;;  %v1235_v46 = vor.u32 %v1428_v33, %v1232_v34 }
  0x17   :  { %494 = vmatpush.bf16.msra.mxu2 %v1111_v6  ;;  %480 = vmatpush.bf16.msra.mxu1 %v1159_v19  ;;  %v1440_v40 = vld [vmem:[%s2133_s2 + $0x14c] sm:$0xf]  ;;  %v1276_v42 = vld [vmem:[%s2133_s2 + $0x17c] sm:$0xf0]  ;;  %v1468_v43 = vmov 0   ;;  %v1171_v53 = vor.u32 %v1420_v39, %v1170_v38 }
  0x18   :  { %507 = vmatpush.bf16.msra.mxu3 %v1115_v10  ;;  %1466 = vset.pattern.permute.xlu0 %v1468_v43  ;;  %v1178_v44 = vld [vmem:[%s2133_s2 + $0x80] sm:$0xf]  ;;  %v1421_v45 = vld [vmem:[%s2133_s2 + $0xb0] sm:$0xf0]  ;;  %v1415_v47 = vld [vmem:[%s2133_s2 + $0x84] sm:$0xf]  ;;  %v1279_v54 = vor.u32 %v1440_v40, %v1276_v42 }
  0x19   :  { %1360 = vmatmul.msk.bf16.vlgmr.msra.gmra.mxu0 %vm414_vm2, %v1656_v18  ;;  %94 = vperm.xlu0 %1466, %v91_v35   ;;  %v1342_v48 = vld [vmem:[%s2133_s2 + $0x1c0] sm:$0xf]  ;;  %v1461_v49 = vld [vmem:[%s2133_s2 + $0x1f0] sm:$0x30]  ;;  %v1180_v50 = vld [vmem:[%s2133_s2 + $0xb4] sm:$0xf0]  ;;  %v1179_v58 = vor.u32 %v1421_v45, %v1178_v44 }
  0x1a   :  { %516 = vmatpush.bf16.msrb.mxu0 %v435_v4  ;;  %1362 = vmatmul.msk.bf16.vlgmr.msra.gmra.mxu2 %vm414_vm2, %v1656_v18  ;;  %v1350_v51 = vld [vmem:[%s2133_s2 + $0x1c8] sm:$0xf]  ;;  %v1462_v52 = vld [vmem:[%s2133_s2 + $0x1f8] sm:$0x30]  ;;  %v1118_v55 = vld [vmem:[%s2133_s2 + $0x10] sm:$0xf]  ;;  %v1343_v62 = vor.u32 %v1461_v49, %v1342_v48  ;;  %v1183_v63 = vor.u32 %v1415_v47, %v1180_v50 }
  0x1b   :  { %542 = vmatpush.bf16.msrb.mxu2 %v441_v11  ;;  %1363 = vmatmul.msk.bf16.vlgmr.msra.gmra.mxu3 %vm414_vm2, %v1656_v18  ;;  %v1456_v56 = vld [vmem:[%s2133_s2 + $0x1cc] sm:$0xf]  ;;  %v1352_v57 = vld [vmem:[%s2133_s2 + $0x1fc] sm:$0x30]  ;;  %v1407_v59 = vld [vmem:[%s2133_s2 + $0x40] sm:$0xf0]  ;;  %v1351_v2 = vor.u32 %v1462_v52, %v1350_v51 }
  0x1c   :  { %555 = vmatpush.bf16.msrb.mxu3 %v444_v15  ;;  %481 = vmatpush.bf16.msra.mxu1 %v1107_v32  ;;  %v1427_v60 = vld [vmem:[%s2133_s2 + $0xe4] sm:$0xf]  ;;  %v1224_v61 = vld [vmem:[%s2133_s2 + $0x114] sm:$0xf0]  ;;  %v1408_v1 = vld [vmem:[%s2133_s2 + $0x48] sm:$0xf0]  ;;  %v1355_v6 = vor.u32 %v1456_v56, %v1352_v57  ;;  %v1119_v7 = vor.u32 %v1407_v59, %v1118_v55  ;;  %v447_v9 = vand.u32 %v1343_v62, %v1500_v5 }
  0x1d   :  { %v1126_v0 = vld [vmem:[%s2133_s2 + $0x18] sm:$0xf]  ;;  %v1402_v3 = vld [vmem:[%s2133_s2 + $0x1c] sm:$0xf]  ;;  %v1128_v4 = vld [vmem:[%s2133_s2 + $0x4c] sm:$0xf0]  ;;  %v1227_v8 = vor.u32 %v1427_v60, %v1224_v61  ;;  %v453_v15 = vand.u32 %v1351_v2, %v1500_v5 }
  0x1e   :  { %517 = vmatpush.bf16.msrb.mxu0 %v1275_v22  ;;  %v1127_v10 = vor.u32 %v1408_v1, %v1126_v0  ;;  %v1414_v11 = vld [vmem:[%s2133_s2 + $0x7c] sm:$0xf]  ;;  %v1172_v12 = vld [vmem:[%s2133_s2 + $0xac] sm:$0xf0]  ;;  %v1290_v13 = vld [vmem:[%s2133_s2 + $0x158] sm:$0xf]  ;;  %v1131_v14 = vor.u32 %v1402_v3, %v1128_v4  ;;  %v456_v20 = vand.u32 %v1355_v6, %v1500_v5 }
  0x1f   :  { %543 = vmatpush.bf16.msrb.mxu2 %v1283_v26  ;;  %1361 = vmatmul.msk.bf16.vlgmr.msra.gmra.mxu1 %vm414_vm2, %v1656_v18  ;;  %v1448_v16 = vld [vmem:[%s2133_s2 + $0x188] sm:$0xf0]  ;;  %v1455_v17 = vld [vmem:[%s2133_s2 + $0x1c4] sm:$0xf]  ;;  %v1344_v19 = vld [vmem:[%s2133_s2 + $0x1f4] sm:$0x30]  ;;  %v1175_v23 = vor.u32 %v1414_v11, %v1172_v12 }
  0x20   :  { %556 = vmatpush.bf16.msrb.mxu3 %v1287_v29  ;;  %529 = vmatpush.bf16.msrb.mxu1 %v438_v37  ;;  %v1298_v21 = vld [vmem:[%s2133_s2 + $0x160] sm:$0xf]  ;;  %v1449_v22 = vld [vmem:[%s2133_s2 + $0x190] sm:$0xf0]  ;;  %v1443_v24 = vld [vmem:[%s2133_s2 + $0x164] sm:$0xf]  ;;  %v1291_v26 = vor.u32 %v1448_v16, %v1290_v13  ;;  %v1347_v29 = vor.u32 %v1455_v17, %v1344_v19 }
  0x21   :  { %v1300_v25 = vld [vmem:[%s2133_s2 + $0x194] sm:$0xf0]  ;;  %v1401_v27 = vld [vmem:[%s2133_s2 + $0x14] sm:$0xf]  ;;  %v1120_v28 = vld [vmem:[%s2133_s2 + $0x44] sm:$0xf0]  ;;  %v1299_v30 = vor.u32 %v1449_v22, %v1298_v21 }
  0x22   :  { %518 = vmatpush.bf16.msrb.mxu0 %v1223_v36  ;;  %v1238_v31 = vld [vmem:[%s2133_s2 + $0xf0] sm:$0xf]  ;;  %v1435_v32 = vld [vmem:[%s2133_s2 + $0x120] sm:$0xf0]  ;;  %v1303_v33 = vor.u32 %v1443_v24, %v1300_v25  ;;  %v1246_v34 = vld [vmem:[%s2133_s2 + $0xf8] sm:$0xf]  ;;  %v1123_v36 = vor.u32 %v1401_v27, %v1120_v28  ;;  %v450_v40 = vand.u32 %v1347_v29, %v1500_v5 }
  0x23   :  { %544 = vmatpush.bf16.msrb.mxu2 %v1231_v41  ;;  %v1436_v35 = vld [vmem:[%s2133_s2 + $0x128] sm:$0xf0]  ;;  %v1430_v37 = vld [vmem:[%s2133_s2 + $0xfc] sm:$0xf]  ;;  %v1248_v38 = vld [vmem:[%s2133_s2 + $0x12c] sm:$0xf0]  ;;  %v1239_v39 = vor.u32 %v1435_v32, %v1238_v31 }
  0x24   :  { %557 = vmatpush.bf16.msrb.mxu3 %v1235_v46  ;;  %530 = vmatpush.bf16.msrb.mxu1 %v1279_v54  ;;  %v1186_v41 = vld [vmem:[%s2133_s2 + $0x88] sm:$0xf]  ;;  %v1422_v42 = vld [vmem:[%s2133_s2 + $0xb8] sm:$0xf0]  ;;  %v1247_v43 = vor.u32 %v1436_v35, %v1246_v34  ;;  %v1292_v45 = vld [vmem:[%s2133_s2 + $0x18c] sm:$0xf0]  ;;  %v1251_v47 = vor.u32 %v1430_v37, %v1248_v38 }
  0x25   :  { %v1442_v44 = vld [vmem:[%s2133_s2 + $0x15c] sm:$0xf]  ;;  %v1194_v46 = vld [vmem:[%s2133_s2 + $0x90] sm:$0xf]  ;;  %v1423_v48 = vld [vmem:[%s2133_s2 + $0xc0] sm:$0xf0] }
  0x26   :  { %519 = vmatpush.bf16.msrb.mxu0 %v1171_v53  ;;  %v1358_v49 = vld [vmem:[%s2133_s2 + $0x1d0] sm:$0xf]  ;;  %v1463_v50 = vld [vmem:[%s2133_s2 + $0x200] sm:$0x30]  ;;  %v1417_v51 = vld [vmem:[%s2133_s2 + $0x94] sm:$0xf]  ;;  %v1187_v53 = vor.u32 %v1422_v42, %v1186_v41  ;;  %v1295_v54 = vor.u32 %v1442_v44, %v1292_v45  ;;  %v1195_v56 = vor.u32 %v1423_v48, %v1194_v46 }
  0x27   :  { %545 = vmatpush.bf16.msrb.mxu2 %v1179_v58  ;;  %v1196_v52 = vld [vmem:[%s2133_s2 + $0xc4] sm:$0xf0]  ;;  %v1134_v55 = vld [vmem:[%s2133_s2 + $0x20] sm:$0xf]  ;;  %v1409_v57 = vld [vmem:[%s2133_s2 + $0x50] sm:$0xf0]  ;;  %v1359_v60 = vor.u32 %v1463_v50, %v1358_v49 }
  0x28   :  { %558 = vmatpush.bf16.msrb.mxu3 %v1183_v63  ;;  %531 = vmatpush.bf16.msrb.mxu1 %v1227_v8  ;;  %v1429_v58 = vld [vmem:[%s2133_s2 + $0xf4] sm:$0xf]  ;;  %v1240_v59 = vld [vmem:[%s2133_s2 + $0x124] sm:$0xf0]  ;;  %v1199_v61 = vor.u32 %v1417_v51, %v1196_v52  ;;  %v1410_v63 = vld [vmem:[%s2133_s2 + $0x58] sm:$0xf0]  ;;  %v1135_v2 = vor.u32 %v1409_v57, %v1134_v55 }
  0x29   :  { %v1142_v62 = vld [vmem:[%s2133_s2 + $0x28] sm:$0xf]  ;;  %v1404_v0 = vld [vmem:[%s2133_s2 + $0x2c] sm:$0xf]  ;;  %v1144_v1 = vld [vmem:[%s2133_s2 + $0x5c] sm:$0xf0]  ;;  %v1243_v3 = vor.u32 %v1429_v58, %v1240_v59  ;;  %v459_v4 = vand.u32 %v1359_v60, %v1500_v5 }
  0x2a   :  { %520 = vmatpush.bf16.msrb.mxu0 %v1119_v7  ;;  %v1143_v6 = vor.u32 %v1410_v63, %v1142_v62  ;;  %v1416_v7 = vld [vmem:[%s2133_s2 + $0x8c] sm:$0xf]  ;;  %v1188_v8 = vld [vmem:[%s2133_s2 + $0xbc] sm:$0xf0]  ;;  %v1450_v11 = vld [vmem:[%s2133_s2 + $0x198] sm:$0xf0] }
  0x2b   :  { %546 = vmatpush.bf16.msrb.mxu2 %v1127_v10  ;;  %v1306_v10 = vld [vmem:[%s2133_s2 + $0x168] sm:$0xf]  ;;  %v1191_v5 = vor.u32 %v1416_v7, %v1188_v8  ;;  %v1403_v13 = vld [vmem:[%s2133_s2 + $0x24] sm:$0xf]  ;;  %v1437_v16 = vld [vmem:[%s2133_s2 + $0x130] sm:$0xf0] }
  0x2c   :  { %559 = vmatpush.bf16.msrb.mxu3 %v1131_v14  ;;  %532 = vmatpush.bf16.msrb.mxu1 %v1175_v23  ;;  %v1307_v12 = vor.u32 %v1450_v11, %v1306_v10  ;;  %v1136_v14 = vld [vmem:[%s2133_s2 + $0x54] sm:$0xf0]  ;;  %v1424_v21 = vld [vmem:[%s2133_s2 + $0xc8] sm:$0xf0]  ;;  %v1150_v23 = vld [vmem:[%s2133_s2 + $0x30] sm:$0xf] }
  0x2d   :  { %1364 = vmatmul.msk.bf16.vlgmr.msrb.gmra.mxu0 %vm414_vm2, %v1656_v18  ;;  %v1139_v17 = vor.u32 %v1403_v13, %v1136_v14  ;;  %v1411_v24 = vld [vmem:[%s2133_s2 + $0x60] sm:$0xf0]  ;;  %s885_s3 = smul.u32 2654435761, %s884_s13 }
  0x2e   :  { %568 = vmatpush.bf16.msra.mxu0 %v447_v9  ;;  %1366 = vmatmul.msk.bf16.vlgmr.msrb.gmra.mxu2 %vm414_vm2, %v1656_v18  ;;  %v1147_v9 = vor.u32 %v1404_v0, %v1144_v1  ;;  %v1151_v25 = vor.u32 %v1411_v24, %v1150_v23 }
  0x2f   :  { %594 = vmatpush.bf16.msra.mxu2 %v453_v15  ;;  %1367 = vmatmul.msk.bf16.vlgmr.msrb.gmra.mxu3 %vm414_vm2, %v1656_v18  ;;  %v1254_v15 = vld [vmem:[%s2133_s2 + $0x100] sm:$0xf]  ;;  %v1948_v34 = vstv %s885_s3 }
  0x30   :  { %607 = vmatpush.bf16.msra.mxu3 %v456_v20  ;;  %533 = vmatpush.bf16.msrb.mxu1 %v1123_v36  ;;  %v1255_v19 = vor.u32 %v1437_v16, %v1254_v15  ;;  %v1202_v20 = vld [vmem:[%s2133_s2 + $0x98] sm:$0xf]  ;;  %s674_s2 = smul.u32 2654435761, %s673_s10 }
  0x31   :  { %v1203_v22 = vor.u32 %v1424_v21, %v1202_v20 }
  0x32   :  { %569 = vmatpush.bf16.msra.mxu0 %v1291_v26  ;;  %v643_v26 = vlaneseq }
  0x33   :  { %595 = vmatpush.bf16.msra.mxu2 %v1299_v30  ;;  %1365 = vmatmul.msk.bf16.vlgmr.msrb.gmra.mxu1 %vm414_vm2, %v1656_v18 }
  0x34   :  { %608 = vmatpush.bf16.msra.mxu3 %v1303_v33  ;;  %581 = vmatpush.bf16.msra.mxu1 %v450_v40  ;;  %v644_v27 = vshrl.u32 %v643_v26, 7  ;;  %v1936_v28 = vand.u32 127, %v643_v26 }
  0x36   :  { %570 = vmatpush.bf16.msra.mxu0 %v1239_v39  ;;  %v1938_v29 = vmul.u32 1568, %v644_v27  ;;  %v648_v44 = vadd.s32 256, %v1936_v28  ;;  %v649_v45 = vadd.s32 384, %v1936_v28 }
  0x37   :  { %596 = vmatpush.bf16.msra.mxu2 %v1247_v43  ;;  %v647_v43 = vadd.s32 128, %v1936_v28 }
  0x38   :  { %609 = vmatpush.bf16.msra.mxu3 %v1251_v47  ;;  %582 = vmatpush.bf16.msra.mxu1 %v1295_v54  ;;  %v660_v30 = vadd.s32 %v1938_v29, %v1936_v28  ;;  %v650_v47 = vadd.s32 512, %v1936_v28  ;;  %v662_v49 = vadd.s32 %v1938_v29, %v648_v44  ;;  %v663_v50 = vadd.s32 %v1938_v29, %v649_v45 }
  0x39   :  { %v661_v48 = vadd.s32 %v1938_v29, %v647_v43 }
  0x3a   :  { %571 = vmatpush.bf16.msra.mxu0 %v1187_v53  ;;  %v675_v31 = vmul.u32 2246822507, %v660_v30  ;;  %v664_v52 = vadd.s32 %v1938_v29, %v650_v47  ;;  %v677_v54 = vmul.u32 2246822507, %v662_v49 }
  0x3b   :  { %597 = vmatpush.bf16.msra.mxu2 %v1195_v56  ;;  %v676_v53 = vmul.u32 2246822507, %v661_v48  ;;  %v678_v56 = vmul.u32 2246822507, %v663_v50 }
  0x3c   :  { %610 = vmatpush.bf16.msra.mxu3 %v1199_v61  ;;  %583 = vmatpush.bf16.msra.mxu1 %v1243_v3  ;;  %v887_v35 = vadd.s32 %v1948_v34, %v675_v31  ;;  %v679_v59 = vmul.u32 2246822507, %v664_v52 }
  0x3d   :  { %v888_v1 = vadd.s32 %v1948_v34, %v676_v53  ;;  %v890_v7 = vadd.s32 %v1948_v34, %v678_v56 }
  0x3e   :  { %572 = vmatpush.bf16.msra.mxu0 %v1135_v2  ;;  %v900_v37 = vshrl.u32 %v887_v35, 16  ;;  %v889_v2 = vadd.s32 %v1948_v34, %v677_v54  ;;  %v891_v27 = vadd.s32 %v1948_v34, %v679_v59 }
  0x3f   :  { %598 = vmatpush.bf16.msra.mxu2 %v1143_v6  ;;  %v901_v10 = vshrl.u32 %v888_v1, 16  ;;  %v903_v14 = vshrl.u32 %v890_v7, 16 }
  0x40   :  { %611 = vmatpush.bf16.msra.mxu3 %v1147_v9  ;;  %584 = vmatpush.bf16.msra.mxu1 %v1191_v5  ;;  %v913_v39 = vxor.u32 %v900_v37, %v887_v35  ;;  %v902_v11 = vshrl.u32 %v889_v2, 16 }
  0x41   :  { %1368 = vmatmul.msk.bf16.vlgmr.msra.gmra.mxu0 %vm414_vm2, %v1656_v18  ;;  %v914_v16 = vxor.u32 %v901_v10, %v888_v1 }
  0x42   :  { %620 = vmatpush.bf16.msrb.mxu0 %v459_v4  ;;  %1370 = vmatmul.msk.bf16.vlgmr.msra.gmra.mxu2 %vm414_vm2, %v1656_v18  ;;  %v926_v41 = vmul.u32 2146121005, %v913_v39 }
  0x43   :  { %1371 = vmatmul.msk.bf16.vlgmr.msra.gmra.mxu3 %vm414_vm2, %v1656_v18 }
  0x44   :  { %585 = vmatpush.bf16.msra.mxu1 %v1139_v17  ;;  %v939_v46 = vshrl.u32 %v926_v41, 15  ;;  %v915_v17 = vxor.u32 %v902_v11, %v889_v2 }
  0x46   :  { %621 = vmatpush.bf16.msrb.mxu0 %v1307_v12  ;;  %v952_v55 = vxor.u32 %v939_v46, %v926_v41  ;;  %v928_v26 = vmul.u32 2146121005, %v915_v17 }
  0x47   :  { %1369 = vmatmul.msk.bf16.vlgmr.msra.gmra.mxu1 %vm414_vm2, %v1656_v18 }
  0x48   :  { %v965_v0 = vmul.u32 2221713035, %v952_v55 }
  0x4a   :  { %622 = vmatpush.bf16.msrb.mxu0 %v1255_v19  ;;  %v978_v15 = vshrl.u32 %v965_v0, 16 }
  0x4e   :  { %623 = vmatpush.bf16.msrb.mxu0 %v1203_v22  ;;  %v916_v22 = vxor.u32 %v903_v14, %v890_v7 }
  0x52   :  { %624 = vmatpush.bf16.msrb.mxu0 %v1151_v25  ;;  %v927_v25 = vmul.u32 2146121005, %v914_v16 }
  0x54   :  { %v940_v35 = vshrl.u32 %v927_v25, 15 }
  0x55   :  { %1372 = vmatmul.msk.bf16.vlgmr.msrb.gmra.mxu0 %vm414_vm2, %v1656_v18  ;;  %v1945_v18 = vstv %s674_s2 }
  0x56   :  { %v689_v32 = vadd.s32 %v1945_v18, %v675_v31  ;;  %v690_v57 = vadd.s32 %v1945_v18, %v676_v53  ;;  %v691_v58 = vadd.s32 %v1945_v18, %v677_v54  ;;  %v692_v61 = vadd.s32 %v1945_v18, %v678_v56 }
  0x57   :  { %v693_v8 = vadd.s32 %v1945_v18, %v679_v59  ;;  %v953_v43 = vxor.u32 %v940_v35, %v927_v25 }
  0x58   :  { %v702_v33 = vshrl.u32 %v689_v32, 16  ;;  %v703_v62 = vshrl.u32 %v690_v57, 16  ;;  %v704_v63 = vshrl.u32 %v691_v58, 16  ;;  %v705_v3 = vshrl.u32 %v692_v61, 16 }
  0x59   :  { %v706_v23 = vshrl.u32 %v693_v8, 16  ;;  %v966_v52 = vmul.u32 2221713035, %v953_v43 }
  0x5a   :  { %v715_v36 = vxor.u32 %v702_v33, %v689_v32  ;;  %v716_v4 = vxor.u32 %v703_v62, %v690_v57  ;;  %v717_v6 = vxor.u32 %v704_v63, %v691_v58  ;;  %v718_v5 = vxor.u32 %v705_v3, %v692_v61 }
  0x5b   :  { %v929_v33 = vmul.u32 2146121005, %v916_v22  ;;  %v719_v37 = vxor.u32 %v706_v23, %v693_v8  ;;  %v979_v59 = vshrl.u32 %v966_v52, 16 }
  0x5c   :  { %v728_v38 = vmul.u32 2146121005, %v715_v36  ;;  %v729_v12 = vmul.u32 2146121005, %v716_v4  ;;  %v730_v13 = vmul.u32 2146121005, %v717_v6 }
  0x5d   :  { %v731_v19 = vmul.u32 2146121005, %v718_v5  ;;  %v941_v36 = vshrl.u32 %v928_v26, 15  ;;  %v732_v45 = vmul.u32 2146121005, %v719_v37  ;;  %v992_v2 = vxor.u32 %v979_v59, %v966_v52 }
  0x5e   :  { %v741_v40 = vshrl.u32 %v728_v38, 15  ;;  %v742_v20 = vshrl.u32 %v729_v12, 15  ;;  %v743_v21 = vshrl.u32 %v730_v13, 15  ;;  %v654_v37 = vadd.s32 1024, %v1936_v28 }
  0x5f   :  { %v744_v32 = vshrl.u32 %v731_v19, 15  ;;  %v954_v44 = vxor.u32 %v941_v36, %v928_v26  ;;  %v745_v54 = vshrl.u32 %v732_v45, 15  ;;  %v1005_v14 = vand.u32 16777215, %v992_v2 }
  0x60   :  { %v754_v42 = vxor.u32 %v741_v40, %v728_v38  ;;  %v755_v30 = vxor.u32 %v742_v20, %v729_v12  ;;  %v756_v31 = vxor.u32 %v743_v21, %v730_v13  ;;  %v904_v38 = vshrl.u32 %v891_v27, 16 }
  0x61   :  { %v757_v41 = vxor.u32 %v744_v32, %v731_v19  ;;  %v967_v53 = vmul.u32 2221713035, %v954_v44  ;;  %v758_v61 = vxor.u32 %v745_v54, %v732_v45  ;;  %v652_v21 = vadd.s32 768, %v1936_v28 }
  0x62   :  { %v767_v51 = vmul.u32 2221713035, %v754_v42  ;;  %v768_v39 = vmul.u32 2221713035, %v755_v30  ;;  %v769_v40 = vmul.u32 2221713035, %v756_v31  ;;  %v917_v46 = vxor.u32 %v904_v38, %v891_v27 }
  0x63   :  { %v942_v42 = vshrl.u32 %v929_v33, 15  ;;  %v770_v49 = vmul.u32 2221713035, %v757_v41  ;;  %v771_v4 = vmul.u32 2221713035, %v758_v61  ;;  %v666_v31 = vadd.s32 %v1938_v29, %v652_v21 }
  0x64   :  { %v780_v60 = vshrl.u32 %v767_v51, 16  ;;  %v781_v47 = vshrl.u32 %v768_v39, 16  ;;  %v782_v48 = vshrl.u32 %v769_v40, 16  ;;  %v930_v62 = vmul.u32 2146121005, %v917_v46 }
  0x65   :  { %v955_v50 = vxor.u32 %v942_v42, %v929_v33  ;;  %v783_v57 = vshrl.u32 %v770_v49, 16  ;;  %v784_v5 = vshrl.u32 %v771_v4, 16  ;;  %v1984_v33 = vxor.u32 2147483648, %v1005_v14 }
  0x66   :  { %v793_v9 = vxor.u32 %v780_v60, %v767_v51  ;;  %v991_v51 = vxor.u32 %v978_v15, %v965_v0  ;;  %v794_v55 = vxor.u32 %v781_v47, %v768_v39  ;;  %v795_v56 = vxor.u32 %v782_v48, %v769_v40 }
  0x67   :  { %v968_v58 = vmul.u32 2221713035, %v955_v50  ;;  %v980_v60 = vshrl.u32 %v967_v53, 16  ;;  %v796_v63 = vxor.u32 %v783_v57, %v770_v49  ;;  %v943_v6 = vshrl.u32 %v930_v62, 15 }
  0x68   :  { %v806_v24 = vand.u32 16777215, %v793_v9  ;;  %v1004_v0 = vand.u32 16777215, %v991_v51  ;;  %v807_v8 = vand.u32 16777215, %v794_v55  ;;  %v797_v16 = vxor.u32 %v784_v5, %v771_v4 }
  0x69   :  { %v981_v1 = vshrl.u32 %v968_v58, 16  ;;  %v993_v3 = vxor.u32 %v980_v60, %v967_v53  ;;  %v651_v9 = vadd.s32 640, %v1936_v28  ;;  %v808_v10 = vand.u32 16777215, %v795_v56 }
  0x6a   :  { %v1967_v7 = vxor.u32 2147483648, %v806_v24  ;;  %v956_v12 = vxor.u32 %v943_v6, %v930_v62  ;;  %v809_v13 = vand.u32 16777215, %v796_v63  ;;  %v1970_v19 = vxor.u32 2147483648, %v1004_v0 }
  0x6b   :  { %v994_v11 = vxor.u32 %v981_v1, %v968_v58  ;;  %v1006_v15 = vand.u32 16777215, %v993_v3  ;;  %v665_v20 = vadd.s32 %v1938_v29, %v651_v9  ;;  %v1975_v22 = vxor.u32 2147483648, %v807_v8 }
  0x6c   :  { %v969_v17 = vmul.u32 2221713035, %v956_v12  ;;  %vm821_vm3 = vcmp.ge.s32.totalorder %v1967_v7, 2151677952  ;;  %v1977_v23 = vxor.u32 2147483648, %v808_v10  ;;  %v810_v25 = vand.u32 16777215, %v797_v16 }
  0x6d   :  { %v1007_v24 = vand.u32 16777215, %v994_v11  ;;  %v1979_v26 = vxor.u32 2147483648, %v809_v13  ;;  %v680_v30 = vmul.u32 2246822507, %v665_v20  ;;  %v1986_v35 = vxor.u32 2147483648, %v1006_v15 }
  0x6e   :  { %v982_v27 = vshrl.u32 %v969_v17, 16  ;;  %v653_v36 = vadd.s32 896, %v1936_v28  ;;  %vm1019_vm4 = vcmp.ge.s32.totalorder %v1970_v19, 2150839091  ;;  %v681_v41 = vmul.u32 2246822507, %v666_v31 }
  0x6f   :  { %v694_v39 = vadd.s32 %v1945_v18, %v680_v30  ;;  %v892_v40 = vadd.s32 %v1948_v34, %v680_v30  ;;  %v1993_v43 = vxor.u32 2147483648, %v1007_v24  ;;  %v1995_v44 = vxor.u32 2147483648, %v810_v25 }
  0x70   :  { %v995_v38 = vxor.u32 %v982_v27, %v969_v17  ;;  %v667_v45 = vadd.s32 %v1938_v29, %v653_v36  ;;  %v1999_v46 = vadd.s32 %v1938_v29, %v654_v37  ;;  %v695_v51 = vadd.s32 %v1945_v18, %v681_v41 }
  0x71   :  { %v707_v49 = vshrl.u32 %v694_v39, 16  ;;  %v905_v50 = vshrl.u32 %v892_v40, 16  ;;  %v893_v52 = vadd.s32 %v1948_v34, %v681_v41  ;;  %vm827_vm5 = vcmp.ge.s32.totalorder %v1977_v23, 2151677952 }
  0x72   :  { %v1008_v48 = vand.u32 16777215, %v995_v38  ;;  %v682_v53 = vmul.u32 2246822507, %v667_v45  ;;  %v683_v54 = vmul.u32 2246822507, %v1999_v46 }
  0x73   :  { %v720_v56 = vxor.u32 %v707_v49, %v694_v39  ;;  %v918_v57 = vxor.u32 %v905_v50, %v892_v40  ;;  %v2007_v58 = vadd.s32 1152, %v1936_v28  ;;  %vm824_vm6 = vcmp.ge.s32.totalorder %v1975_v22, 2151677952 }
  0x74   :  { %v708_v59 = vshrl.u32 %v695_v51, 16  ;;  %v906_v60 = vshrl.u32 %v893_v52, 16  ;;  %v696_v61 = vadd.s32 %v1945_v18, %v682_v53  ;;  %v894_v62 = vadd.s32 %v1948_v34, %v682_v53 }
  0x75   :  { %vm830_vm7 = vcmp.ge.s32.totalorder %v1979_v26, 2151677952  ;;  %v2013_v1 = vxor.u32 2147483648, %v1008_v48  ;;  %v733_v2 = vmul.u32 2146121005, %v720_v56  ;;  %v2018_v3 = vadd.s32 %v1945_v18, %v683_v54 }
  0x76   :  { %vm1025_vm8 = vcmp.ge.s32.totalorder %v1986_v35, 2150839091  ;;  %v931_v4 = vmul.u32 2146121005, %v918_v57  ;;  %v721_v6 = vxor.u32 %v708_v59, %v695_v51  ;;  %v919_v0 = vxor.u32 %v906_v60, %v893_v52 }
  0x77   :  { %v709_v8 = vshrl.u32 %v696_v61, 16  ;;  %vm1022_vm9 = vcmp.ge.s32.totalorder %v1984_v33, 2150839091  ;;  %v746_v11 = vshrl.u32 %v733_v2, 15  ;;  %v907_v5 = vshrl.u32 %v894_v62, 16 }
  0x78   :  { %v710_v12 = vshrl.u32 %v2018_v3, 16  ;;  %vm1028_vm10 = vcmp.ge.s32.totalorder %v1993_v43, 2150839091  ;;  %v944_v17 = vshrl.u32 %v931_v4, 15  ;;  %v734_v20 = vmul.u32 2146121005, %v721_v6 }
  0x79   :  { %v759_v24 = vxor.u32 %v746_v11, %v733_v2  ;;  %v932_v25 = vmul.u32 2146121005, %v919_v0  ;;  %v722_v27 = vxor.u32 %v709_v8, %v696_v61  ;;  %v2034_v48 = vxor.u32 %v907_v5, %v894_v62 }
  0x7a   :  { %v957_v37 = vxor.u32 %v944_v17, %v931_v4  ;;  %v747_v40 = vshrl.u32 %v734_v20, 15  ;;  %vm833_vm11 = vcmp.ge.s32.totalorder %v1995_v44, 2151677952  ;;  %vm1031_vm12 = vcmp.ge.s32.totalorder %v2013_v1, 2150839091 }
  0x7b   :  { %v772_v39 = vmul.u32 2221713035, %v759_v24  ;;  %v945_v41 = vshrl.u32 %v932_v25, 15  ;;  %v735_v56 = vmul.u32 2146121005, %v722_v27  ;;  %v723_v43 = vxor.u32 %v710_v12, %v2018_v3 }
  0x7c   :  { %v760_v50 = vxor.u32 %v747_v40, %v734_v20  ;;  %v669_v3 = vadd.s32 %v1938_v29, %v2007_v58 }
  0x7d   :  { %v785_v19 = vshrl.u32 %v772_v39, 16  ;;  %v958_v51 = vxor.u32 %v945_v41, %v932_v25  ;;  %v748_v17 = vshrl.u32 %v735_v56, 15 }
  0x7e   :  { %v773_v62 = vmul.u32 2221713035, %v760_v50 }
  0x7f   :  { %v798_v61 = vxor.u32 %v785_v19, %v772_v39  ;;  %v971_v0 = vmul.u32 2221713035, %v958_v51  ;;  %v761_v25 = vxor.u32 %v748_v17, %v735_v56  ;;  %v736_v39 = vmul.u32 2146121005, %v723_v43 }
  0x80   :  { %v786_v22 = vshrl.u32 %v773_v62, 16 }
  0x81   :  { %v811_v11 = vand.u32 16777215, %v798_v61  ;;  %v749_v50 = vshrl.u32 %v736_v39, 15 }
  0x8b   :  { %v1982_v32 = vpop.permute.xlu0 %94 }
  0x96   :  { %v470_v42 = vpop.f32.mrf.mxu0 }
  0x97   :  { %v471_v47 = vadd.f32 %v470_v42, %v1982_v32 }
  0x99   :  { %v630_v55 = vmax.f32 %v471_v47, 0.0  ;;  %v970_v47 = vmul.u32 2221713035, %v957_v37  ;;  %v774_v37 = vmul.u32 2221713035, %v761_v25 }
  0x9b   :  { %v858_v63 = vmul.f32 1.3333334, %v630_v55  ;;  %v983_v55 = vshrl.u32 %v970_v47, 16 }
  0x9c   :  { %v483_v15 = vpop.f32.mrf.mxu1 }
  0x9d   :  { %v871_v9 = vsel %vm821_vm3, %v858_v63, 0.0  ;;  %v496_v10 = vpop.f32.mrf.mxu2  ;;  %v484_v21 = vadd.f32 %v483_v15, %v1982_v32  ;;  %v996_v6 = vxor.u32 %v983_v55, %v970_v47  ;;  %v1378_v15 = vxor.u32 2147483648, %v811_v11 }
  0x9e   :  { %v1056_v13 = vmul.f32 1.25, %v871_v9  ;;  %v472_v14 = vpop.f32.mrf.mxu0  ;;  %v497_v16 = vadd.f32 %v496_v10, %v1982_v32  ;;  %v509_v7 = vpop.f32.mrf.mxu3 }
  0x9f   :  { %v510_v36 = vadd.f32 %v509_v7, %v1982_v32  ;;  %v631_v38 = vmax.f32 %v484_v21, 0.0  ;;  %v984_v14 = vshrl.u32 %v971_v0, 16  ;;  %v933_v7 = vmul.u32 2146121005, %v2034_v48 }
  0xa0   :  { %v1069_v30 = vsel %vm1019_vm4, %v1056_v13, 0.0  ;;  %v632_v31 = vmax.f32 %v497_v16, 0.0  ;;  %v1009_v13 = vand.u32 16777215, %v996_v6  ;;  %v799_v16 = vxor.u32 %v786_v22, %v773_v62 }
  0xa1   :  { %1082 = vst [vmem:[%s2137_s4] sm:$0x3f] %v1069_v30  ;;  %v633_v45 = vmax.f32 %v510_v36, 0.0  ;;  %v859_v49 = vmul.f32 1.3333334, %v631_v38  ;;  %v997_v21 = vxor.u32 %v984_v14, %v971_v0  ;;  %vm836_vm13 = vcmp.ge.s32.totalorder %v1378_v15, 2151677952 }
  0xa2   :  { %v860_v42 = vmul.f32 1.3333334, %v632_v31  ;;  %v2059_v20 = vxor.u32 2147483648, %v1009_v13  ;;  %v812_v24 = vand.u32 16777215, %v799_v16  ;;  %v895_v31 = vadd.s32 %v1948_v34, %v683_v54 }
  0xa3   :  { %v861_v53 = vmul.f32 1.3333334, %v633_v45  ;;  %v872_v57 = vsel %vm824_vm6, %v859_v49, 0.0  ;;  %v1010_v30 = vand.u32 16777215, %v997_v21  ;;  %v946_v38 = vshrl.u32 %v933_v7, 15 }
  0xa4   :  { %v873_v52 = vsel %vm827_vm5, %v860_v42, 0.0  ;;  %v1057_v63 = vmul.f32 1.25, %v872_v57  ;;  %v485_v4 = vpop.f32.mrf.mxu1  ;;  %v1379_v36 = vxor.u32 2147483648, %v812_v24  ;;  %vm1034_vm14 = vcmp.ge.s32.totalorder %v2059_v20, 2150839091 }
  0xa5   :  { %v1058_v59 = vmul.f32 1.25, %v873_v52  ;;  %v498_v60 = vpop.f32.mrf.mxu2  ;;  %v874_v2 = vsel %vm830_vm7, %v861_v53, 0.0  ;;  %v1392_v42 = vxor.u32 2147483648, %v1010_v30  ;;  %v908_v45 = vshrl.u32 %v895_v31, 16 }
  0xa6   :  { %v1059_v8 = vmul.f32 1.25, %v874_v2  ;;  %v511_v10 = vpop.f32.mrf.mxu3  ;;  %v1070_v5 = vsel %vm1022_vm9, %v1057_v63, 0.0  ;;  %vm839_vm15 = vcmp.ge.s32.totalorder %v1379_v36, 2151677952  ;;  %v787_v48 = vshrl.u32 %v774_v37, 16 }
  0xa7   :  { %v1071_v23 = vsel %vm1025_vm8, %v1058_v59, 0.0  ;;  %1083 = vst [vmem:[%s2137_s4 + $0x8] sm:$0x3f] %v1070_v5  ;;  %vm1037_vm0 = vcmp.ge.s32.totalorder %v1392_v42, 2150839091  ;;  %v959_v19 = vxor.u32 %v946_v38, %v933_v7  ;;  %v762_v57 = vxor.u32 %v749_v50, %v736_v39 }
  0xa8   :  { %1084 = vst [vmem:[%s2137_s4 + $0x10] sm:$0x3f] %v1071_v23  ;;  %v1072_v35 = vsel %vm1028_vm10, %v1059_v8, 0.0  ;;  %v800_v58 = vxor.u32 %v787_v48, %v774_v37  ;;  %v921_v59 = vxor.u32 %v908_v45, %v895_v31  ;;  %v656_v63 = vadd.s32 1280, %v1936_v28 }
  0xa9   :  { %1085 = vst [vmem:[%s2137_s4 + $0x18] sm:$0x3f] %v1072_v35  ;;  %v972_v56 = vmul.u32 2221713035, %v959_v19  ;;  %v775_v4 = vmul.u32 2221713035, %v762_v57 }
  0xaa   :  { %v522_v9 = vpop.f32.mrf.mxu0  ;;  %v813_v62 = vand.u32 16777215, %v800_v58  ;;  %v657_v6 = vadd.s32 1408, %v1936_v28  ;;  %v684_v16 = vmul.u32 2246822507, %v669_v3 }
  0xab   :  { %v523_v26 = vadd.f32 %v522_v9, %v1982_v32  ;;  %v985_v1 = vshrl.u32 %v972_v56, 16  ;;  %v934_v9 = vmul.u32 2146121005, %v921_v59  ;;  %v788_v5 = vshrl.u32 %v775_v4, 16 }
  0xac   :  { %v1380_v23 = vxor.u32 2147483648, %v813_v62  ;;  %v698_v37 = vadd.s32 %v1945_v18, %v684_v16  ;;  %v896_v38 = vadd.s32 %v1948_v34, %v684_v16 }
  0xad   :  { %v634_v33 = vmax.f32 %v523_v26, 0.0  ;;  %v998_v22 = vxor.u32 %v985_v1, %v972_v56  ;;  %v947_v14 = vshrl.u32 %v934_v9, 15  ;;  %v801_v24 = vxor.u32 %v788_v5, %v775_v4 }
  0xae   :  { %vm842_vm1 = vcmp.ge.s32.totalorder %v1380_v23, 2151677952  ;;  %v711_v45 = vshrl.u32 %v698_v37, 16  ;;  %v909_v3 = vshrl.u32 %v896_v38, 16 }
  0xaf   :  { %v862_v27 = vmul.f32 1.3333334, %v634_v33  ;;  %v1011_v21 = vand.u32 16777215, %v998_v22  ;;  %v960_v30 = vxor.u32 %v947_v14, %v934_v9  ;;  %v814_v36 = vand.u32 16777215, %v801_v24 }
  0xb0   :  { %v535_v46 = vpop.f32.mrf.mxu1  ;;  %v724_v48 = vxor.u32 %v711_v45, %v698_v37 }
  0xb1   :  { %v875_v40 = vsel %vm833_vm11, %v862_v27, 0.0  ;;  %v548_v41 = vpop.f32.mrf.mxu2  ;;  %v536_v49 = vadd.f32 %v535_v46, %v1982_v32  ;;  %v1393_v31 = vxor.u32 2147483648, %v1011_v21  ;;  %v973_v39 = vmul.u32 2221713035, %v960_v30 }
  0xb2   :  { %v1060_v12 = vmul.f32 1.25, %v875_v40  ;;  %v524_v47 = vpop.f32.mrf.mxu0  ;;  %v549_v54 = vadd.f32 %v548_v41, %v1982_v32  ;;  %v561_v44 = vpop.f32.mrf.mxu3  ;;  %v670_v40 = vadd.s32 %v1938_v29, %v656_v63  ;;  %v671_v41 = vadd.s32 %v1938_v29, %v657_v6 }
  0xb3   :  { %v562_v53 = vadd.f32 %v561_v44, %v1982_v32  ;;  %v635_v55 = vmax.f32 %v536_v49, 0.0  ;;  %vm1040_vm2 = vcmp.ge.s32.totalorder %v1393_v31, 2150839091  ;;  %v1381_v42 = vxor.u32 2147483648, %v814_v36 }
  0xb4   :  { %v1073_v51 = vsel %vm1031_vm12, %v1060_v12, 0.0  ;;  %v636_v52 = vmax.f32 %v549_v54, 0.0  ;;  %v986_v46 = vshrl.u32 %v973_v39, 16  ;;  %v685_v54 = vmul.u32 2246822507, %v670_v40 }
  0xb5   :  { %1086 = vst [vmem:[%s2137_s4 + $0x20] sm:$0x3f] %v1073_v51  ;;  %v637_v61 = vmax.f32 %v562_v53, 0.0  ;;  %v863_v2 = vmul.f32 1.3333334, %v635_v55  ;;  %vm845_vm3 = vcmp.ge.s32.totalorder %v1381_v42, 2151677952  ;;  %v922_v49 = vxor.u32 %v909_v3, %v896_v38 }
  0xb6   :  { %v864_v60 = vmul.f32 1.3333334, %v636_v52  ;;  %v999_v19 = vxor.u32 %v986_v46, %v973_v39  ;;  %v699_v51 = vadd.s32 %v1945_v18, %v685_v54  ;;  %v897_v52 = vadd.s32 %v1948_v34, %v685_v54 }
  0xb7   :  { %v865_v8 = vmul.f32 1.3333334, %v637_v61  ;;  %v876_v10 = vsel %vm836_vm13, %v863_v2, 0.0  ;;  %v737_v55 = vmul.u32 2146121005, %v724_v48  ;;  %vm1094_vm13 = vcmask 259072  }
  0xb8   :  { %v877_v0 = vsel %vm839_vm15, %v864_v60, 0.0  ;;  %v1061_v13 = vmul.f32 1.25, %v876_v10  ;;  %v537_v35 = vpop.f32.mrf.mxu1  ;;  %v935_v56 = vmul.u32 2146121005, %v922_v49  ;;  %v686_v57 = vmul.u32 2246822507, %v671_v41 }
  0xb9   :  { %v1062_v11 = vmul.f32 1.25, %v877_v0  ;;  %v550_v26 = vpop.f32.mrf.mxu2  ;;  %v878_v33 = vsel %vm842_vm1, %v865_v8, 0.0  ;;  %v1012_v59 = vand.u32 16777215, %v999_v19  ;;  %v712_v61 = vshrl.u32 %v699_v51, 16 }
  0xba   :  { %v563_v25 = vpop.f32.mrf.mxu3  ;;  %v1074_v15 = vsel %vm1034_vm14, %v1061_v13, 0.0  ;;  %v1063_v43 = vmul.f32 1.25, %v878_v33  ;;  %v910_v62 = vshrl.u32 %v897_v52, 16  ;;  %v750_v1 = vshrl.u32 %v737_v55, 15 }
  0xbb   :  { %v1075_v17 = vsel %vm1037_vm0, %v1062_v11, 0.0  ;;  %1087 = vst [vmem:[%s2137_s4 + $0x28] sm:$0x3f] %v1074_v15  ;;  %v948_v4 = vshrl.u32 %v935_v56, 15  ;;  %v1394_v6 = vxor.u32 2147483648, %v1012_v59  ;;  %v725_v0 = vxor.u32 %v712_v61, %v699_v51 }
  0xbc   :  { %1088 = vst [vmem:[%s2137_s4 + $0x30] sm:$0x3f] %v1075_v17  ;;  %v1076_v12 = vsel %vm1040_vm2, %v1063_v43, 0.0  ;;  %v923_v23 = vxor.u32 %v910_v62, %v897_v52  ;;  %v763_v9 = vxor.u32 %v750_v1, %v737_v55  ;;  %v700_v5 = vadd.s32 %v1945_v18, %v686_v57 }
  0xbd   :  { %1089 = vst [vmem:[%s2137_s4 + $0x38] sm:$0x3f] %v1076_v12  ;;  %v961_v10 = vxor.u32 %v948_v4, %v935_v56  ;;  %vm1043_vm4 = vcmp.ge.s32.totalorder %v1394_v6, 2150839091  ;;  %v738_v22 = vmul.u32 2146121005, %v725_v0  ;;  %v898_v35 = vadd.s32 %v1948_v34, %v686_v57 }
  0xbe   :  { %v574_v7 = vpop.f32.mrf.mxu0  ;;  %v776_v13 = vmul.u32 2221713035, %v763_v9  ;;  %v936_v17 = vmul.u32 2146121005, %v923_v23  ;;  %v713_v21 = vshrl.u32 %v700_v5, 16 }
  0xbf   :  { %v575_v27 = vadd.f32 %v574_v7, %v1982_v32  ;;  %v974_v14 = vmul.u32 2221713035, %v961_v10  ;;  %v751_v16 = vshrl.u32 %v738_v22, 15  ;;  %v911_v43 = vshrl.u32 %v898_v35, 16 }
  0xc0   :  { %v789_v25 = vshrl.u32 %v776_v13, 16  ;;  %v949_v31 = vshrl.u32 %v936_v17, 15  ;;  %v726_v36 = vxor.u32 %v713_v21, %v700_v5 }
  0xc1   :  { %v638_v20 = vmax.f32 %v575_v27, 0.0  ;;  %v987_v15 = vshrl.u32 %v974_v14, 16  ;;  %v764_v30 = vxor.u32 %v751_v16, %v738_v22  ;;  %v924_v42 = vxor.u32 %v911_v43, %v898_v35 }
  0xc2   :  { %v802_v39 = vxor.u32 %v789_v25, %v776_v13  ;;  %v962_v3 = vxor.u32 %v949_v31, %v936_v17  ;;  %v739_v12 = vmul.u32 2146121005, %v726_v36 }
  0xc3   :  { %v866_v47 = vmul.f32 1.3333334, %v638_v20  ;;  %v658_v20 = vadd.s32 1536, %v1936_v28  ;;  %v1000_v40 = vxor.u32 %v987_v15, %v974_v14  ;;  %v777_v45 = vmul.u32 2221713035, %v764_v30 }
  0xc4   :  { %v587_v58 = vpop.f32.mrf.mxu1  ;;  %v815_v46 = vand.u32 16777215, %v802_v39  ;;  %v937_v48 = vmul.u32 2146121005, %v924_v42  ;;  %v975_v19 = vmul.u32 2221713035, %v962_v3 }
  0xc5   :  { %v879_v44 = vsel %vm845_vm3, %v866_v47, 0.0  ;;  %v600_v50 = vpop.f32.mrf.mxu2  ;;  %v588_v8 = vadd.f32 %v587_v58, %v1982_v32  ;;  %v672_v47 = vadd.s32 %v1938_v29, %v658_v20  ;;  %v1013_v54 = vand.u32 16777215, %v1000_v40 }
  0xc6   :  { %v576_v53 = vpop.f32.mrf.mxu0  ;;  %v601_v60 = vadd.f32 %v600_v50, %v1982_v32  ;;  %v613_v63 = vpop.f32.mrf.mxu3  ;;  %v1064_v2 = vmul.f32 1.25, %v879_v44  ;;  %v790_v44 = vshrl.u32 %v777_v45, 16  ;;  %v752_v50 = vshrl.u32 %v739_v12, 15 }
  0xc7   :  { %v614_v33 = vadd.f32 %v613_v63, %v1982_v32  ;;  %v639_v24 = vmax.f32 %v588_v8, 0.0  ;;  %v1382_v51 = vxor.u32 2147483648, %v815_v46  ;;  %v1395_v52 = vxor.u32 2147483648, %v1013_v54 }
  0xc8   :  { %v640_v11 = vmax.f32 %v601_v60, 0.0  ;;  %v1077_v26 = vsel %vm1043_vm4, %v1064_v2, 0.0  ;;  %v950_v53 = vshrl.u32 %v937_v48, 15  ;;  %v687_v28 = vmul.u32 2246822507, %v672_v47 }
  0xc9   :  { %1090 = vst [vmem:[%s2137_s4 + $0x40] sm:$0x3f] %v1077_v26  ;;  %v867_v49 = vmul.f32 1.3333334, %v639_v24  ;;  %v803_v58 = vxor.u32 %v790_v44, %v777_v45  ;;  %v988_v55 = vshrl.u32 %v975_v19, 16  ;;  %v641_v56 = vmax.f32 %v614_v33, 0.0 }
  0xca   :  { %v868_v41 = vmul.f32 1.3333334, %v640_v11  ;;  %v765_v57 = vxor.u32 %v752_v50, %v739_v12  ;;  %vm848_vm5 = vcmp.ge.s32.totalorder %v1382_v51, 2151677952  ;;  %vm1046_vm6 = vcmp.ge.s32.totalorder %v1395_v52, 2150839091 }
  0xcb   :  { %v963_v59 = vxor.u32 %v950_v53, %v937_v48  ;;  %v701_v29 = vadd.s32 %v1945_v18, %v687_v28  ;;  %v880_v60 = vsel %vm848_vm5, %v867_v49, 0.0  ;;  %v816_v61 = vand.u32 16777215, %v803_v58 }
  0xcc   :  { %v589_v27 = vpop.f32.mrf.mxu1  ;;  %v1001_v62 = vxor.u32 %v988_v55, %v975_v19  ;;  %v778_v63 = vmul.u32 2221713035, %v765_v57  ;;  %v1065_v1 = vmul.f32 1.25, %v880_v60  ;;  %v899_v0 = vadd.s32 %v1948_v34, %v687_v28 }
  0xcd   :  { %v602_v7 = vpop.f32.mrf.mxu2  ;;  %v976_v4 = vmul.u32 2221713035, %v963_v59  ;;  %v714_v6 = vshrl.u32 %v701_v29, 16  ;;  %v1383_v23 = vxor.u32 2147483648, %v816_v61  ;;  %v869_v13 = vmul.f32 1.3333334, %v641_v56 }
  0xce   :  { %v615_v37 = vpop.f32.mrf.mxu3  ;;  %v1014_v8 = vand.u32 16777215, %v1001_v62  ;;  %v791_v9 = vshrl.u32 %v778_v63, 16  ;;  %v1078_v10 = vsel %vm1046_vm6, %v1065_v1, 0.0  ;;  %v912_v5 = vshrl.u32 %v899_v0, 16 }
  0xcf   :  { %v989_v11 = vshrl.u32 %v976_v4, 16  ;;  %v727_v22 = vxor.u32 %v714_v6, %v701_v29  ;;  %1091 = vst [vmem:[%s2137_s4 + $0x48] sm:$0x3f] %v1078_v10  ;;  %vm851_vm7 = vcmp.ge.s32.totalorder %v1383_v23, 2151677952 }
  0xd0   :  { %v1396_v18 = vxor.u32 2147483648, %v1014_v8  ;;  %v804_v26 = vxor.u32 %v791_v9, %v778_v63  ;;  %v881_v14 = vsel %vm851_vm7, %v868_v41, 0.0  ;;  %v925_v17 = vxor.u32 %v912_v5, %v899_v0 }
  0xd1   :  { %v1002_v35 = vxor.u32 %v989_v11, %v976_v4  ;;  %v740_v16 = vmul.u32 2146121005, %v727_v22  ;;  %v1066_v34 = vmul.f32 1.25, %v881_v14 }
  0xd2   :  { %v2113_v38 = vpop.f32.mrf.mxu0  ;;  %vm1049_vm8 = vcmp.ge.s32.totalorder %v1396_v18, 2150839091  ;;  %v817_v33 = vand.u32 16777215, %v804_v26  ;;  %v938_v24 = vmul.u32 2146121005, %v925_v17 }
  0xd3   :  { %v1015_v21 = vand.u32 16777215, %v1002_v35  ;;  %v753_v7 = vshrl.u32 %v740_v16, 15  ;;  %v1079_v25 = vsel %vm1049_vm8, %v1066_v34, 0.0  ;;  %v627_v31 = vadd.f32 %v2113_v38, %v1982_v32 }
  0xd4   :  { %v1384_v15 = vxor.u32 2147483648, %v817_v33  ;;  %1092 = vst [vmem:[%s2137_s4 + $0x50] sm:$0x3f] %v1079_v25  ;;  %v951_v30 = vshrl.u32 %v938_v24, 15 }
  0xd5   :  { %v1397_v43 = vxor.u32 2147483648, %v1015_v21  ;;  %v766_v27 = vxor.u32 %v753_v7, %v740_v16  ;;  %v642_v45 = vmax.f32 %v627_v31, 0.0 }
  0xd6   :  { %vm854_vm9 = vcmp.ge.s32.totalorder %v1384_v15, 2151677952  ;;  %v964_v20 = vxor.u32 %v951_v30, %v938_v24 }
  0xd7   :  { %v882_v36 = vsel %vm854_vm9, %v869_v13, 0.0  ;;  %vm1052_vm10 = vcmp.ge.s32.totalorder %v1397_v43, 2150839091  ;;  %v779_v37 = vmul.u32 2221713035, %v766_v27 }
  0xd8   :  { %v1067_v39 = vmul.f32 1.25, %v882_v36  ;;  %v977_v41 = vmul.u32 2221713035, %v964_v20  ;;  %v870_v54 = vmul.f32 1.3333334, %v642_v45 }
  0xd9   :  { %v792_v40 = vshrl.u32 %v779_v37, 16 }
  0xda   :  { %v628_v2 = vpop.f32.mrf.mxu0  ;;  %v1080_v42 = vsel %vm1052_vm10, %v1067_v39, 0.0  ;;  %v990_v12 = vshrl.u32 %v977_v41, 16 }
  0xdb   :  { %1093 = vst [vmem:[%s2137_s4 + $0x58] sm:$0x3f] %v1080_v42  ;;  %v805_v3 = vxor.u32 %v792_v40, %v779_v37 }
  0xdc   :  { %v1003_v46 = vxor.u32 %v990_v12, %v977_v41 }
  0xdd   :  { %v818_v47 = vand.u32 16777215, %v805_v3 }
  0xde   :  { %v1016_v32 = vand.u32 16777215, %v1003_v46 }
  0xdf   :  { %v1385_v48 = vxor.u32 2147483648, %v818_v47 }
  0xe0   :  { %v1398_v38 = vxor.u32 2147483648, %v1016_v32 }
  0xe1   :  { %vm857_vm11 = vcmp.ge.s32.totalorder %v1385_v48, 2151677952 }
  0xe2   :  { %v883_v49 = vsel %vm857_vm11, %v870_v54, 0.0  ;;  %vm1055_vm12 = vcmp.ge.s32.totalorder %v1398_v38, 2150839091 }
  0xe3   :  { %v1068_v44 = vmul.f32 1.25, %v883_v49 }
  0xe5   :  { %v1081_v19 = vsel %vm1055_vm12, %v1068_v44, 0.0 }
  0xe6   :  { %1095 = vst.msk [vmem:[%s2137_s4 + $0x60] sm:$0x3f] %vm1094_vm13, %v1081_v19 }

// kernel: _lambda_.8
= control target key start
LH: loop header
LB: loop body
LE: loop exit
PB: predicated region body
PF: predicated region fallthrough
CT: control target
= control target key end

     0   :  { %v50_v0 = vlaneseq  ;;  %vm193_vm0 = vcmask 556032   ;;  %vm196_vm8 = vcmask 551936   ;;  %s317_s0 = inlined_call_operand.<no memory space> [shape: s32[1], index: 0, kind: input, shape index: {}]   ;;  %s318_s1 = inlined_call_operand.vmem [shape: f32[12,196], index: 1, kind: input, shape index: {}]   ;;  %s319_s2 = inlined_call_operand.vmem [shape: f32[12,196], index: 2, kind: input, shape index: {}]   ;;  %s320_s3 = inlined_call_operand.vmem [shape: f32[12,196], index: 3, kind: input, shape index: {}]   ;;  %s321_s4 = inlined_call_operand.vmem [shape: f32[12,196], index: 4, kind: input, shape index: {}]   ;;  %s322_s5 = inlined_call_operand.vmem [shape: f32[12,196], index: 5, kind: output, shape index: {}]  }
   0x1   :  { %v22_v1 = vld [vmem:[%s318_s1] sm:$0xff]  ;;  %s62_s26 = sadd.s32 3, %s317_s0  ;;  %s129_s29 = sadd.s32 4, %s317_s0  ;;  %v23_v8 = vld [vmem:[%s318_s1 + $0x8] sm:$0xff]  ;;  %v24_v16 = vld [vmem:[%s318_s1 + $0x10] sm:$0xf] }
   0x2   :  { %v26_v2 = vld [vmem:[%s319_s2] sm:$0xff]  ;;  %v51_v6 = vshrl.u32 %v50_v0, 7  ;;  %v54_v7 = vand.u32 127, %v50_v0  ;;  %s63_s7 = smul.u32 2654435761, %s62_s26  ;;  %v27_v10 = vld [vmem:[%s319_s2 + $0x8] sm:$0xff] }
   0x3   :  { %v34_v3 = vld [vmem:[%s320_s3] sm:$0xff]  ;;  %v30_v4 = vmax.f32 %v22_v1, %v26_v2  ;;  %s130_s10 = smul.u32 2654435761, %s129_s29  ;;  %v35_v11 = vld [vmem:[%s320_s3 + $0x8] sm:$0xff]  ;;  %v31_v14 = vmax.f32 %v23_v8, %v27_v10  ;;  %v28_v17 = vld [vmem:[%s319_s2 + $0x10] sm:$0xf] }
   0x4   :  { %v38_v5 = vld [vmem:[%s321_s4] sm:$0xff]  ;;  %v39_v12 = vld [vmem:[%s321_s4 + $0x8] sm:$0xff]  ;;  %v56_v13 = vmul.u32 196, %v51_v6  ;;  %v55_v18 = vadd.s32 128, %v54_v7  ;;  %v36_v19 = vld [vmem:[%s320_s3 + $0x10] sm:$0xf]  ;;  %v32_v23 = vmax.f32 %v24_v16, %v28_v17  ;;  %v68_v25 = vstv %s63_s7 }
   0x5   :  { %v42_v9 = vmax.f32 %v34_v3, %v38_v5  ;;  %v43_v15 = vmax.f32 %v35_v11, %v39_v12  ;;  %v40_v20 = vld [vmem:[%s321_s4 + $0x10] sm:$0xf]  ;;  %v131_v26 = vstv %s130_s10  ;;  %v52_v28 = vadd.s32 8, %v51_v6  ;;  %v25_v31 = vld [vmem:[%s318_s1 + $0x18] sm:$0xf] }
   0x6   :  { %v58_v22 = vadd.s32 %v56_v13, %v54_v7  ;;  %v44_v24 = vmax.f32 %v36_v19, %v40_v20  ;;  %v59_v27 = vadd.s32 %v56_v13, %v55_v18  ;;  %v29_v34 = vld [vmem:[%s319_s2 + $0x18] sm:$0xf] }
   0x7   :  { %v46_v21 = vmax.f32 %v30_v4, %v42_v9  ;;  %v47_v30 = vmax.f32 %v31_v14, %v43_v15  ;;  %v57_v33 = vmul.u32 196, %v52_v28  ;;  %v37_v42 = vld [vmem:[%s320_s3 + $0x18] sm:$0xf]  ;;  %v33_v48 = vmax.f32 %v25_v31, %v29_v34 }
   0x8   :  { %v64_v29 = vmul.u32 2246822507, %v58_v22  ;;  %v65_v32 = vmul.u32 2246822507, %v59_v27  ;;  %v48_v38 = vmax.f32 %v32_v23, %v44_v24  ;;  %v41_v43 = vld [vmem:[%s321_s4 + $0x18] sm:$0xf] }
   0x9   :  { %v288_v36 = vmul.f32 1.3333334, %v46_v21  ;;  %v60_v41 = vadd.s32 %v57_v33, %v54_v7  ;;  %v61_v44 = vadd.s32 %v57_v33, %v55_v18  ;;  %v296_v47 = vmul.f32 1.3333334, %v47_v30 }
   0xa   :  { %v69_v35 = vadd.s32 %v68_v25, %v64_v29  ;;  %v132_v37 = vadd.s32 %v131_v26, %v64_v29  ;;  %v70_v39 = vadd.s32 %v68_v25, %v65_v32  ;;  %v133_v40 = vadd.s32 %v131_v26, %v65_v32 }
   0xb   :  { %v66_v51 = vmul.u32 2246822507, %v60_v41  ;;  %v67_v52 = vmul.u32 2246822507, %v61_v44  ;;  %v298_v55 = vmul.f32 1.3333334, %v48_v38  ;;  %v45_v56 = vmax.f32 %v37_v42, %v41_v43 }
   0xc   :  { %v73_v45 = vshrl.u32 %v69_v35, 16  ;;  %v136_v46 = vshrl.u32 %v132_v37, 16  ;;  %v74_v49 = vshrl.u32 %v70_v39, 16  ;;  %v137_v50 = vshrl.u32 %v133_v40, 16 }
   0xd   :  { %v71_v59 = vadd.s32 %v68_v25, %v66_v51  ;;  %v134_v60 = vadd.s32 %v131_v26, %v66_v51  ;;  %v72_v63 = vadd.s32 %v68_v25, %v67_v52  ;;  %v135_v0 = vadd.s32 %v131_v26, %v67_v52 }
   0xe   :  { %v77_v53 = vxor.u32 %v73_v45, %v69_v35  ;;  %v140_v54 = vxor.u32 %v136_v46, %v132_v37  ;;  %v78_v57 = vxor.u32 %v74_v49, %v70_v39  ;;  %v141_v58 = vxor.u32 %v137_v50, %v133_v40 }
   0xf   :  { %v75_v3 = vshrl.u32 %v71_v59, 16  ;;  %v138_v4 = vshrl.u32 %v134_v60, 16  ;;  %v76_v7 = vshrl.u32 %v72_v63, 16  ;;  %v139_v8 = vshrl.u32 %v135_v0, 16 }
  0x10   :  { %v81_v61 = vmul.u32 2146121005, %v77_v53  ;;  %v144_v62 = vmul.u32 2146121005, %v140_v54  ;;  %v82_v1 = vmul.u32 2146121005, %v78_v57  ;;  %v49_v23 = vmax.f32 %v33_v48, %v45_v56 }
  0x11   :  { %v145_v2 = vmul.u32 2146121005, %v141_v58  ;;  %v79_v11 = vxor.u32 %v75_v3, %v71_v59  ;;  %v142_v12 = vxor.u32 %v138_v4, %v134_v60  ;;  %v80_v15 = vxor.u32 %v76_v7, %v72_v63 }
  0x12   :  { %v85_v5 = vshrl.u32 %v81_v61, 15  ;;  %v148_v6 = vshrl.u32 %v144_v62, 15  ;;  %v86_v9 = vshrl.u32 %v82_v1, 15  ;;  %v143_v16 = vxor.u32 %v139_v8, %v135_v0 }
  0x13   :  { %v149_v10 = vshrl.u32 %v145_v2, 15  ;;  %v83_v19 = vmul.u32 2146121005, %v79_v11  ;;  %v146_v20 = vmul.u32 2146121005, %v142_v12 }
  0x14   :  { %v89_v13 = vxor.u32 %v85_v5, %v81_v61  ;;  %v152_v14 = vxor.u32 %v148_v6, %v144_v62  ;;  %v90_v17 = vxor.u32 %v86_v9, %v82_v1  ;;  %v84_v24 = vmul.u32 2146121005, %v80_v15 }
  0x15   :  { %v153_v18 = vxor.u32 %v149_v10, %v145_v2  ;;  %v87_v27 = vshrl.u32 %v83_v19, 15  ;;  %v150_v28 = vshrl.u32 %v146_v20, 15  ;;  %v147_v32 = vmul.u32 2146121005, %v143_v16 }
  0x16   :  { %v93_v21 = vmul.u32 2221713035, %v89_v13  ;;  %v156_v22 = vmul.u32 2221713035, %v152_v14  ;;  %v94_v25 = vmul.u32 2221713035, %v90_v17 }
  0x17   :  { %v157_v26 = vmul.u32 2221713035, %v153_v18  ;;  %v88_v31 = vshrl.u32 %v84_v24, 15  ;;  %v91_v35 = vxor.u32 %v87_v27, %v83_v19  ;;  %v154_v37 = vxor.u32 %v150_v28, %v146_v20 }
  0x18   :  { %v97_v29 = vshrl.u32 %v93_v21, 16  ;;  %v160_v30 = vshrl.u32 %v156_v22, 16  ;;  %v98_v33 = vshrl.u32 %v94_v25, 16  ;;  %v151_v41 = vshrl.u32 %v147_v32, 15 }
  0x19   :  { %v161_v34 = vshrl.u32 %v157_v26, 16  ;;  %v92_v40 = vxor.u32 %v88_v31, %v84_v24  ;;  %v95_v44 = vmul.u32 2221713035, %v91_v35  ;;  %v158_v45 = vmul.u32 2221713035, %v154_v37 }
  0x1a   :  { %v101_v38 = vxor.u32 %v97_v29, %v93_v21  ;;  %v164_v39 = vxor.u32 %v160_v30, %v156_v22  ;;  %v102_v42 = vxor.u32 %v98_v33, %v94_v25  ;;  %v155_v50 = vxor.u32 %v151_v41, %v147_v32 }
  0x1b   :  { %v165_v43 = vxor.u32 %v161_v34, %v157_v26  ;;  %v96_v49 = vmul.u32 2221713035, %v92_v40  ;;  %v99_v53 = vshrl.u32 %v95_v44, 16  ;;  %v162_v54 = vshrl.u32 %v158_v45, 16 }
  0x1c   :  { %v105_v46 = vand.u32 16777215, %v101_v38  ;;  %v168_v48 = vand.u32 16777215, %v164_v39  ;;  %v106_v51 = vand.u32 16777215, %v102_v42 }
  0x1d   :  { %v169_v52 = vand.u32 16777215, %v165_v43  ;;  %v100_v58 = vshrl.u32 %v96_v49, 16  ;;  %v159_v59 = vmul.u32 2221713035, %v155_v50  ;;  %v103_v62 = vxor.u32 %v99_v53, %v95_v44 }
  0x1e   :  { %v202_v56 = vxor.u32 2147483648, %v105_v46  ;;  %v206_v57 = vxor.u32 2147483648, %v168_v48  ;;  %v203_v60 = vxor.u32 2147483648, %v106_v51  ;;  %v166_v63 = vxor.u32 %v162_v54, %v158_v45 }
  0x1f   :  { %v207_v61 = vxor.u32 2147483648, %v169_v52  ;;  %v104_v0 = vxor.u32 %v100_v58, %v96_v49  ;;  %v163_v1 = vshrl.u32 %v159_v59, 16  ;;  %v107_v3 = vand.u32 16777215, %v103_v62 }
  0x20   :  { %vm111_vm1 = vcmp.ge.s32.totalorder %v202_v56, 2151677952  ;;  %vm174_vm2 = vcmp.ge.s32.totalorder %v206_v57, 2150839091  ;;  %vm114_vm3 = vcmp.ge.s32.totalorder %v203_v60, 2151677952  ;;  %v170_v6 = vand.u32 16777215, %v166_v63 }
  0x21   :  { %v125_v2 = vsel %vm111_vm1, %v288_v36, 0.0  ;;  %vm177_vm4 = vcmp.ge.s32.totalorder %v207_v61, 2150839091  ;;  %v126_v5 = vsel %vm114_vm3, %v296_v47, 0.0  ;;  %v108_v7 = vand.u32 16777215, %v104_v0 }
  0x22   :  { %v184_v4 = vmul.f32 1.25, %v125_v2  ;;  %v185_v8 = vmul.f32 1.25, %v126_v5  ;;  %v204_v9 = vxor.u32 2147483648, %v107_v3  ;;  %v124_v10 = vmul.f32 1.3333334, %v49_v23 }
  0x23   :  { %v167_v11 = vxor.u32 %v163_v1, %v159_v59  ;;  %v208_v13 = vxor.u32 2147483648, %v170_v6  ;;  %v205_v14 = vxor.u32 2147483648, %v108_v7 }
  0x24   :  { %v188_v12 = vsel %vm174_vm2, %v184_v4, 0.0  ;;  %v189_v36 = vsel %vm177_vm4, %v185_v8, 0.0  ;;  %vm117_vm5 = vcmp.ge.s32.totalorder %v204_v9, 2151677952 }
  0x25   :  { %192 = vst [vmem:[%s322_s5] sm:$0xff] %v188_v12  ;;  %v171_v15 = vand.u32 16777215, %v167_v11  ;;  %v127_v47 = vsel %vm117_vm5, %v298_v55, 0.0  ;;  %vm180_vm6 = vcmp.ge.s32.totalorder %v208_v13, 2150839091  ;;  %vm120_vm7 = vcmp.ge.s32.totalorder %v205_v14, 2151677952 }
  0x26   :  { %194 = vst.msk [vmem:[%s322_s5 + $0x8] sm:$0xff] %vm193_vm0, %v189_v36  ;;  %v186_v16 = vmul.f32 1.25, %v127_v47  ;;  %v128_v17 = vsel %vm120_vm7, %v124_v10, 0.0 }
  0x27   :  { %v209_v18 = vxor.u32 2147483648, %v171_v15  ;;  %v187_v19 = vmul.f32 1.25, %v128_v17 }
  0x28   :  { %v190_v20 = vsel %vm180_vm6, %v186_v16, 0.0 }
  0x29   :  { %vm183_vm9 = vcmp.ge.s32.totalorder %v209_v18, 2150839091  ;;  %195 = vst [vmem:[%s322_s5 + $0x10] sm:$0xf] %v190_v20 }
  0x2a   :  { %v191_v21 = vsel %vm183_vm9, %v187_v19, 0.0 }
  0x2b   :  { %197 = vst.msk [vmem:[%s322_s5 + $0x18] sm:$0xf] %vm196_vm8, %v191_v21 }

// kernel: _lambda_.9
= control target key start
LH: loop header
LB: loop body
LE: loop exit
PB: predicated region body
PF: predicated region fallthrough
CT: control target
= control target key end

     0   :  { %vm161_vm0 = vcmask 1042432   ;;  %v491_v46 = vmov 0   ;;  %vm157_vm1 = vcmask 179200   ;;  %vm371_vm7 = vcmask 588800   ;;  %s668_s2 = inlined_call_operand.vmem [shape: bf16[150,200], index: 2, kind: input, shape index: {}]   ;;  %s669_s1 = inlined_call_operand.vmem [shape: bf16[16,150], index: 1, kind: input, shape index: {}]   ;;  %s670_s3 = inlined_call_operand.vmem [shape: f32[16,1], index: 3, kind: input, shape index: {}]   ;;  %s671_s0 = inlined_call_operand.<no memory space> [shape: s32[1], index: 0, kind: input, shape index: {}]   ;;  %s672_s4 = inlined_call_operand.vmem [shape: f32[16,200], index: 4, kind: output, shape index: {}]  }
   0x1   :  { %v445_v0 = vld [vmem:[%s668_s2 + $0x70] sm:$0xf]  ;;  %v486_v1 = vld [vmem:[%s668_s2 + $0x74] sm:$0xf0]  ;;  %v485_v2 = vld [vmem:[%s668_s2 + $0x74] sm:$0xf]  ;;  %490 = vset.pattern.permute.xlu0 %v491_v46 }
   0x2   :  { %v446_v3 = vor.u32 %v486_v1, %v445_v0  ;;  %v447_v4 = vld [vmem:[%s668_s2 + $0x78] sm:$0xf0]  ;;  %v437_v5 = vld [vmem:[%s668_s2 + $0x60] sm:$0xf]  ;;  %v484_v6 = vld [vmem:[%s668_s2 + $0x64] sm:$0xf0] }
   0x3   :  { %v450_v7 = vor.u32 %v485_v2, %v447_v4  ;;  %v483_v8 = vld [vmem:[%s668_s2 + $0x64] sm:$0xf]  ;;  %v439_v9 = vld [vmem:[%s668_s2 + $0x68] sm:$0xf0]  ;;  %v438_v10 = vor.u32 %v484_v6, %v437_v5  ;;  %v429_v12 = vld [vmem:[%s668_s2 + $0x50] sm:$0xf]  ;;  %v228_v6 = vlaneseq }
   0x4   :  { %168 = vmatpush.bf16.msra.mxu0 %v446_v3  ;;  %v442_v11 = vor.u32 %v483_v8, %v439_v9  ;;  %v482_v13 = vld [vmem:[%s668_s2 + $0x54] sm:$0xf0]  ;;  %v481_v14 = vld [vmem:[%s668_s2 + $0x54] sm:$0xf]  ;;  %v431_v15 = vld [vmem:[%s668_s2 + $0x58] sm:$0xf0] }
   0x5   :  { %196 = vmatpush.bf16.msra.mxu2 %v450_v7  ;;  %v40_v16 = vld [vmem:[%s668_s2 + $0x90] sm:$0x77]  ;;  %v430_v17 = vor.u32 %v482_v13, %v429_v12  ;;  %v434_v20 = vor.u32 %v481_v14, %v431_v15  ;;  %v421_v21 = vld [vmem:[%s668_s2 + $0x40] sm:$0xf]  ;;  %v480_v22 = vld [vmem:[%s668_s2 + $0x44] sm:$0xf0] }
   0x6   :  { %v118_v18 = vunpack.c.h.b16 %v40_v16  ;;  %v117_v19 = vunpack.c.l.b16 %v40_v16  ;;  %v479_v23 = vld [vmem:[%s668_s2 + $0x44] sm:$0xf]  ;;  %v423_v24 = vld [vmem:[%s668_s2 + $0x48] sm:$0xf0]  ;;  %v413_v29 = vld [vmem:[%s668_s2 + $0x30] sm:$0xf]  ;;  %v422_v30 = vor.u32 %v480_v22, %v421_v21 }
   0x7   :  { %v487_v26 = vld [vmem:[%s668_s2 + $0x84] sm:$0xf]  ;;  %v455_v27 = vld [vmem:[%s668_s2 + $0x88] sm:$0xf0]  ;;  %v478_v31 = vld [vmem:[%s668_s2 + $0x34] sm:$0xf0]  ;;  %v426_v35 = vor.u32 %v479_v23, %v423_v24 }
   0x8   :  { %169 = vmatpush.bf16.msra.mxu0 %v438_v10  ;;  %v138_v25 = vpack.c.b16 %v118_v18, %v118_v18  ;;  %v137_v28 = vpack.c.b16 %v117_v19, %v117_v19  ;;  %v469_v34 = vld [vmem:[%s669_s1 + $0x4] sm:$0xf]  ;;  %v458_v36 = vor.u32 %v487_v26, %v455_v27  ;;  %v383_v37 = vld [vmem:[%s669_s1 + $0x8] sm:$0xf0]  ;;  %v453_v38 = vld [vmem:[%s668_s2 + $0x80] sm:$0xf]  ;;  %v414_v44 = vor.u32 %v478_v31, %v413_v29 }
   0x9   :  { %197 = vmatpush.bf16.msra.mxu2 %v442_v11  ;;  %v488_v39 = vld [vmem:[%s668_s2 + $0x84] sm:$0xf0]  ;;  %v477_v40 = vld [vmem:[%s668_s2 + $0x34] sm:$0xf]  ;;  %v415_v41 = vld [vmem:[%s668_s2 + $0x38] sm:$0xf0]  ;;  %v386_v45 = vor.u32 %v469_v34, %v383_v37 }
   0xa   :  { %v166_v32 = vsel %vm161_vm0, %v138_v25, 0  ;;  %v163_v33 = vsel %vm161_vm0, %v137_v28, 0  ;;  %v454_v42 = vor.u32 %v488_v39, %v453_v38  ;;  %v41_v43 = vld [vmem:[%s670_s3] sm:$0xff]  ;;  %v418_v47 = vor.u32 %v477_v40, %v415_v41  ;;  %v476_v49 = vld [vmem:[%s668_s2 + $0x24] sm:$0xf0]  ;;  %s240_s23 = sadd.s32 5, %s671_s0 }
   0xb   :  { %216 = vmatpush.bf16.msra.mxu3 %v166_v32  ;;  %188 = vmatpush.bf16.msra.mxu1 %v163_v33  ;;  %v405_v48 = vld [vmem:[%s668_s2 + $0x20] sm:$0xf]  ;;  %v475_v50 = vld [vmem:[%s668_s2 + $0x24] sm:$0xf]  ;;  %v407_v51 = vld [vmem:[%s668_s2 + $0x28] sm:$0xf0] }
   0xc   :  { %170 = vmatpush.bf16.msra.mxu0 %v430_v17  ;;  %45 = vperm.xlu0 %490, %v41_v43   ;;  %v406_v52 = vor.u32 %v476_v49, %v405_v48  ;;  %v410_v53 = vor.u32 %v475_v50, %v407_v51  ;;  %v397_v54 = vld [vmem:[%s668_s2 + $0x10] sm:$0xf]  ;;  %v474_v55 = vld [vmem:[%s668_s2 + $0x14] sm:$0xf0]  ;;  %v473_v56 = vld [vmem:[%s668_s2 + $0x14] sm:$0xf] }
   0xd   :  { %198 = vmatpush.bf16.msra.mxu2 %v434_v20  ;;  %v399_v57 = vld [vmem:[%s668_s2 + $0x18] sm:$0xf0]  ;;  %v42_v58 = vld [vmem:[%s670_s3 + $0x8] sm:$0xff]  ;;  %v398_v59 = vor.u32 %v474_v55, %v397_v54  ;;  %v389_v61 = vld [vmem:[%s668_s2] sm:$0xf]  ;;  %v229_v7 = vshrl.u32 %v228_v6, 7 }
   0xe   :  { %v402_v60 = vor.u32 %v473_v56, %v399_v57  ;;  %v472_v62 = vld [vmem:[%s668_s2 + $0x4] sm:$0xf0]  ;;  %v471_v63 = vld [vmem:[%s668_s2 + $0x4] sm:$0xf]  ;;  %v391_v0 = vld [vmem:[%s668_s2 + $0x8] sm:$0xf0] }
   0xf   :  { %217 = vmatpush.bf16.msra.mxu3 %v458_v36  ;;  %189 = vmatpush.bf16.msra.mxu1 %v454_v42  ;;  %v390_v1 = vor.u32 %v472_v62, %v389_v61  ;;  %v381_v2 = vld [vmem:[%s669_s1] sm:$0xf]  ;;  %v470_v3 = vld [vmem:[%s669_s1 + $0x4] sm:$0xf0]  ;;  %v394_v4 = vor.u32 %v471_v63, %v391_v0  ;;  %v232_v8 = vand.u32 127, %v228_v6  ;;  %v234_v9 = vmul.u32 200, %v229_v7 }
  0x10   :  { %171 = vmatpush.bf16.msra.mxu0 %v422_v30  ;;  %v382_v5 = vor.u32 %v470_v3, %v381_v2  ;;  %v230_v10 = vadd.s32 8, %v229_v7  ;;  %s241_s24 = smul.u32 2654435761, %s240_s23  ;;  %s307_s1 = sadd.s32 6, %s671_s0 }
  0x11   :  { %199 = vmatpush.bf16.msra.mxu2 %v426_v35  ;;  %v233_v11 = vadd.s32 128, %v232_v8  ;;  %v236_v12 = vadd.s32 %v234_v9, %v232_v8  ;;  %s308_s27 = smul.u32 2654435761, %s307_s1 }
  0x12   :  { %460 = vmatmul.msk.bf16.vlgmr.msra.gmra.mxu3 %vm157_vm1, %v386_v45  ;;  %459 = vmatmul.msk.bf16.vlgmr.msra.gmra.mxu1 %vm157_vm1, %v386_v45  ;;  %v235_v13 = vmul.u32 200, %v230_v10  ;;  %v246_v15 = vstv %s241_s24 }
  0x13   :  { %v242_v14 = vmul.u32 2246822507, %v236_v12  ;;  %v237_v16 = vadd.s32 %v234_v9, %v233_v11  ;;  %v309_v19 = vstv %s308_s27 }
  0x14   :  { %172 = vmatpush.bf16.msra.mxu0 %v414_v44  ;;  %50 = vperm.xlu0 %490, %v42_v58   ;;  %v238_v18 = vadd.s32 %v235_v13, %v232_v8  ;;  %v239_v26 = vadd.s32 %v235_v13, %v233_v11 }
  0x15   :  { %200 = vmatpush.bf16.msra.mxu2 %v418_v47  ;;  %v247_v17 = vadd.s32 %v246_v15, %v242_v14  ;;  %v243_v20 = vmul.u32 2246822507, %v237_v16  ;;  %v310_v21 = vadd.s32 %v309_v19, %v242_v14 }
  0x16   :  { %v244_v23 = vmul.u32 2246822507, %v238_v18  ;;  %v245_v33 = vmul.u32 2246822507, %v239_v26 }
  0x17   :  { %v251_v22 = vshrl.u32 %v247_v17, 16  ;;  %v248_v24 = vadd.s32 %v246_v15, %v243_v20  ;;  %v314_v25 = vshrl.u32 %v310_v21, 16  ;;  %v311_v29 = vadd.s32 %v309_v19, %v243_v20 }
  0x18   :  { %173 = vmatpush.bf16.msra.mxu0 %v406_v52  ;;  %v249_v28 = vadd.s32 %v246_v15, %v244_v23  ;;  %v312_v31 = vadd.s32 %v309_v19, %v244_v23  ;;  %v250_v40 = vadd.s32 %v246_v15, %v245_v33  ;;  %v313_v46 = vadd.s32 %v309_v19, %v245_v33 }
  0x19   :  { %201 = vmatpush.bf16.msra.mxu2 %v410_v53  ;;  %v255_v27 = vxor.u32 %v251_v22, %v247_v17  ;;  %v252_v30 = vshrl.u32 %v248_v24, 16  ;;  %v318_v32 = vxor.u32 %v314_v25, %v310_v21  ;;  %v315_v36 = vshrl.u32 %v311_v29, 16 }
  0x1a   :  { %v253_v35 = vshrl.u32 %v249_v28, 16  ;;  %v316_v38 = vshrl.u32 %v312_v31, 16  ;;  %v254_v48 = vshrl.u32 %v250_v40, 16  ;;  %v317_v54 = vshrl.u32 %v313_v46, 16 }
  0x1b   :  { %v259_v34 = vmul.u32 2146121005, %v255_v27  ;;  %v256_v37 = vxor.u32 %v252_v30, %v248_v24  ;;  %v322_v39 = vmul.u32 2146121005, %v318_v32  ;;  %v319_v43 = vxor.u32 %v315_v36, %v311_v29 }
  0x1c   :  { %174 = vmatpush.bf16.msra.mxu0 %v398_v59  ;;  %v257_v42 = vxor.u32 %v253_v35, %v249_v28  ;;  %v320_v45 = vxor.u32 %v316_v38, %v312_v31  ;;  %v258_v56 = vxor.u32 %v254_v48, %v250_v40  ;;  %v321_v62 = vxor.u32 %v317_v54, %v313_v46 }
  0x1d   :  { %202 = vmatpush.bf16.msra.mxu2 %v402_v60  ;;  %v263_v41 = vshrl.u32 %v259_v34, 15  ;;  %v260_v44 = vmul.u32 2146121005, %v256_v37  ;;  %v326_v47 = vshrl.u32 %v322_v39, 15  ;;  %v323_v51 = vmul.u32 2146121005, %v319_v43 }
  0x1e   :  { %v261_v50 = vmul.u32 2146121005, %v257_v42  ;;  %v324_v53 = vmul.u32 2146121005, %v320_v45  ;;  %v262_v0 = vmul.u32 2146121005, %v258_v56 }
  0x1f   :  { %v267_v49 = vxor.u32 %v263_v41, %v259_v34  ;;  %v264_v52 = vshrl.u32 %v260_v44, 15  ;;  %v330_v55 = vxor.u32 %v326_v47, %v322_v39  ;;  %v327_v59 = vshrl.u32 %v323_v51, 15 }
  0x20   :  { %175 = vmatpush.bf16.msra.mxu0 %v390_v1  ;;  %v265_v58 = vshrl.u32 %v261_v50, 15  ;;  %v328_v61 = vshrl.u32 %v324_v53, 15  ;;  %v325_v6 = vmul.u32 2146121005, %v321_v62  ;;  %v266_v8 = vshrl.u32 %v262_v0, 15 }
  0x21   :  { %203 = vmatpush.bf16.msra.mxu2 %v394_v4  ;;  %v271_v57 = vmul.u32 2221713035, %v267_v49  ;;  %v268_v60 = vxor.u32 %v264_v52, %v260_v44  ;;  %v334_v63 = vmul.u32 2221713035, %v330_v55  ;;  %v331_v3 = vxor.u32 %v327_v59, %v323_v51 }
  0x22   :  { %v269_v2 = vxor.u32 %v265_v58, %v261_v50  ;;  %v329_v14 = vshrl.u32 %v325_v6, 15  ;;  %v270_v16 = vxor.u32 %v266_v8, %v262_v0 }
  0x23   :  { %176 = vmatmul.bf16.vlgmr.msra.gmra.mxu0 %v382_v5  ;;  %v275_v1 = vshrl.u32 %v271_v57, 16  ;;  %v272_v4 = vmul.u32 2221713035, %v268_v60  ;;  %v338_v7 = vshrl.u32 %v334_v63, 16  ;;  %v335_v11 = vmul.u32 2221713035, %v331_v3 }
  0x24   :  { %204 = vmatmul.bf16.vlgmr.msra.gmra.mxu2 %v382_v5  ;;  %v332_v5 = vxor.u32 %v328_v61, %v324_v53  ;;  %v273_v10 = vmul.u32 2221713035, %v269_v2  ;;  %v333_v25 = vxor.u32 %v329_v14, %v325_v6  ;;  %v274_v28 = vmul.u32 2221713035, %v270_v16 }
  0x25   :  { %v279_v9 = vxor.u32 %v275_v1, %v271_v57  ;;  %v276_v12 = vshrl.u32 %v272_v4, 16  ;;  %v342_v15 = vxor.u32 %v338_v7, %v334_v63  ;;  %v339_v20 = vshrl.u32 %v335_v11, 16 }
  0x26   :  { %v336_v13 = vmul.u32 2221713035, %v332_v5  ;;  %v277_v19 = vshrl.u32 %v273_v10, 16  ;;  %v337_v35 = vmul.u32 2221713035, %v333_v25  ;;  %v278_v38 = vshrl.u32 %v274_v28, 16 }
  0x27   :  { %v283_v18 = vand.u32 16777215, %v279_v9  ;;  %v280_v23 = vxor.u32 %v276_v12, %v272_v4  ;;  %v346_v27 = vand.u32 16777215, %v342_v15  ;;  %v343_v32 = vxor.u32 %v339_v20, %v335_v11 }
  0x28   :  { %v340_v24 = vshrl.u32 %v336_v13, 16  ;;  %v281_v30 = vxor.u32 %v277_v19, %v273_v10  ;;  %v341_v49 = vshrl.u32 %v337_v35, 16  ;;  %v282_v52 = vxor.u32 %v278_v38, %v274_v28 }
  0x29   :  { %v461_v29 = vxor.u32 2147483648, %v283_v18  ;;  %v284_v33 = vand.u32 16777215, %v280_v23  ;;  %v465_v37 = vxor.u32 2147483648, %v346_v27  ;;  %v347_v43 = vand.u32 16777215, %v343_v32 }
  0x2a   :  { %v344_v34 = vxor.u32 %v340_v24, %v336_v13  ;;  %v285_v39 = vand.u32 16777215, %v281_v30  ;;  %v345_v61 = vxor.u32 %v341_v49, %v337_v35  ;;  %v286_v0 = vand.u32 16777215, %v282_v52 }
  0x2b   :  { %vm289_vm2 = vcmp.ge.s32.totalorder %v461_v29, 2151677952  ;;  %v462_v46 = vxor.u32 2147483648, %v284_v33  ;;  %vm352_vm3 = vcmp.ge.s32.totalorder %v465_v37, 2150839091  ;;  %v466_v57 = vxor.u32 2147483648, %v347_v43 }
  0x2c   :  { %v348_v48 = vand.u32 16777215, %v344_v34  ;;  %v463_v56 = vxor.u32 2147483648, %v285_v39  ;;  %v349_v6 = vand.u32 16777215, %v345_v61  ;;  %v464_v10 = vxor.u32 2147483648, %v286_v0 }
  0x2d   :  { %vm292_vm4 = vcmp.ge.s32.totalorder %v462_v46, 2151677952  ;;  %vm355_vm6 = vcmp.ge.s32.totalorder %v466_v57, 2150839091 }
  0x2e   :  { %v467_v63 = vxor.u32 2147483648, %v348_v48  ;;  %vm295_vm5 = vcmp.ge.s32.totalorder %v463_v56, 2151677952  ;;  %v468_v16 = vxor.u32 2147483648, %v349_v6  ;;  %vm298_vm9 = vcmp.ge.s32.totalorder %v464_v10, 2151677952 }
  0x30   :  { %vm358_vm8 = vcmp.ge.s32.totalorder %v467_v63, 2150839091  ;;  %vm361_vm10 = vcmp.ge.s32.totalorder %v468_v16, 2150839091 }
  0x7e   :  { %v46_v17 = vpop.permute.xlu0 %45 }
  0x86   :  { %v51_v44 = vpop.permute.xlu0 %50 }
  0x8f   :  { %v191_v22 = vpop.f32.mrf.mxu1 }
  0x95   :  { %v219_v41 = vpop.f32.mrf.mxu3 }
  0x97   :  { %v193_v55 = vpop.f32.mrf.mxu1 }
  0x9d   :  { %v221_v9 = vpop.f32.mrf.mxu3 }
  0xa0   :  { %v177_v21 = vpop.f32.mrf.mxu0 }
  0xa1   :  { %v178_v26 = vadd.f32 %v177_v21, %v46_v17 }
  0xa3   :  { %v192_v31 = vadd.f32 %v191_v22, %v178_v26 }
  0xa5   :  { %v224_v36 = vmax.f32 %v192_v31, 0.0 }
  0xa7   :  { %v299_v40 = vmul.f32 1.3333334, %v224_v36  ;;  %v205_v42 = vpop.f32.mrf.mxu2 }
  0xa8   :  { %v206_v45 = vadd.f32 %v205_v42, %v46_v17  ;;  %v179_v47 = vpop.f32.mrf.mxu0 }
  0xa9   :  { %v303_v50 = vsel %vm289_vm2, %v299_v40, 0.0  ;;  %v180_v51 = vadd.f32 %v179_v47, %v51_v44 }
  0xaa   :  { %v362_v53 = vmul.f32 1.25, %v303_v50  ;;  %v220_v54 = vadd.f32 %v219_v41, %v206_v45 }
  0xab   :  { %v194_v58 = vadd.f32 %v193_v55, %v180_v51 }
  0xac   :  { %v366_v59 = vsel %vm352_vm3, %v362_v53, 0.0  ;;  %v225_v60 = vmax.f32 %v220_v54, 0.0 }
  0xad   :  { %370 = vst [vmem:[%s672_s4] sm:$0xff] %v366_v59  ;;  %v226_v62 = vmax.f32 %v194_v58, 0.0 }
  0xae   :  { %v300_v1 = vmul.f32 1.3333334, %v225_v60 }
  0xaf   :  { %v301_v2 = vmul.f32 1.3333334, %v226_v62  ;;  %v207_v3 = vpop.f32.mrf.mxu2 }
  0xb0   :  { %v304_v4 = vsel %vm292_vm4, %v300_v1, 0.0  ;;  %v208_v5 = vadd.f32 %v207_v3, %v51_v44 }
  0xb1   :  { %v363_v7 = vmul.f32 1.25, %v304_v4  ;;  %v305_v8 = vsel %vm295_vm5, %v301_v2, 0.0 }
  0xb2   :  { %v364_v11 = vmul.f32 1.25, %v305_v8  ;;  %v222_v12 = vadd.f32 %v221_v9, %v208_v5 }
  0xb3   :  { %v367_v13 = vsel %vm355_vm6, %v363_v7, 0.0 }
  0xb4   :  { %372 = vst.msk [vmem:[%s672_s4 + $0x8] sm:$0xff] %vm371_vm7, %v367_v13  ;;  %v368_v14 = vsel %vm358_vm8, %v364_v11, 0.0  ;;  %v227_v15 = vmax.f32 %v222_v12, 0.0 }
  0xb5   :  { %373 = vst [vmem:[%s672_s4 + $0x10] sm:$0xff] %v368_v14 }
  0xb6   :  { %v302_v17 = vmul.f32 1.3333334, %v227_v15 }
  0xb8   :  { %v306_v18 = vsel %vm298_vm9, %v302_v17, 0.0 }
  0xb9   :  { %v365_v19 = vmul.f32 1.25, %v306_v18 }
  0xbb   :  { %v369_v20 = vsel %vm361_vm10, %v365_v19, 0.0 }
  0xbc   :  { %374 = vst.msk [vmem:[%s672_s4 + $0x18] sm:$0xff] %vm371_vm7, %v369_v20 }

// kernel: _lambda_.10
= control target key start
LH: loop header
LB: loop body
LE: loop exit
PB: predicated region body
PF: predicated region fallthrough
CT: control target
= control target key end

     0   :  { %v29_v0 = vlaneseq  ;;  %vm185_vm0 = vcmask 1041408   ;;  %vm192_vm5 = vcmask 1043458   ;;  %vm187_vm6 = vcmask 1045508   ;;  %s265_s0 = inlined_call_operand.<no memory space> [shape: s32[1], index: 0, kind: input, shape index: {}]   ;;  %s266_s1 = inlined_call_operand.vmem [shape: f32[2,400], index: 1, kind: input, shape index: {}]   ;;  %s267_s2 = inlined_call_operand.vmem [shape: f32[2,400], index: 2, kind: input, shape index: {}]   ;;  %s268_s3 = inlined_call_operand.vmem [shape: f32[2,400], index: 3, kind: input, shape index: {}]   ;;  %s269_s4 = inlined_call_operand.vmem [shape: f32[2,400], index: 4, kind: input, shape index: {}]   ;;  %s270_s5 = inlined_call_operand.vmem [shape: f32[2,400], index: 5, kind: output, shape index: {}]  }
   0x1   :  { %v22_v1 = vld [vmem:[%s266_s1] sm:$0xff]  ;;  %s41_s26 = sadd.s32 7, %s265_s0  ;;  %s115_s29 = sadd.s32 8, %s265_s0  ;;  %vm193_vm7 = vmor %vm192_vm5, %vm185_vm0  ;;  %vm195_vm13 = vcmask 130054   ;;  %vm189_vm14 = vcmask 1043456  }
   0x2   :  { %v23_v2 = vld [vmem:[%s267_s2] sm:$0xff]  ;;  %v30_v6 = vshrl.u32 %v29_v0, 7  ;;  %v32_v7 = vand.u32 127, %v29_v0  ;;  %s42_s1 = smul.u32 2654435761, %s41_s26  ;;  %vm194_vm12 = vmor %vm187_vm6, %vm193_vm7 }
   0x3   :  { %v25_v3 = vld [vmem:[%s268_s3] sm:$0xff]  ;;  %v24_v4 = vmax.f32 %v22_v1, %v23_v2  ;;  %s116_s2 = smul.u32 2654435761, %s115_s29  ;;  %vm196_vm15 = vmor %vm195_vm13, %vm194_vm12 }
   0x4   :  { %v26_v5 = vld [vmem:[%s269_s4] sm:$0xff]  ;;  %v33_v9 = vadd.s32 128, %v32_v7  ;;  %v34_v10 = vadd.s32 256, %v32_v7  ;;  %v35_v11 = vadd.s32 384, %v32_v7  ;;  %v36_v12 = vmul.u32 400, %v30_v6 }
   0x5   :  { %v27_v8 = vmax.f32 %v25_v3, %v26_v5  ;;  %v47_v18 = vstv %s42_s1  ;;  %v117_v20 = vstv %s116_s2 }
   0x6   :  { %v37_v14 = vadd.s32 %v36_v12, %v32_v7  ;;  %v38_v15 = vadd.s32 %v36_v12, %v33_v9  ;;  %v39_v16 = vadd.s32 %v36_v12, %v34_v10  ;;  %v40_v17 = vadd.s32 %v36_v12, %v35_v11 }
   0x7   :  { %v28_v13 = vmax.f32 %v24_v4, %v27_v8 }
   0x8   :  { %v43_v21 = vmul.u32 2246822507, %v37_v14  ;;  %v44_v22 = vmul.u32 2246822507, %v38_v15  ;;  %v45_v23 = vmul.u32 2246822507, %v39_v16 }
   0x9   :  { %v100_v19 = vmul.f32 1.3333334, %v28_v13  ;;  %v46_v24 = vmul.u32 2246822507, %v40_v17 }
   0xa   :  { %v48_v25 = vadd.s32 %v47_v18, %v43_v21  ;;  %v49_v26 = vadd.s32 %v47_v18, %v44_v22  ;;  %v50_v27 = vadd.s32 %v47_v18, %v45_v23  ;;  %v118_v28 = vadd.s32 %v117_v20, %v43_v21 }
   0xb   :  { %102 = vst [vmem:[#allocation1] ss:$4 sm:$0xff] %v100_v19  ;;  %v51_v29 = vadd.s32 %v47_v18, %v46_v24  ;;  %v119_v30 = vadd.s32 %v117_v20, %v44_v22  ;;  %v120_v31 = vadd.s32 %v117_v20, %v45_v23  ;;  %v121_v32 = vadd.s32 %v117_v20, %v46_v24 }
   0xc   :  { %v52_v33 = vshrl.u32 %v48_v25, 16  ;;  %v53_v34 = vshrl.u32 %v49_v26, 16  ;;  %v54_v35 = vshrl.u32 %v50_v27, 16  ;;  %v122_v36 = vshrl.u32 %v118_v28, 16 }
   0xd   :  { %v55_v37 = vshrl.u32 %v51_v29, 16  ;;  %v123_v38 = vshrl.u32 %v119_v30, 16  ;;  %v124_v39 = vshrl.u32 %v120_v31, 16  ;;  %v125_v40 = vshrl.u32 %v121_v32, 16 }
   0xe   :  { %v56_v41 = vxor.u32 %v52_v33, %v48_v25  ;;  %v57_v42 = vxor.u32 %v53_v34, %v49_v26  ;;  %v58_v43 = vxor.u32 %v54_v35, %v50_v27  ;;  %v126_v45 = vxor.u32 %v122_v36, %v118_v28 }
   0xf   :  { %v59_v44 = vxor.u32 %v55_v37, %v51_v29  ;;  %v127_v49 = vxor.u32 %v123_v38, %v119_v30  ;;  %v128_v51 = vxor.u32 %v124_v39, %v120_v31  ;;  %v129_v52 = vxor.u32 %v125_v40, %v121_v32 }
  0x10   :  { %v60_v46 = vmul.u32 2146121005, %v56_v41  ;;  %v61_v47 = vmul.u32 2146121005, %v57_v42  ;;  %v62_v48 = vmul.u32 2146121005, %v58_v43 }
  0x11   :  { %v63_v50 = vmul.u32 2146121005, %v59_v44  ;;  %v130_v57 = vmul.u32 2146121005, %v126_v45  ;;  %v131_v61 = vmul.u32 2146121005, %v127_v49 }
  0x12   :  { %v64_v53 = vshrl.u32 %v60_v46, 15  ;;  %v65_v54 = vshrl.u32 %v61_v47, 15  ;;  %v66_v55 = vshrl.u32 %v62_v48, 15  ;;  %v132_v63 = vmul.u32 2146121005, %v128_v51 }
  0x13   :  { %v67_v56 = vshrl.u32 %v63_v50, 15  ;;  %v133_v0 = vmul.u32 2146121005, %v129_v52  ;;  %v134_v1 = vshrl.u32 %v130_v57, 15  ;;  %v135_v6 = vshrl.u32 %v131_v61, 15 }
  0x14   :  { %v68_v58 = vxor.u32 %v64_v53, %v60_v46  ;;  %v69_v59 = vxor.u32 %v65_v54, %v61_v47  ;;  %v70_v60 = vxor.u32 %v66_v55, %v62_v48  ;;  %v136_v7 = vshrl.u32 %v132_v63, 15  ;;  %v104_v28 = vld.sshfl [vmem:[#allocation1 + $0x8] sm:$0xff pattern:$0x73625140] }
  0x15   :  { %v71_v62 = vxor.u32 %v67_v56, %v63_v50  ;;  %v137_v8 = vshrl.u32 %v133_v0, 15  ;;  %v138_v12 = vxor.u32 %v134_v1, %v130_v57  ;;  %v139_v14 = vxor.u32 %v135_v6, %v131_v61  ;;  %v105_v29 = vld.sshfl [vmem:[#allocation1 + $0x10] sm:$0xff pattern:$0x73625140] }
  0x16   :  { %v72_v2 = vmul.u32 2221713035, %v68_v58  ;;  %v73_v3 = vmul.u32 2221713035, %v69_v59  ;;  %v74_v4 = vmul.u32 2221713035, %v70_v60  ;;  %v140_v15 = vxor.u32 %v136_v7, %v132_v63 }
  0x17   :  { %v75_v5 = vmul.u32 2221713035, %v71_v62  ;;  %v141_v16 = vxor.u32 %v137_v8, %v133_v0  ;;  %v142_v20 = vmul.u32 2221713035, %v138_v12  ;;  %v143_v22 = vmul.u32 2221713035, %v139_v14 }
  0x18   :  { %v76_v9 = vshrl.u32 %v72_v2, 16  ;;  %v77_v10 = vshrl.u32 %v73_v3, 16  ;;  %v78_v11 = vshrl.u32 %v74_v4, 16  ;;  %v144_v23 = vmul.u32 2221713035, %v140_v15 }
  0x19   :  { %v79_v13 = vshrl.u32 %v75_v5, 16  ;;  %v145_v24 = vmul.u32 2221713035, %v141_v16  ;;  %v103_v31 = vld.sshfl [vmem:[#allocation1] sm:$0xff pattern:$0x73625140] }
  0x1a   :  { %v80_v17 = vxor.u32 %v76_v9, %v72_v2  ;;  %v81_v18 = vxor.u32 %v77_v10, %v73_v3  ;;  %v82_v19 = vxor.u32 %v78_v11, %v74_v4  ;;  %v146_v32 = vshrl.u32 %v142_v20, 16  ;;  %v106_v40 = vld.sshfl [vmem:[#allocation1 + $0x18] sm:$0xff pattern:$0x73625140] }
  0x1b   :  { %v83_v21 = vxor.u32 %v79_v13, %v75_v5  ;;  %v147_v33 = vshrl.u32 %v143_v22, 16  ;;  %v148_v34 = vshrl.u32 %v144_v23, 16  ;;  %v149_v38 = vshrl.u32 %v145_v24, 16 }
  0x1c   :  { %v84_v25 = vand.u32 16777215, %v80_v17  ;;  %v85_v26 = vand.u32 16777215, %v81_v18  ;;  %v86_v27 = vand.u32 16777215, %v82_v19  ;;  %v150_v41 = vxor.u32 %v146_v32, %v142_v20 }
  0x1d   :  { %v87_v30 = vand.u32 16777215, %v83_v21  ;;  %v151_v42 = vxor.u32 %v147_v33, %v143_v22  ;;  %v152_v43 = vxor.u32 %v148_v34, %v144_v23  ;;  %v153_v44 = vxor.u32 %v149_v38, %v145_v24 }
  0x1e   :  { %v202_v35 = vxor.u32 2147483648, %v84_v25  ;;  %v203_v36 = vxor.u32 2147483648, %v85_v26  ;;  %v204_v37 = vxor.u32 2147483648, %v86_v27  ;;  %v154_v49 = vand.u32 16777215, %v150_v41 }
  0x1f   :  { %v205_v39 = vxor.u32 2147483648, %v87_v30  ;;  %v155_v50 = vand.u32 16777215, %v151_v42  ;;  %v156_v51 = vand.u32 16777215, %v152_v43 }
  0x20   :  { %vm90_vm1 = vcmp.ge.s32.totalorder %v202_v35, 2151677952  ;;  %vm93_vm2 = vcmp.ge.s32.totalorder %v203_v36, 2151677952  ;;  %vm96_vm3 = vcmp.ge.s32.totalorder %v204_v37, 2151677952  ;;  %v157_v52 = vand.u32 16777215, %v153_v44 }
  0x21   :  { %vm99_vm4 = vcmp.ge.s32.totalorder %v205_v39, 2151677952  ;;  %v112_v45 = vsel %vm93_vm2, %v104_v28, 0.0  ;;  %v113_v46 = vsel %vm96_vm3, %v105_v29, 0.0  ;;  %v111_v47 = vsel %vm90_vm1, %v103_v31, 0.0 }
  0x22   :  { %v114_v48 = vsel %vm99_vm4, %v106_v40, 0.0  ;;  %v171_v53 = vmul.f32 1.25, %v112_v45  ;;  %v206_v54 = vxor.u32 2147483648, %v154_v49  ;;  %v207_v55 = vxor.u32 2147483648, %v155_v50 }
  0x23   :  { %v172_v56 = vmul.f32 1.25, %v113_v46  ;;  %v173_v57 = vmul.f32 1.25, %v114_v48  ;;  %v208_v58 = vxor.u32 2147483648, %v156_v51  ;;  %v209_v59 = vxor.u32 2147483648, %v157_v52 }
  0x24   :  { %v170_v60 = vmul.f32 1.25, %v111_v47  ;;  %vm160_vm8 = vcmp.ge.s32.totalorder %v206_v54, 2150839091  ;;  %vm163_vm9 = vcmp.ge.s32.totalorder %v207_v55, 2150839091 }
  0x25   :  { %vm166_vm10 = vcmp.ge.s32.totalorder %v208_v58, 2150839091  ;;  %vm169_vm11 = vcmp.ge.s32.totalorder %v209_v59, 2150839091  ;;  %v175_v61 = vsel %vm163_vm9, %v171_v53, 0.0 }
  0x26   :  { %v176_v62 = vsel %vm166_vm10, %v172_v56, 0.0  ;;  %v177_v63 = vsel %vm169_vm11, %v173_v57, 0.0  ;;  %v182_v0 = vrot.slane %v175_v61, 6  ;;  %v174_v1 = vsel %vm160_vm8, %v170_v60, 0.0 }
  0x27   :  { %v183_v2 = vrot.slane %v176_v62, 4  ;;  %v184_v3 = vrot.slane %v177_v63, 2 }
  0x28   :  { %v186_v4 = vsel %vm185_vm0, %v174_v1, %v182_v0 }
  0x29   :  { %v188_v5 = vsel %vm187_vm6, %v183_v2, %v184_v3 }
  0x2a   :  { %v190_v6 = vsel %vm189_vm14, %v186_v4, %v188_v5 }
  0x2b   :  { %197 = vst.msk [vmem:[%s270_s5] sm:$0xff] %vm196_vm15, %v190_v6 }

// kernel: _lambda_.11
= control target key start
LH: loop header
LB: loop body
LE: loop exit
PB: predicated region body
PF: predicated region fallthrough
CT: control target
= control target key end

     0   :  { %vm421_vm0 = vcmask 1043456   ;;  %s964_s0 = inlined_call_operand.<no memory space> [shape: s32[1], index: 0, kind: input, shape index: {}]   ;;  %s965_s1 = inlined_call_operand.vmem [shape: f32[2,400], index: 1, kind: input, shape index: {}]   ;;  %s966_s2 = inlined_call_operand.vmem [shape: bf16[400,120], index: 2, kind: input, shape index: {}]   ;;  %s967_s3 = inlined_call_operand.vmem [shape: f32[1,120], index: 3, kind: input, shape index: {}]   ;;  %s968_s4 = inlined_call_operand.vmem [shape: bf16[120,84], index: 4, kind: input, shape index: {}]   ;;  %s969_s5 = inlined_call_operand.vmem [shape: f32[1,84], index: 5, kind: input, shape index: {}]   ;;  %s970_s6 = inlined_call_operand.vmem [shape: bf16[84,10], index: 6, kind: input, shape index: {}]   ;;  %s971_s7 = inlined_call_operand.vmem [shape: f32[1,10], index: 7, kind: input, shape index: {}]   ;;  %s972_s8 = inlined_call_operand.hbm [shape: f32[2,10], index: 8, kind: output, shape index: {}]  }
   0x1   :  { %v709_v0 = vld [vmem:[%s966_s2 + $0x38] sm:$0xff]  ;;  %v708_v3 = vld [vmem:[%s966_s2 + $0x30] sm:$0xff]  ;;  %v707_v6 = vld [vmem:[%s966_s2 + $0x28] sm:$0xff] }
   0x2   :  { %v717_v1 = vld [vmem:[%s966_s2 + $0x78] sm:$0xff]  ;;  %256 = vmatpush.bf16.msra.mxu0 %v709_v0  ;;  %v716_v4 = vld [vmem:[%s966_s2 + $0x70] sm:$0xff]  ;;  %v715_v7 = vld [vmem:[%s966_s2 + $0x68] sm:$0xff] }
   0x3   :  { %v725_v2 = vld [vmem:[%s966_s2 + $0xb8] sm:$0xff]  ;;  %269 = vmatpush.bf16.msra.mxu1 %v717_v1  ;;  %v724_v5 = vld [vmem:[%s966_s2 + $0xb0] sm:$0xff]  ;;  %v726_v8 = vld [vmem:[%s966_s2 + $0xc0] sm:$0xff] }
   0x4   :  { %282 = vmatpush.bf16.msra.mxu2 %v725_v2  ;;  %v723_v9 = vld [vmem:[%s966_s2 + $0xa8] sm:$0xff]  ;;  %v33_v10 = vld [vmem:[%s965_s1] sm:$0xff]  ;;  %302 = vmatpush.bf16.msra.mxu3 %v726_v8  ;;  %v367_v11 = vld [vmem:[%s968_s4 + $0x38] sm:$0xf] }
   0x5   :  { %35 = vst [vmem:[#allocation1] ss:$4 sm:$0xff] %v33_v10  ;;  %v706_v12 = vld [vmem:[%s966_s2 + $0x20] sm:$0xff]  ;;  %v401_v13 = vunpack.c.l.b16 %v367_v11 }
   0x6   :  { %257 = vmatpush.bf16.msra.mxu0 %v708_v3  ;;  %v714_v14 = vld [vmem:[%s966_s2 + $0x60] sm:$0xff] }
   0x7   :  { %270 = vmatpush.bf16.msra.mxu1 %v716_v4  ;;  %v722_v15 = vld [vmem:[%s966_s2 + $0xa0] sm:$0xff]  ;;  %v409_v16 = vpack.c.b16 %v401_v13, %v401_v13 }
   0x8   :  { %283 = vmatpush.bf16.msra.mxu2 %v724_v5 }
   0xa   :  { %258 = vmatpush.bf16.msra.mxu0 %v707_v6 }
   0xb   :  { %271 = vmatpush.bf16.msra.mxu1 %v715_v7 }
   0xc   :  { %284 = vmatpush.bf16.msra.mxu2 %v723_v9 }
   0xd   :  { %14 = vsyncpa [#allocation4], 0  ;;  %v423_v17 = vsel %vm421_vm0, %v409_v16, 0  ;;  %v705_v18 = vld [vmem:[%s966_s2 + $0x18] sm:$0xff]  ;;  %vm252_vm1 = vcmask 130048   ;;  %v733_v23 = vld [vmem:[%s968_s4 + $0x30] sm:$0xff]  ;;  %v309_v40 = vlaneseq }
   0xe   :  { %259 = vmatpush.bf16.msra.mxu0 %v706_v12  ;;  %v713_v19 = vld [vmem:[%s966_s2 + $0x58] sm:$0xff]  ;;  %425 = vmatpush.bf16.msrb.mxu3 %v423_v17  ;;  %v704_v24 = vld [vmem:[%s966_s2 + $0x10] sm:$0xff]  ;;  %v732_v27 = vld [vmem:[%s968_s4 + $0x28] sm:$0xff]  ;;  %s334_s22 = sadd.s32 10, %s964_s0  ;;  %vm513_vm2 = vcmask 1041408   ;;  %vm417_vm5 = vcmask 982016  }
   0xf   :  { %272 = vmatpush.bf16.msra.mxu1 %v714_v14  ;;  %v721_v20 = vld [vmem:[%s966_s2 + $0x98] sm:$0xff]  ;;  %v712_v25 = vld [vmem:[%s966_s2 + $0x50] sm:$0xff]  ;;  %v703_v28 = vld [vmem:[%s966_s2 + $0x8] sm:$0xff]  ;;  %v902_v41 = vshrl.u32 %v309_v40, 7  ;;  %v904_v42 = vand.u32 127, %v309_v40  ;;  %s441_s20 = sadd.s32 11, %s964_s0 }
  0x10   :  { %285 = vmatpush.bf16.msra.mxu2 %v722_v15  ;;  %v39_v21 = vld.sshfl [vmem:[#allocation1 + $0x18] sm:$0xff pattern:$0x73625140]  ;;  %v720_v26 = vld [vmem:[%s966_s2 + $0x90] sm:$0xff]  ;;  %v711_v29 = vld [vmem:[%s966_s2 + $0x48] sm:$0xff]  ;;  %vm509_vm7 = vcmask 687104  }
  0x11   :  { %v47_v22 = vpack.c.bf16 %v39_v21, %v39_v21  ;;  %v719_v30 = vld [vmem:[%s966_s2 + $0x88] sm:$0xff]  ;;  %v702_v31 = vld [vmem:[%s966_s2] sm:$0xff]  ;;  %v38_v36 = vld.sshfl [vmem:[#allocation1 + $0x10] sm:$0xff pattern:$0x73625140]  ;;  %v313_v43 = vmul.u32 120, %v902_v41 }
  0x12   :  { %260 = vmatpush.bf16.msra.mxu0 %v705_v18  ;;  %426 = vmatpush.bf16.msrb.mxu3 %v733_v23  ;;  %v710_v32 = vld [vmem:[%s966_s2 + $0x40] sm:$0xff]  ;;  %v37_v34 = vld.sshfl [vmem:[#allocation1 + $0x8] sm:$0xff pattern:$0x73625140]  ;;  %v46_v39 = vpack.c.bf16 %v38_v36, %v38_v36  ;;  %s335_s23 = smul.u32 2654435761, %s334_s22 }
  0x13   :  { %273 = vmatpush.bf16.msra.mxu1 %v713_v19  ;;  %648 = vmatmul.msk.bf16.vlgmr.msra.gmra.mxu3 %vm252_vm1, %v47_v22  ;;  %v36_v33 = vld.sshfl [vmem:[#allocation1] sm:$0xff pattern:$0x73625140]  ;;  %v45_v38 = vpack.c.bf16 %v37_v34, %v37_v34  ;;  %v314_v44 = vadd.s32 %v313_v43, %v904_v42  ;;  %v730_v52 = vld [vmem:[%s968_s4 + $0x18] sm:$0xff]  ;;  %v729_v55 = vld [vmem:[%s968_s4 + $0x10] sm:$0xff]  ;;  %s769_s28 = smov [#allocation3]  }
  0x14   :  { %286 = vmatpush.bf16.msra.mxu2 %v721_v20  ;;  %v718_v35 = vld [vmem:[%s966_s2 + $0x80] sm:$0xff]  ;;  %v44_v37 = vpack.c.bf16 %v36_v33, %v36_v33  ;;  %s315_s2 = sadd.s32 9, %s964_s0  ;;  %v336_v49 = vstv %s335_s23  ;;  %v728_v58 = vld [vmem:[%s968_s4 + $0x8] sm:$0xff]  ;;  %v737_v14 = vld [vmem:[%s970_s6 + $0x18] sm:$0xff]  ;;  %s442_s21 = smul.u32 2654435761, %s441_s20 }
  0x15   :  { %s316_s19 = smul.u32 2654435761, %s315_s2  ;;  %v317_v45 = vmul.u32 2246822507, %v314_v44  ;;  %v731_v47 = vld [vmem:[%s968_s4 + $0x20] sm:$0xff]  ;;  %v736_v20 = vld [vmem:[%s970_s6 + $0x10] sm:$0xff] }
  0x16   :  { %261 = vmatpush.bf16.msra.mxu0 %v704_v24  ;;  %427 = vmatpush.bf16.msrb.mxu3 %v732_v27  ;;  %v727_v61 = vld [vmem:[%s968_s4] sm:$0xff]  ;;  %v471_v0 = vld [vmem:[%s970_s6 + $0x28] sm:$0x3]  ;;  %v444_v40 = vstv %s442_s21  ;;  %s537_s29 = sshll.u32 %s769_s28, 4  ;;  %vm530_vm8 = vcmask 74752   ;;  %s538_s29 = int_to_ptr.vmem [resolvable:$true] %s537_s29 }
  0x17   :  { %274 = vmatpush.bf16.msra.mxu1 %v712_v25  ;;  %v318_v46 = vstv %s316_s19  ;;  %v337_v50 = vadd.s32 %v336_v49, %v317_v45  ;;  %v497_v1 = vunpack.c.l.b16 %v471_v0  ;;  %v738_v8 = vld [vmem:[%s970_s6 + $0x20] sm:$0xff] }
  0x18   :  { %287 = vmatpush.bf16.msra.mxu2 %v720_v26  ;;  %v319_v48 = vadd.s32 %v318_v46, %v317_v45  ;;  %v740_v9 = vld [vmem:[%s967_s3] ss:$0 sm:$0xff]  ;;  %v735_v46 = vld [vmem:[%s970_s6 + $0x8] sm:$0xff] }
  0x19   :  { %v338_v53 = vshrl.u32 %v337_v50, 16  ;;  %v503_v5 = vpack.c.b16 %v497_v1, %v497_v1 }
  0x1a   :  { %262 = vmatpush.bf16.msra.mxu0 %v703_v28  ;;  %428 = vmatpush.bf16.msrb.mxu3 %v731_v47  ;;  %v320_v51 = vshrl.u32 %v319_v48, 16 }
  0x1b   :  { %275 = vmatpush.bf16.msra.mxu1 %v711_v29  ;;  %v339_v56 = vxor.u32 %v338_v53, %v337_v50  ;;  %v515_v6 = vsel %vm513_vm2, %v503_v5, 0  ;;  %v741_v53 = vld [vmem:[%s969_s5] ss:$0 sm:$0xff]  ;;  %s539_s5 = sshll.u32 %s972_s8, 4  ;;  %s540_s5 = int_to_ptr.hbm [resolvable:$true] %s539_s5 }
  0x1c   :  { %288 = vmatpush.bf16.msra.mxu2 %v719_v30  ;;  %v321_v54 = vxor.u32 %v320_v51, %v319_v48 }
  0x1d   :  { %v340_v59 = vmul.u32 2146121005, %v339_v56 }
  0x1e   :  { %263 = vmatpush.bf16.msra.mxu0 %v702_v31  ;;  %429 = vmatpush.bf16.msrb.mxu3 %v730_v52  ;;  %v322_v57 = vmul.u32 2146121005, %v321_v54 }
  0x1f   :  { %276 = vmatpush.bf16.msra.mxu1 %v710_v32  ;;  %v341_v62 = vshrl.u32 %v340_v59, 15 }
  0x20   :  { %289 = vmatpush.bf16.msra.mxu2 %v718_v35  ;;  %v323_v60 = vshrl.u32 %v322_v57, 15 }
  0x21   :  { %264 = vmatmul.bf16.vlgmr.msra.gmra.mxu0 %v44_v37  ;;  %v342_v3 = vxor.u32 %v341_v62, %v340_v59  ;;  %v439_v37 = vmul.u32 84, %v902_v41  ;;  %v734_v41 = vld [vmem:[%s970_s6] sm:$0xff] }
  0x22   :  { %277 = vmatmul.bf16.vlgmr.msra.gmra.mxu1 %v45_v38  ;;  %430 = vmatpush.bf16.msrb.mxu3 %v729_v55  ;;  %v324_v63 = vxor.u32 %v323_v60, %v322_v57  ;;  %v742_v62 = vld [vmem:[%s971_s7] ss:$0 sm:$0xff] }
  0x23   :  { %290 = vmatmul.bf16.vlgmr.msra.gmra.mxu2 %v46_v39  ;;  %v343_v7 = vmul.u32 2221713035, %v342_v3  ;;  %519 = vmatpush.bf16.msrb.mxu0 %v515_v6  ;;  %v440_v38 = vadd.s32 %v439_v37, %v904_v42 }
  0x24   :  { %v325_v4 = vmul.u32 2221713035, %v324_v63 }
  0x25   :  { %v344_v13 = vshrl.u32 %v343_v7, 16  ;;  %v443_v39 = vmul.u32 2246822507, %v440_v38 }
  0x26   :  { %431 = vmatpush.bf16.msrb.mxu3 %v728_v58  ;;  %v326_v10 = vshrl.u32 %v325_v4, 16 }
  0x27   :  { %520 = vmatpush.bf16.msrb.mxu0 %v738_v8  ;;  %v345_v19 = vxor.u32 %v344_v13, %v343_v7  ;;  %v445_v43 = vadd.s32 %v444_v40, %v443_v39 }
  0x28   :  { %v327_v16 = vxor.u32 %v326_v10, %v325_v4 }
  0x29   :  { %v346_v26 = vand.u32 16777215, %v345_v19  ;;  %v446_v44 = vshrl.u32 %v445_v43, 16 }
  0x2a   :  { %432 = vmatpush.bf16.msrb.mxu3 %v727_v61  ;;  %v328_v21 = vand.u32 16777215, %v327_v16 }
  0x2b   :  { %521 = vmatpush.bf16.msrb.mxu0 %v737_v14  ;;  %v650_v30 = vxor.u32 2147483648, %v346_v26  ;;  %v447_v45 = vxor.u32 %v446_v44, %v445_v43 }
  0x2c   :  { %v649_v27 = vxor.u32 2147483648, %v328_v21 }
  0x2d   :  { %vm349_vm4 = vcmp.ge.s32.totalorder %v650_v30, 2150839091  ;;  %v448_v47 = vmul.u32 2146121005, %v447_v45 }
  0x2e   :  { %vm331_vm3 = vcmp.ge.s32.totalorder %v649_v27, 2151677952 }
  0x2f   :  { %522 = vmatpush.bf16.msrb.mxu0 %v736_v20  ;;  %v449_v48 = vshrl.u32 %v448_v47, 15 }
  0x31   :  { %v450_v49 = vxor.u32 %v449_v48, %v448_v47 }
  0x33   :  { %523 = vmatpush.bf16.msrb.mxu0 %v735_v46  ;;  %v451_v42 = vmul.u32 2221713035, %v450_v49 }
  0x35   :  { %v452_v50 = vshrl.u32 %v451_v42, 16 }
  0x37   :  { %524 = vmatpush.bf16.msrb.mxu0 %v734_v41  ;;  %v453_v51 = vxor.u32 %v452_v50, %v451_v42 }
  0x39   :  { %v454_v52 = vand.u32 16777215, %v453_v51 }
  0x3b   :  { %v680_v55 = vxor.u32 2147483648, %v454_v52 }
  0x3d   :  { %vm457_vm6 = vcmp.ge.s32.totalorder %v680_v55, 2151677952 }
  0x96   :  { %v304_v2 = vpop.f32.mrf.mxu3 }
  0x9e   :  { %v265_v11 = vpop.f32.mrf.mxu0  ;;  %v306_v17 = vpop.f32.mrf.mxu3 }
  0x9f   :  { %v278_v12 = vpop.f32.mrf.mxu1  ;;  %v266_v15 = vadd.f32 %v740_v9, %v265_v11 }
  0xa1   :  { %v279_v18 = vadd.f32 %v278_v12, %v266_v15 }
  0xa6   :  { %v291_v22 = vpop.f32.mrf.mxu2  ;;  %v267_v24 = vpop.f32.mrf.mxu0 }
  0xa7   :  { %v292_v23 = vadd.f32 %v291_v22, %v279_v18  ;;  %v280_v25 = vpop.f32.mrf.mxu1 }
  0xa9   :  { %v305_v28 = vadd.f32 %v304_v2, %v292_v23 }
  0xab   :  { %v308_v29 = vmax.f32 %v305_v28, 0.0 }
  0xad   :  { %v332_v31 = vmul.f32 1.3333334, %v308_v29 }
  0xae   :  { %v293_v32 = vpop.f32.mrf.mxu2 }
  0xaf   :  { %v333_v33 = vsel %vm331_vm3, %v332_v31, 0.0 }
  0xb0   :  { %v350_v34 = vmul.f32 1.25, %v333_v33 }
  0xb2   :  { %v351_v35 = vsel %vm349_vm4, %v350_v34, 0.0 }
  0xb3   :  { %v352_v36 = vpack.c.bf16 %v351_v35, %v351_v35 }
  0xb5   :  { %679 = vmatmul.msk.bf16.vlgmr.msrb.gmra.mxu3 %vm417_vm5, %v352_v36 }
 0x138   :  { %v434_v54 = vpop.f32.mrf.mxu3 }
 0x139   :  { %v435_v56 = vadd.f32 %v741_v53, %v434_v54 }
 0x13b   :  { %v438_v57 = vmax.f32 %v435_v56, 0.0 }
 0x13d   :  { %v458_v58 = vmul.f32 1.3333334, %v438_v57 }
 0x13f   :  { %v459_v59 = vsel %vm457_vm6, %v458_v58, 0.0 }
 0x140   :  { %v460_v60 = vpack.c.bf16 %v459_v59, %v459_v59  ;;  %v436_v61 = vpop.f32.mrf.mxu3 }
 0x142   :  { %701 = vmatmul.msk.bf16.vlgmr.msrb.gmra.mxu0 %vm509_vm7, %v460_v60 }
 0x1bf   :  { %v526_v63 = vpop.f32.mrf.mxu0 }
 0x1c0   :  { %v527_v0 = vadd.f32 %v742_v62, %v526_v63 }
 0x1c2   :  { %531 = vst.msk [vmem:[#allocation3] sm:$0x3] %vm530_vm8, %v527_v0 }
 0x1c3   :  { %542 = dma.vmem_to_hbm [thread:$0]  %s538_s29, 32, %s540_s5, [#allocation4]  }
 0x1c7   :  { %v528_v1 = vpop.f32.mrf.mxu0 }
 0x1c8   :  { %767 = dma.done.wait [#allocation4], 32  }
 0x1c9   :  { %768 = vsyncadd [#allocation4], 4294967264 }
 0x1ca   :  { %547 = vsyncpa [#allocation4], 1 }

</bundles_post_ra>
